<compile_context>
chip_gen: v6e
topology: v6e:2x2x1
jax: 0.10.0
libtpu: 0.0.40
codegen_flags: <defaults>
</compile_context>

<pallas_src>
import functools
import math

import jax
import jax.numpy as jnp
from jax import lax
from jax.experimental import pallas as pl
from jax.experimental.pallas import tpu as pltpu

_LN_EPS = 1e-5          # torch.nn.LayerNorm default eps
_NEG_INF = -1e30        # large finite negative: avoids NaN from masked rows


def _layer_norm(z, gamma, beta):
    mean = jnp.mean(z, axis=-1, keepdims=True)
    var = jnp.mean(jnp.square(z - mean), axis=-1, keepdims=True)
    return (z - mean) * lax.rsqrt(var + _LN_EPS) * gamma + beta


# ---------------------------------------------------------------------------
# In-kernel multi-head attention block (head-major weights, no lane slicing)
# ---------------------------------------------------------------------------
def _mha_block(x, kv, wq_ref, bq_ref, wk_ref, bk_ref, wv_ref, bv_ref,
               wo_ref, bo_ref, *, num_heads, causal):
    """x: (Sq, D) f32, kv: (Sk, D) f32  ->  (Sq, D) f32 attention output."""
    xb = x.astype(jnp.bfloat16)
    kvb = kv.astype(jnp.bfloat16)
    sq, sk = x.shape[0], kv.shape[0]
    if causal:
        row = lax.broadcasted_iota(jnp.int32, (sq, sk), 0)
        col = lax.broadcasted_iota(jnp.int32, (sq, sk), 1)
        mask = col > row
        neg = jnp.float32(_NEG_INF)

    attn_out = bo_ref[...]                        # (1, D) f32; broadcasts
    # TODO(synk): switch to lax.fori_loop(unroll=True) if num_heads grows.
    for h in range(num_heads):
        wq = wq_ref[h]                            # (D, dk) bf16, free slice
        wk = wk_ref[h]
        wv = wv_ref[h]
        wo = wo_ref[h]                            # (dk, D) bf16

        # 1/sqrt(dk) is already folded into wq / bq at init time.
        qh = jnp.dot(xb, wq, preferred_element_type=jnp.float32) + bq_ref[h]
        kh = jnp.dot(kvb, wk, preferred_element_type=jnp.float32) + bk_ref[h]
        vh = jnp.dot(kvb, wv, preferred_element_type=jnp.float32) + bv_ref[h]

        # q @ k^T via dot_general contracting last dims (no explicit .T).
        s = lax.dot_general(qh.astype(jnp.bfloat16), kh.astype(jnp.bfloat16),
                            (((1,), (1,)), ((), ())),
                            preferred_element_type=jnp.float32)     # (Sq, Sk)
        if causal:
            s = jnp.where(mask, neg, s)

        # Softmax with deferred normalization (all f32).
        m = jnp.max(s, axis=-1, keepdims=True)
        e = jnp.exp(s - m)
        l = jnp.sum(e, axis=-1, keepdims=True)
        ctx = jnp.dot(e.astype(jnp.bfloat16), vh.astype(jnp.bfloat16),
                      preferred_element_type=jnp.float32)           # (Sq, dk)
        ctx = ctx * pl.reciprocal(l, approx=True)

        # Output projection: sum of per-head products == concat(heads) @ Wo.
        attn_out = attn_out + jnp.dot(ctx.astype(jnp.bfloat16), wo,
                                      preferred_element_type=jnp.float32)
    return attn_out


# ---------------------------------------------------------------------------
# Fused decoder-layer kernel: self-attn -> cross-attn -> FFN (one grid step)
# ---------------------------------------------------------------------------
def decoder_layer_kernel(
        x_ref, mem_ref,
        wq1_ref, bq1_ref, wk1_ref, bk1_ref, wv1_ref, bv1_ref, wo1_ref, bo1_ref,
        g1_ref, be1_ref,
        wq2_ref, bq2_ref, wk2_ref, bk2_ref, wv2_ref, bv2_ref, wo2_ref, bo2_ref,
        g2_ref, be2_ref,
        w1_ref, b1_ref, w2_ref, b2_ref, gf_ref, bef_ref,
        o_ref, *, num_heads, causal):
    x = x_ref[...]                                 # (Sq, D) f32
    mem = mem_ref[...]                             # (Sm, D) f32

    # Stage 1: self-attention + dropout(identity) + residual + LayerNorm.
    a1 = _mha_block(x, x, wq1_ref, bq1_ref, wk1_ref, bk1_ref, wv1_ref, bv1_ref,
                    wo1_ref, bo1_ref, num_heads=num_heads, causal=causal)
    h1 = _layer_norm(a1 + x, g1_ref[...], be1_ref[...])

    # Stage 2: cross-attention on memory + residual + LayerNorm.
    a2 = _mha_block(h1, mem, wq2_ref, bq2_ref, wk2_ref, bk2_ref, wv2_ref,
                    bv2_ref, wo2_ref, bo2_ref,
                    num_heads=num_heads, causal=causal)
    h2 = _layer_norm(a2 + h1, g2_ref[...], be2_ref[...])

    # Stage 3: feed-forward (Linear -> ReLU -> Linear) + residual + LayerNorm.
    f = jnp.dot(h2.astype(jnp.bfloat16), w1_ref[...],
                preferred_element_type=jnp.float32) + b1_ref[...]
    f = jnp.maximum(f, 0.0)                        # ReLU
    y = jnp.dot(f.astype(jnp.bfloat16), w2_ref[...],
                preferred_element_type=jnp.float32) + b2_ref[...]
    # TODO(synk): nn.Dropout treated as identity (inference semantics).
    o_ref[...] = _layer_norm(y + h2, gf_ref[...], bef_ref[...]).astype(o_ref.dtype)


# ---------------------------------------------------------------------------
# Wrapper
# ---------------------------------------------------------------------------
def transformer_decoder_layer(src, memory, params, *, num_heads, mask=False):
    B, S, D = src.shape
    Bm, Sm, Dm = memory.shape
    assert Bm == B and Dm == D and D % num_heads == 0

    weights = (*params["attn1"], *params["attn2"], *params["ffn"])  # 26 arrays

    kernel = functools.partial(decoder_layer_kernel,
                               num_heads=num_heads, causal=bool(mask))

    def _const_spec(a):
        nd = a.ndim
        return pl.BlockSpec(a.shape, lambda b, _nd=nd: (0,) * _nd)

    in_specs = ([pl.BlockSpec((None, S, D), lambda b: (b, 0, 0)),     # src
                 pl.BlockSpec((None, Sm, D), lambda b: (b, 0, 0))]    # memory
                + [_const_spec(w) for w in weights])

    return pl.pallas_call(
        kernel,
        out_shape=jax.ShapeDtypeStruct((B, S, D), src.dtype),
        grid_spec=pltpu.PrefetchScalarGridSpec(
            num_scalar_prefetch=0,
            grid=(B,),
            in_specs=in_specs,
            out_specs=pl.BlockSpec((None, S, D), lambda b: (b, 0, 0)),
        ),
        compiler_params=pltpu.CompilerParams(
            dimension_semantics=("parallel",)),
    )(src, memory, *weights)


# ---------------------------------------------------------------------------
# Parameter init (torch-style uniform +/- 1/sqrt(fan_in); head-major layout,
# weights pre-transposed to (d_in, d_out), pre-cast to bf16, and 1/sqrt(dk)
# folded into Wq / bq once at init time)
# ---------------------------------------------------------------------------
def _uniform(key, shape, bound):
    return jax.random.uniform(key, shape, jnp.float32, -bound, bound)


def init_mha_params(key, d_model, num_heads):
    dk = d_model // num_heads
    ks = jax.random.split(key, 8)
    bound = 1.0 / math.sqrt(d_model)
    scale = 1.0 / math.sqrt(dk)            # folded into Wq / bq (host, one-time)
    wq = _uniform(ks[0], (num_heads, d_model, dk), bound) * scale
    bq = _uniform(ks[1], (num_heads, 1, dk), bound) * scale
    wk = _uniform(ks[2], (num_heads, d_model, dk), bound)
    bk = _uniform(ks[3], (num_heads, 1, dk), bound)
    wv = _uniform(ks[4], (num_heads, d_model, dk), bound)
    bv = _uniform(ks[5], (num_heads, 1, dk), bound)
    wo = _uniform(ks[6], (num_heads, dk, d_model), bound)
    bo = _uniform(ks[7], (1, d_model), bound)
    g = jnp.ones((1, d_model), jnp.float32)
    beta = jnp.zeros((1, d_model), jnp.float32)
    return (wq.astype(jnp.bfloat16), bq, wk.astype(jnp.bfloat16), bk,
            wv.astype(jnp.bfloat16), bv, wo.astype(jnp.bfloat16), bo, g, beta)


def init_ffn_params(key, d_model, hidden):
    ks = jax.random.split(key, 4)
    b1_bound = 1.0 / math.sqrt(d_model)
    b2_bound = 1.0 / math.sqrt(hidden)
    w1 = _uniform(ks[0], (d_model, hidden), b1_bound)
    b1 = _uniform(ks[1], (1, hidden), b1_bound)
    w2 = _uniform(ks[2], (hidden, d_model), b2_bound)
    b2 = _uniform(ks[3], (1, d_model), b2_bound)
    g = jnp.ones((1, d_model), jnp.float32)
    beta = jnp.zeros((1, d_model), jnp.float32)
    return (w1.astype(jnp.bfloat16), b1, w2.astype(jnp.bfloat16), b2, g, beta)


# ---------------------------------------------------------------------------
# Pure-JAX reference (mirrors the kernel's bf16-operand / f32-accum numerics)
# ---------------------------------------------------------------------------
def _ref_mha(x, kv, params, *, num_heads, causal):
    wq, bq, wk, bk, wv, bv, wo, bo, g, beta = params
    xb = x.astype(jnp.bfloat16)
    kvb = kv.astype(jnp.bfloat16)
    q = jnp.einsum('bsd,hdk->bhsk', xb, wq,
                   preferred_element_type=jnp.float32) + bq[None]
    k = jnp.einsum('bsd,hdk->bhsk', kvb, wk,
                   preferred_element_type=jnp.float32) + bk[None]
    v = jnp.einsum('bsd,hdk->bhsk', kvb, wv,
                   preferred_element_type=jnp.float32) + bv[None]
    s = jnp.einsum('bhqd,bhkd->bhqk', q.astype(jnp.bfloat16),
                   k.astype(jnp.bfloat16), preferred_element_type=jnp.float32)
    if causal:
        sq, sk = x.shape[1], kv.shape[1]
        row = lax.broadcasted_iota(jnp.int32, (sq, sk), 0)
        col = lax.broadcasted_iota(jnp.int32, (sq, sk), 1)
        s = jnp.where((col > row)[None, None], jnp.float32(_NEG_INF), s)
    m = jnp.max(s, axis=-1, keepdims=True)
    e = jnp.exp(s - m)
    l = jnp.sum(e, axis=-1, keepdims=True)
    ctx = jnp.einsum('bhqk,bhkd->bhqd', e.astype(jnp.bfloat16),
                     v.astype(jnp.bfloat16),
                     preferred_element_type=jnp.float32) / l
    attn = jnp.einsum('bhqd,hdf->bqf', ctx.astype(jnp.bfloat16), wo,
                      preferred_element_type=jnp.float32) + bo
    return _layer_norm(attn + x, g, beta)


def _ref_ffn(x, params):
    w1, b1, w2, b2, g, beta = params
    h = jnp.einsum('bsd,dh->bsh', x.astype(jnp.bfloat16), w1,
                   preferred_element_type=jnp.float32) + b1
    h = jnp.maximum(h, 0.0)
    y = jnp.einsum('bsh,hd->bsd', h.astype(jnp.bfloat16), w2,
                   preferred_element_type=jnp.float32) + b2
    return _layer_norm(y + x, g, beta)


def _ref_decoder_layer(src, memory, params, *, num_heads, mask):
    a1 = _ref_mha(src, src, params["attn1"], num_heads=num_heads, causal=mask)
    a2 = _ref_mha(a1, memory, params["attn2"], num_heads=num_heads, causal=mask)
    return _ref_ffn(a2, params["ffn"])


if __name__ == "__main__":
    B, S_src, S_mem = 2, 16, 16
    d_model, num_heads, hidden = 128, 4, 256   # lane-dense feature dims

    root = jax.random.PRNGKey(0)
    k_src, k_mem, k_a1, k_a2, k_ffn = jax.random.split(root, 5)
    src = jax.random.normal(k_src, (B, S_src, d_model), jnp.float32)
    memory = jax.random.normal(k_mem, (B, S_mem, d_model), jnp.float32)

    params = {
        "attn1": init_mha_params(k_a1, d_model, num_heads),
        "attn2": init_mha_params(k_a2, d_model, num_heads),
        "ffn": init_ffn_params(k_ffn, d_model, hidden),
    }

    for use_mask in (False, True):
        out = jax.block_until_ready(
            transformer_decoder_layer(src, memory, params,
                                      num_heads=num_heads, mask=use_mask))
        ref = _ref_decoder_layer(src, memory, params,
                                 num_heads=num_heads, mask=use_mask)
        assert out.shape == (B, S_src, d_model)
        max_err = float(jnp.max(jnp.abs(out - ref)))
        assert jnp.allclose(out, ref, atol=2e-2, rtol=2e-2), max_err

    print("KERNEL_OK")
</pallas_src>

<mosaic_0001>
module attributes {stable_mosaic.version = 11 : i64} {
  func.func @decoder_layer_kernel(%arg0: i32, %arg1: memref<1x16x128xf32, #tpu.memory_space<vmem>>, %arg2: memref<1x16x128xf32, #tpu.memory_space<vmem>>, %arg3: memref<4x128x32xbf16, #tpu.memory_space<vmem>>, %arg4: memref<4x1x32xf32, #tpu.memory_space<vmem>>, %arg5: memref<4x128x32xbf16, #tpu.memory_space<vmem>>, %arg6: memref<4x1x32xf32, #tpu.memory_space<vmem>>, %arg7: memref<4x128x32xbf16, #tpu.memory_space<vmem>>, %arg8: memref<4x1x32xf32, #tpu.memory_space<vmem>>, %arg9: memref<4x32x128xbf16, #tpu.memory_space<vmem>>, %arg10: memref<1x128xf32, #tpu.memory_space<vmem>>, %arg11: memref<1x128xf32, #tpu.memory_space<vmem>>, %arg12: memref<1x128xf32, #tpu.memory_space<vmem>>, %arg13: memref<4x128x32xbf16, #tpu.memory_space<vmem>>, %arg14: memref<4x1x32xf32, #tpu.memory_space<vmem>>, %arg15: memref<4x128x32xbf16, #tpu.memory_space<vmem>>, %arg16: memref<4x1x32xf32, #tpu.memory_space<vmem>>, %arg17: memref<4x128x32xbf16, #tpu.memory_space<vmem>>, %arg18: memref<4x1x32xf32, #tpu.memory_space<vmem>>, %arg19: memref<4x32x128xbf16, #tpu.memory_space<vmem>>, %arg20: memref<1x128xf32, #tpu.memory_space<vmem>>, %arg21: memref<1x128xf32, #tpu.memory_space<vmem>>, %arg22: memref<1x128xf32, #tpu.memory_space<vmem>>, %arg23: memref<128x256xbf16, #tpu.memory_space<vmem>>, %arg24: memref<1x256xf32, #tpu.memory_space<vmem>>, %arg25: memref<256x128xbf16, #tpu.memory_space<vmem>>, %arg26: memref<1x128xf32, #tpu.memory_space<vmem>>, %arg27: memref<1x128xf32, #tpu.memory_space<vmem>>, %arg28: memref<1x128xf32, #tpu.memory_space<vmem>>, %arg29: memref<1x16x128xf32, #tpu.memory_space<vmem>>) attributes {dimension_semantics = [#tpu.dimension_semantics<parallel>], iteration_bounds = array<i64: 2>, scalar_prefetch = 0 : i64, scratch_operands = 0 : i64, tpu.core_type = #tpu.core_type<tc>, window_params = [{transform_indices = @transform_0, window_bounds = array<i64: 1, 16, 128>}, {transform_indices = @transform_1, window_bounds = array<i64: 1, 16, 128>}, {pipeline_mode = #tpu.pipeline_mode<synchronous>, transform_indices = @transform_2, window_bounds = array<i64: 4, 128, 32>}, {pipeline_mode = #tpu.pipeline_mode<synchronous>, transform_indices = @transform_3, window_bounds = array<i64: 4, 1, 32>}, {pipeline_mode = #tpu.pipeline_mode<synchronous>, transform_indices = @transform_4, window_bounds = array<i64: 4, 128, 32>}, {pipeline_mode = #tpu.pipeline_mode<synchronous>, transform_indices = @transform_5, window_bounds = array<i64: 4, 1, 32>}, {pipeline_mode = #tpu.pipeline_mode<synchronous>, transform_indices = @transform_6, window_bounds = array<i64: 4, 128, 32>}, {pipeline_mode = #tpu.pipeline_mode<synchronous>, transform_indices = @transform_7, window_bounds = array<i64: 4, 1, 32>}, {pipeline_mode = #tpu.pipeline_mode<synchronous>, transform_indices = @transform_8, window_bounds = array<i64: 4, 32, 128>}, {pipeline_mode = #tpu.pipeline_mode<synchronous>, transform_indices = @transform_9, window_bounds = array<i64: 1, 128>}, {pipeline_mode = #tpu.pipeline_mode<synchronous>, transform_indices = @transform_10, window_bounds = array<i64: 1, 128>}, {pipeline_mode = #tpu.pipeline_mode<synchronous>, transform_indices = @transform_11, window_bounds = array<i64: 1, 128>}, {pipeline_mode = #tpu.pipeline_mode<synchronous>, transform_indices = @transform_12, window_bounds = array<i64: 4, 128, 32>}, {pipeline_mode = #tpu.pipeline_mode<synchronous>, transform_indices = @transform_13, window_bounds = array<i64: 4, 1, 32>}, {pipeline_mode = #tpu.pipeline_mode<synchronous>, transform_indices = @transform_14, window_bounds = array<i64: 4, 128, 32>}, {pipeline_mode = #tpu.pipeline_mode<synchronous>, transform_indices = @transform_15, window_bounds = array<i64: 4, 1, 32>}, {pipeline_mode = #tpu.pipeline_mode<synchronous>, transform_indices = @transform_16, window_bounds = array<i64: 4, 128, 32>}, {pipeline_mode = #tpu.pipeline_mode<synchronous>, transform_indices = @transform_17, window_bounds = array<i64: 4, 1, 32>}, {pipeline_mode = #tpu.pipeline_mode<synchronous>, transform_indices = @transform_18, window_bounds = array<i64: 4, 32, 128>}, {pipeline_mode = #tpu.pipeline_mode<synchronous>, transform_indices = @transform_19, window_bounds = array<i64: 1, 128>}, {pipeline_mode = #tpu.pipeline_mode<synchronous>, transform_indices = @transform_20, window_bounds = array<i64: 1, 128>}, {pipeline_mode = #tpu.pipeline_mode<synchronous>, transform_indices = @transform_21, window_bounds = array<i64: 1, 128>}, {pipeline_mode = #tpu.pipeline_mode<synchronous>, transform_indices = @transform_22, window_bounds = array<i64: 128, 256>}, {pipeline_mode = #tpu.pipeline_mode<synchronous>, transform_indices = @transform_23, window_bounds = array<i64: 1, 256>}, {pipeline_mode = #tpu.pipeline_mode<synchronous>, transform_indices = @transform_24, window_bounds = array<i64: 256, 128>}, {pipeline_mode = #tpu.pipeline_mode<synchronous>, transform_indices = @transform_25, window_bounds = array<i64: 1, 128>}, {pipeline_mode = #tpu.pipeline_mode<synchronous>, transform_indices = @transform_26, window_bounds = array<i64: 1, 128>}, {pipeline_mode = #tpu.pipeline_mode<synchronous>, transform_indices = @transform_27, window_bounds = array<i64: 1, 128>}, {transform_indices = @transform_28, window_bounds = array<i64: 1, 16, 128>}]} {
    %c0 = arith.constant 0 : index
    %c0_0 = arith.constant 0 : index
    %c0_1 = arith.constant 0 : index
    %0 = vector.load %arg1[%c0, %c0_0, %c0_1] : memref<1x16x128xf32, #tpu.memory_space<vmem>>, vector<1x16x128xf32>
    %1 = vector.shape_cast %0 : vector<1x16x128xf32> to vector<16x128xf32>
    %c0_2 = arith.constant 0 : index
    %c0_3 = arith.constant 0 : index
    %c0_4 = arith.constant 0 : index
    %2 = vector.load %arg2[%c0_2, %c0_3, %c0_4] : memref<1x16x128xf32, #tpu.memory_space<vmem>>, vector<1x16x128xf32>
    %3 = vector.shape_cast %2 : vector<1x16x128xf32> to vector<16x128xf32>
    %4 = arith.truncf %1 : vector<16x128xf32> to vector<16x128xbf16>
    %5 = arith.truncf %1 : vector<16x128xf32> to vector<16x128xbf16>
    %c0_5 = arith.constant 0 : index
    %c0_6 = arith.constant 0 : index
    %6 = vector.load %arg10[%c0_5, %c0_6] : memref<1x128xf32, #tpu.memory_space<vmem>>, vector<1x128xf32>
    %c0_7 = arith.constant 0 : index
    %c0_8 = arith.constant 0 : index
    %c0_9 = arith.constant 0 : index
    %7 = vector.load %arg3[%c0_7, %c0_8, %c0_9] : memref<4x128x32xbf16, #tpu.memory_space<vmem>>, vector<1x128x32xbf16>
    %8 = vector.shape_cast %7 : vector<1x128x32xbf16> to vector<128x32xbf16>
    %c0_10 = arith.constant 0 : index
    %c0_11 = arith.constant 0 : index
    %c0_12 = arith.constant 0 : index
    %9 = vector.load %arg5[%c0_10, %c0_11, %c0_12] : memref<4x128x32xbf16, #tpu.memory_space<vmem>>, vector<1x128x32xbf16>
    %10 = vector.shape_cast %9 : vector<1x128x32xbf16> to vector<128x32xbf16>
    %c0_13 = arith.constant 0 : index
    %c0_14 = arith.constant 0 : index
    %c0_15 = arith.constant 0 : index
    %11 = vector.load %arg7[%c0_13, %c0_14, %c0_15] : memref<4x128x32xbf16, #tpu.memory_space<vmem>>, vector<1x128x32xbf16>
    %12 = vector.shape_cast %11 : vector<1x128x32xbf16> to vector<128x32xbf16>
    %c0_16 = arith.constant 0 : index
    %c0_17 = arith.constant 0 : index
    %c0_18 = arith.constant 0 : index
    %13 = vector.load %arg9[%c0_16, %c0_17, %c0_18] : memref<4x32x128xbf16, #tpu.memory_space<vmem>>, vector<1x32x128xbf16>
    %14 = vector.shape_cast %13 : vector<1x32x128xbf16> to vector<32x128xbf16>
    %cst = arith.constant dense<0.000000e+00> : vector<16x32xf32>
    %15 = tpu.matmul %4, %8, %cst {dimension_numbers = #tpu.dot_dimension_numbers<[1], [0], [0], [1], [0, 0, 1, 1], [], []>} : vector<16x128xbf16>, vector<128x32xbf16>, vector<16x32xf32> -> vector<16x32xf32>
    %c0_19 = arith.constant 0 : index
    %c0_20 = arith.constant 0 : index
    %c0_21 = arith.constant 0 : index
    %16 = vector.load %arg4[%c0_19, %c0_20, %c0_21] : memref<4x1x32xf32, #tpu.memory_space<vmem>>, vector<1x1x32xf32>
    %17 = vector.shape_cast %16 : vector<1x1x32xf32> to vector<1x32xf32>
    %18 = vector.broadcast %17 : vector<1x32xf32> to vector<16x32xf32>
    %19 = arith.addf %15, %18 : vector<16x32xf32>
    %cst_22 = arith.constant dense<0.000000e+00> : vector<16x32xf32>
    %20 = tpu.matmul %5, %10, %cst_22 {dimension_numbers = #tpu.dot_dimension_numbers<[1], [0], [0], [1], [0, 0, 1, 1], [], []>} : vector<16x128xbf16>, vector<128x32xbf16>, vector<16x32xf32> -> vector<16x32xf32>
    %c0_23 = arith.constant 0 : index
    %c0_24 = arith.constant 0 : index
    %c0_25 = arith.constant 0 : index
    %21 = vector.load %arg6[%c0_23, %c0_24, %c0_25] : memref<4x1x32xf32, #tpu.memory_space<vmem>>, vector<1x1x32xf32>
    %22 = vector.shape_cast %21 : vector<1x1x32xf32> to vector<1x32xf32>
    %23 = vector.broadcast %22 : vector<1x32xf32> to vector<16x32xf32>
    %24 = arith.addf %20, %23 : vector<16x32xf32>
    %cst_26 = arith.constant dense<0.000000e+00> : vector<16x32xf32>
    %25 = tpu.matmul %5, %12, %cst_26 {dimension_numbers = #tpu.dot_dimension_numbers<[1], [0], [0], [1], [0, 0, 1, 1], [], []>} : vector<16x128xbf16>, vector<128x32xbf16>, vector<16x32xf32> -> vector<16x32xf32>
    %c0_27 = arith.constant 0 : index
    %c0_28 = arith.constant 0 : index
    %c0_29 = arith.constant 0 : index
    %26 = vector.load %arg8[%c0_27, %c0_28, %c0_29] : memref<4x1x32xf32, #tpu.memory_space<vmem>>, vector<1x1x32xf32>
    %27 = vector.shape_cast %26 : vector<1x1x32xf32> to vector<1x32xf32>
    %28 = vector.broadcast %27 : vector<1x32xf32> to vector<16x32xf32>
    %29 = arith.addf %25, %28 : vector<16x32xf32>
    %30 = arith.truncf %19 : vector<16x32xf32> to vector<16x32xbf16>
    %31 = arith.truncf %24 : vector<16x32xf32> to vector<16x32xbf16>
    %cst_30 = arith.constant dense<0.000000e+00> : vector<16x16xf32>
    %32 = tpu.matmul %30, %31, %cst_30 {dimension_numbers = #tpu.dot_dimension_numbers<[1], [1], [0], [0], [0, 0, 1, 0], [], []>} : vector<16x32xbf16>, vector<16x32xbf16>, vector<16x16xf32> -> vector<16x16xf32>
    %cst_31 = arith.constant dense<0xFF800000> : vector<16xf32>
    %33 = vector.multi_reduction <maximumf>, %32, %cst_31 [1] : vector<16x16xf32> to vector<16xf32>
    %34 = vector.shape_cast %33 : vector<16xf32> to vector<16x1xf32>
    %35 = vector.broadcast %34 : vector<16x1xf32> to vector<16x16xf32>
    %36 = arith.subf %32, %35 : vector<16x16xf32>
    %37 = math.exp %36 : vector<16x16xf32>
    %cst_32 = arith.constant dense<0.000000e+00> : vector<16xf32>
    %38 = vector.multi_reduction <add>, %37, %cst_32 [1] : vector<16x16xf32> to vector<16xf32>
    %39 = vector.shape_cast %38 : vector<16xf32> to vector<16x1xf32>
    %40 = arith.truncf %37 : vector<16x16xf32> to vector<16x16xbf16>
    %41 = arith.truncf %29 : vector<16x32xf32> to vector<16x32xbf16>
    %cst_33 = arith.constant dense<0.000000e+00> : vector<16x32xf32>
    %42 = tpu.matmul %40, %41, %cst_33 {dimension_numbers = #tpu.dot_dimension_numbers<[1], [0], [0], [1], [0, 0, 1, 1], [], []>} : vector<16x16xbf16>, vector<16x32xbf16>, vector<16x32xf32> -> vector<16x32xf32>
    %43 = tpu.reciprocal %39 {approx = true} : vector<16x1xf32> -> vector<16x1xf32>
    %44 = vector.broadcast %43 : vector<16x1xf32> to vector<16x32xf32>
    %45 = arith.mulf %42, %44 : vector<16x32xf32>
    %46 = arith.truncf %45 : vector<16x32xf32> to vector<16x32xbf16>
    %cst_34 = arith.constant dense<0.000000e+00> : vector<16x128xf32>
    %47 = tpu.matmul %46, %14, %cst_34 {dimension_numbers = #tpu.dot_dimension_numbers<[1], [0], [0], [1], [0, 0, 1, 1], [], []>} : vector<16x32xbf16>, vector<32x128xbf16>, vector<16x128xf32> -> vector<16x128xf32>
    %48 = vector.broadcast %6 : vector<1x128xf32> to vector<16x128xf32>
    %49 = arith.addf %48, %47 : vector<16x128xf32>
    %c1 = arith.constant 1 : index
    %c0_35 = arith.constant 0 : index
    %c0_36 = arith.constant 0 : index
    %50 = vector.load %arg3[%c1, %c0_35, %c0_36] : memref<4x128x32xbf16, #tpu.memory_space<vmem>>, vector<1x128x32xbf16>
    %51 = vector.shape_cast %50 : vector<1x128x32xbf16> to vector<128x32xbf16>
    %c1_37 = arith.constant 1 : index
    %c0_38 = arith.constant 0 : index
    %c0_39 = arith.constant 0 : index
    %52 = vector.load %arg5[%c1_37, %c0_38, %c0_39] : memref<4x128x32xbf16, #tpu.memory_space<vmem>>, vector<1x128x32xbf16>
    %53 = vector.shape_cast %52 : vector<1x128x32xbf16> to vector<128x32xbf16>
    %c1_40 = arith.constant 1 : index
    %c0_41 = arith.constant 0 : index
    %c0_42 = arith.constant 0 : index
    %54 = vector.load %arg7[%c1_40, %c0_41, %c0_42] : memref<4x128x32xbf16, #tpu.memory_space<vmem>>, vector<1x128x32xbf16>
    %55 = vector.shape_cast %54 : vector<1x128x32xbf16> to vector<128x32xbf16>
    %c1_43 = arith.constant 1 : index
    %c0_44 = arith.constant 0 : index
    %c0_45 = arith.constant 0 : index
    %56 = vector.load %arg9[%c1_43, %c0_44, %c0_45] : memref<4x32x128xbf16, #tpu.memory_space<vmem>>, vector<1x32x128xbf16>
    %57 = vector.shape_cast %56 : vector<1x32x128xbf16> to vector<32x128xbf16>
    %cst_46 = arith.constant dense<0.000000e+00> : vector<16x32xf32>
    %58 = tpu.matmul %4, %51, %cst_46 {dimension_numbers = #tpu.dot_dimension_numbers<[1], [0], [0], [1], [0, 0, 1, 1], [], []>} : vector<16x128xbf16>, vector<128x32xbf16>, vector<16x32xf32> -> vector<16x32xf32>
    %c1_47 = arith.constant 1 : index
    %c0_48 = arith.constant 0 : index
    %c0_49 = arith.constant 0 : index
    %59 = vector.load %arg4[%c1_47, %c0_48, %c0_49] : memref<4x1x32xf32, #tpu.memory_space<vmem>>, vector<1x1x32xf32>
    %60 = vector.shape_cast %59 : vector<1x1x32xf32> to vector<1x32xf32>
    %61 = vector.broadcast %60 : vector<1x32xf32> to vector<16x32xf32>
    %62 = arith.addf %58, %61 : vector<16x32xf32>
    %cst_50 = arith.constant dense<0.000000e+00> : vector<16x32xf32>
    %63 = tpu.matmul %5, %53, %cst_50 {dimension_numbers = #tpu.dot_dimension_numbers<[1], [0], [0], [1], [0, 0, 1, 1], [], []>} : vector<16x128xbf16>, vector<128x32xbf16>, vector<16x32xf32> -> vector<16x32xf32>
    %c1_51 = arith.constant 1 : index
    %c0_52 = arith.constant 0 : index
    %c0_53 = arith.constant 0 : index
    %64 = vector.load %arg6[%c1_51, %c0_52, %c0_53] : memref<4x1x32xf32, #tpu.memory_space<vmem>>, vector<1x1x32xf32>
    %65 = vector.shape_cast %64 : vector<1x1x32xf32> to vector<1x32xf32>
    %66 = vector.broadcast %65 : vector<1x32xf32> to vector<16x32xf32>
    %67 = arith.addf %63, %66 : vector<16x32xf32>
    %cst_54 = arith.constant dense<0.000000e+00> : vector<16x32xf32>
    %68 = tpu.matmul %5, %55, %cst_54 {dimension_numbers = #tpu.dot_dimension_numbers<[1], [0], [0], [1], [0, 0, 1, 1], [], []>} : vector<16x128xbf16>, vector<128x32xbf16>, vector<16x32xf32> -> vector<16x32xf32>
    %c1_55 = arith.constant 1 : index
    %c0_56 = arith.constant 0 : index
    %c0_57 = arith.constant 0 : index
    %69 = vector.load %arg8[%c1_55, %c0_56, %c0_57] : memref<4x1x32xf32, #tpu.memory_space<vmem>>, vector<1x1x32xf32>
    %70 = vector.shape_cast %69 : vector<1x1x32xf32> to vector<1x32xf32>
    %71 = vector.broadcast %70 : vector<1x32xf32> to vector<16x32xf32>
    %72 = arith.addf %68, %71 : vector<16x32xf32>
    %73 = arith.truncf %62 : vector<16x32xf32> to vector<16x32xbf16>
    %74 = arith.truncf %67 : vector<16x32xf32> to vector<16x32xbf16>
    %cst_58 = arith.constant dense<0.000000e+00> : vector<16x16xf32>
    %75 = tpu.matmul %73, %74, %cst_58 {dimension_numbers = #tpu.dot_dimension_numbers<[1], [1], [0], [0], [0, 0, 1, 0], [], []>} : vector<16x32xbf16>, vector<16x32xbf16>, vector<16x16xf32> -> vector<16x16xf32>
    %cst_59 = arith.constant dense<0xFF800000> : vector<16xf32>
    %76 = vector.multi_reduction <maximumf>, %75, %cst_59 [1] : vector<16x16xf32> to vector<16xf32>
    %77 = vector.shape_cast %76 : vector<16xf32> to vector<16x1xf32>
    %78 = vector.broadcast %77 : vector<16x1xf32> to vector<16x16xf32>
    %79 = arith.subf %75, %78 : vector<16x16xf32>
    %80 = math.exp %79 : vector<16x16xf32>
    %cst_60 = arith.constant dense<0.000000e+00> : vector<16xf32>
    %81 = vector.multi_reduction <add>, %80, %cst_60 [1] : vector<16x16xf32> to vector<16xf32>
    %82 = vector.shape_cast %81 : vector<16xf32> to vector<16x1xf32>
    %83 = arith.truncf %80 : vector<16x16xf32> to vector<16x16xbf16>
    %84 = arith.truncf %72 : vector<16x32xf32> to vector<16x32xbf16>
    %cst_61 = arith.constant dense<0.000000e+00> : vector<16x32xf32>
    %85 = tpu.matmul %83, %84, %cst_61 {dimension_numbers = #tpu.dot_dimension_numbers<[1], [0], [0], [1], [0, 0, 1, 1], [], []>} : vector<16x16xbf16>, vector<16x32xbf16>, vector<16x32xf32> -> vector<16x32xf32>
    %86 = tpu.reciprocal %82 {approx = true} : vector<16x1xf32> -> vector<16x1xf32>
    %87 = vector.broadcast %86 : vector<16x1xf32> to vector<16x32xf32>
    %88 = arith.mulf %85, %87 : vector<16x32xf32>
    %89 = arith.truncf %88 : vector<16x32xf32> to vector<16x32xbf16>
    %cst_62 = arith.constant dense<0.000000e+00> : vector<16x128xf32>
    %90 = tpu.matmul %89, %57, %cst_62 {dimension_numbers = #tpu.dot_dimension_numbers<[1], [0], [0], [1], [0, 0, 1, 1], [], []>} : vector<16x32xbf16>, vector<32x128xbf16>, vector<16x128xf32> -> vector<16x128xf32>
    %91 = arith.addf %49, %90 : vector<16x128xf32>
    %c2 = arith.constant 2 : index
    %c0_63 = arith.constant 0 : index
    %c0_64 = arith.constant 0 : index
    %92 = vector.load %arg3[%c2, %c0_63, %c0_64] : memref<4x128x32xbf16, #tpu.memory_space<vmem>>, vector<1x128x32xbf16>
    %93 = vector.shape_cast %92 : vector<1x128x32xbf16> to vector<128x32xbf16>
    %c2_65 = arith.constant 2 : index
    %c0_66 = arith.constant 0 : index
    %c0_67 = arith.constant 0 : index
    %94 = vector.load %arg5[%c2_65, %c0_66, %c0_67] : memref<4x128x32xbf16, #tpu.memory_space<vmem>>, vector<1x128x32xbf16>
    %95 = vector.shape_cast %94 : vector<1x128x32xbf16> to vector<128x32xbf16>
    %c2_68 = arith.constant 2 : index
    %c0_69 = arith.constant 0 : index
    %c0_70 = arith.constant 0 : index
    %96 = vector.load %arg7[%c2_68, %c0_69, %c0_70] : memref<4x128x32xbf16, #tpu.memory_space<vmem>>, vector<1x128x32xbf16>
    %97 = vector.shape_cast %96 : vector<1x128x32xbf16> to vector<128x32xbf16>
    %c2_71 = arith.constant 2 : index
    %c0_72 = arith.constant 0 : index
    %c0_73 = arith.constant 0 : index
    %98 = vector.load %arg9[%c2_71, %c0_72, %c0_73] : memref<4x32x128xbf16, #tpu.memory_space<vmem>>, vector<1x32x128xbf16>
    %99 = vector.shape_cast %98 : vector<1x32x128xbf16> to vector<32x128xbf16>
    %cst_74 = arith.constant dense<0.000000e+00> : vector<16x32xf32>
    %100 = tpu.matmul %4, %93, %cst_74 {dimension_numbers = #tpu.dot_dimension_numbers<[1], [0], [0], [1], [0, 0, 1, 1], [], []>} : vector<16x128xbf16>, vector<128x32xbf16>, vector<16x32xf32> -> vector<16x32xf32>
    %c2_75 = arith.constant 2 : index
    %c0_76 = arith.constant 0 : index
    %c0_77 = arith.constant 0 : index
    %101 = vector.load %arg4[%c2_75, %c0_76, %c0_77] : memref<4x1x32xf32, #tpu.memory_space<vmem>>, vector<1x1x32xf32>
    %102 = vector.shape_cast %101 : vector<1x1x32xf32> to vector<1x32xf32>
    %103 = vector.broadcast %102 : vector<1x32xf32> to vector<16x32xf32>
    %104 = arith.addf %100, %103 : vector<16x32xf32>
    %cst_78 = arith.constant dense<0.000000e+00> : vector<16x32xf32>
    %105 = tpu.matmul %5, %95, %cst_78 {dimension_numbers = #tpu.dot_dimension_numbers<[1], [0], [0], [1], [0, 0, 1, 1], [], []>} : vector<16x128xbf16>, vector<128x32xbf16>, vector<16x32xf32> -> vector<16x32xf32>
    %c2_79 = arith.constant 2 : index
    %c0_80 = arith.constant 0 : index
    %c0_81 = arith.constant 0 : index
    %106 = vector.load %arg6[%c2_79, %c0_80, %c0_81] : memref<4x1x32xf32, #tpu.memory_space<vmem>>, vector<1x1x32xf32>
    %107 = vector.shape_cast %106 : vector<1x1x32xf32> to vector<1x32xf32>
    %108 = vector.broadcast %107 : vector<1x32xf32> to vector<16x32xf32>
    %109 = arith.addf %105, %108 : vector<16x32xf32>
    %cst_82 = arith.constant dense<0.000000e+00> : vector<16x32xf32>
    %110 = tpu.matmul %5, %97, %cst_82 {dimension_numbers = #tpu.dot_dimension_numbers<[1], [0], [0], [1], [0, 0, 1, 1], [], []>} : vector<16x128xbf16>, vector<128x32xbf16>, vector<16x32xf32> -> vector<16x32xf32>
    %c2_83 = arith.constant 2 : index
    %c0_84 = arith.constant 0 : index
    %c0_85 = arith.constant 0 : index
    %111 = vector.load %arg8[%c2_83, %c0_84, %c0_85] : memref<4x1x32xf32, #tpu.memory_space<vmem>>, vector<1x1x32xf32>
    %112 = vector.shape_cast %111 : vector<1x1x32xf32> to vector<1x32xf32>
    %113 = vector.broadcast %112 : vector<1x32xf32> to vector<16x32xf32>
    %114 = arith.addf %110, %113 : vector<16x32xf32>
    %115 = arith.truncf %104 : vector<16x32xf32> to vector<16x32xbf16>
    %116 = arith.truncf %109 : vector<16x32xf32> to vector<16x32xbf16>
    %cst_86 = arith.constant dense<0.000000e+00> : vector<16x16xf32>
    %117 = tpu.matmul %115, %116, %cst_86 {dimension_numbers = #tpu.dot_dimension_numbers<[1], [1], [0], [0], [0, 0, 1, 0], [], []>} : vector<16x32xbf16>, vector<16x32xbf16>, vector<16x16xf32> -> vector<16x16xf32>
    %cst_87 = arith.constant dense<0xFF800000> : vector<16xf32>
    %118 = vector.multi_reduction <maximumf>, %117, %cst_87 [1] : vector<16x16xf32> to vector<16xf32>
    %119 = vector.shape_cast %118 : vector<16xf32> to vector<16x1xf32>
    %120 = vector.broadcast %119 : vector<16x1xf32> to vector<16x16xf32>
    %121 = arith.subf %117, %120 : vector<16x16xf32>
    %122 = math.exp %121 : vector<16x16xf32>
    %cst_88 = arith.constant dense<0.000000e+00> : vector<16xf32>
    %123 = vector.multi_reduction <add>, %122, %cst_88 [1] : vector<16x16xf32> to vector<16xf32>
    %124 = vector.shape_cast %123 : vector<16xf32> to vector<16x1xf32>
    %125 = arith.truncf %122 : vector<16x16xf32> to vector<16x16xbf16>
    %126 = arith.truncf %114 : vector<16x32xf32> to vector<16x32xbf16>
    %cst_89 = arith.constant dense<0.000000e+00> : vector<16x32xf32>
    %127 = tpu.matmul %125, %126, %cst_89 {dimension_numbers = #tpu.dot_dimension_numbers<[1], [0], [0], [1], [0, 0, 1, 1], [], []>} : vector<16x16xbf16>, vector<16x32xbf16>, vector<16x32xf32> -> vector<16x32xf32>
    %128 = tpu.reciprocal %124 {approx = true} : vector<16x1xf32> -> vector<16x1xf32>
    %129 = vector.broadcast %128 : vector<16x1xf32> to vector<16x32xf32>
    %130 = arith.mulf %127, %129 : vector<16x32xf32>
    %131 = arith.truncf %130 : vector<16x32xf32> to vector<16x32xbf16>
    %cst_90 = arith.constant dense<0.000000e+00> : vector<16x128xf32>
    %132 = tpu.matmul %131, %99, %cst_90 {dimension_numbers = #tpu.dot_dimension_numbers<[1], [0], [0], [1], [0, 0, 1, 1], [], []>} : vector<16x32xbf16>, vector<32x128xbf16>, vector<16x128xf32> -> vector<16x128xf32>
    %133 = arith.addf %91, %132 : vector<16x128xf32>
    %c3 = arith.constant 3 : index
    %c0_91 = arith.constant 0 : index
    %c0_92 = arith.constant 0 : index
    %134 = vector.load %arg3[%c3, %c0_91, %c0_92] : memref<4x128x32xbf16, #tpu.memory_space<vmem>>, vector<1x128x32xbf16>
    %135 = vector.shape_cast %134 : vector<1x128x32xbf16> to vector<128x32xbf16>
    %c3_93 = arith.constant 3 : index
    %c0_94 = arith.constant 0 : index
    %c0_95 = arith.constant 0 : index
    %136 = vector.load %arg5[%c3_93, %c0_94, %c0_95] : memref<4x128x32xbf16, #tpu.memory_space<vmem>>, vector<1x128x32xbf16>
    %137 = vector.shape_cast %136 : vector<1x128x32xbf16> to vector<128x32xbf16>
    %c3_96 = arith.constant 3 : index
    %c0_97 = arith.constant 0 : index
    %c0_98 = arith.constant 0 : index
    %138 = vector.load %arg7[%c3_96, %c0_97, %c0_98] : memref<4x128x32xbf16, #tpu.memory_space<vmem>>, vector<1x128x32xbf16>
    %139 = vector.shape_cast %138 : vector<1x128x32xbf16> to vector<128x32xbf16>
    %c3_99 = arith.constant 3 : index
    %c0_100 = arith.constant 0 : index
    %c0_101 = arith.constant 0 : index
    %140 = vector.load %arg9[%c3_99, %c0_100, %c0_101] : memref<4x32x128xbf16, #tpu.memory_space<vmem>>, vector<1x32x128xbf16>
    %141 = vector.shape_cast %140 : vector<1x32x128xbf16> to vector<32x128xbf16>
    %cst_102 = arith.constant dense<0.000000e+00> : vector<16x32xf32>
    %142 = tpu.matmul %4, %135, %cst_102 {dimension_numbers = #tpu.dot_dimension_numbers<[1], [0], [0], [1], [0, 0, 1, 1], [], []>} : vector<16x128xbf16>, vector<128x32xbf16>, vector<16x32xf32> -> vector<16x32xf32>
    %c3_103 = arith.constant 3 : index
    %c0_104 = arith.constant 0 : index
    %c0_105 = arith.constant 0 : index
    %143 = vector.load %arg4[%c3_103, %c0_104, %c0_105] : memref<4x1x32xf32, #tpu.memory_space<vmem>>, vector<1x1x32xf32>
    %144 = vector.shape_cast %143 : vector<1x1x32xf32> to vector<1x32xf32>
    %145 = vector.broadcast %144 : vector<1x32xf32> to vector<16x32xf32>
    %146 = arith.addf %142, %145 : vector<16x32xf32>
    %cst_106 = arith.constant dense<0.000000e+00> : vector<16x32xf32>
    %147 = tpu.matmul %5, %137, %cst_106 {dimension_numbers = #tpu.dot_dimension_numbers<[1], [0], [0], [1], [0, 0, 1, 1], [], []>} : vector<16x128xbf16>, vector<128x32xbf16>, vector<16x32xf32> -> vector<16x32xf32>
    %c3_107 = arith.constant 3 : index
    %c0_108 = arith.constant 0 : index
    %c0_109 = arith.constant 0 : index
    %148 = vector.load %arg6[%c3_107, %c0_108, %c0_109] : memref<4x1x32xf32, #tpu.memory_space<vmem>>, vector<1x1x32xf32>
    %149 = vector.shape_cast %148 : vector<1x1x32xf32> to vector<1x32xf32>
    %150 = vector.broadcast %149 : vector<1x32xf32> to vector<16x32xf32>
    %151 = arith.addf %147, %150 : vector<16x32xf32>
    %cst_110 = arith.constant dense<0.000000e+00> : vector<16x32xf32>
    %152 = tpu.matmul %5, %139, %cst_110 {dimension_numbers = #tpu.dot_dimension_numbers<[1], [0], [0], [1], [0, 0, 1, 1], [], []>} : vector<16x128xbf16>, vector<128x32xbf16>, vector<16x32xf32> -> vector<16x32xf32>
    %c3_111 = arith.constant 3 : index
    %c0_112 = arith.constant 0 : index
    %c0_113 = arith.constant 0 : index
    %153 = vector.load %arg8[%c3_111, %c0_112, %c0_113] : memref<4x1x32xf32, #tpu.memory_space<vmem>>, vector<1x1x32xf32>
    %154 = vector.shape_cast %153 : vector<1x1x32xf32> to vector<1x32xf32>
    %155 = vector.broadcast %154 : vector<1x32xf32> to vector<16x32xf32>
    %156 = arith.addf %152, %155 : vector<16x32xf32>
    %157 = arith.truncf %146 : vector<16x32xf32> to vector<16x32xbf16>
    %158 = arith.truncf %151 : vector<16x32xf32> to vector<16x32xbf16>
    %cst_114 = arith.constant dense<0.000000e+00> : vector<16x16xf32>
    %159 = tpu.matmul %157, %158, %cst_114 {dimension_numbers = #tpu.dot_dimension_numbers<[1], [1], [0], [0], [0, 0, 1, 0], [], []>} : vector<16x32xbf16>, vector<16x32xbf16>, vector<16x16xf32> -> vector<16x16xf32>
    %cst_115 = arith.constant dense<0xFF800000> : vector<16xf32>
    %160 = vector.multi_reduction <maximumf>, %159, %cst_115 [1] : vector<16x16xf32> to vector<16xf32>
    %161 = vector.shape_cast %160 : vector<16xf32> to vector<16x1xf32>
    %162 = vector.broadcast %161 : vector<16x1xf32> to vector<16x16xf32>
    %163 = arith.subf %159, %162 : vector<16x16xf32>
    %164 = math.exp %163 : vector<16x16xf32>
    %cst_116 = arith.constant dense<0.000000e+00> : vector<16xf32>
    %165 = vector.multi_reduction <add>, %164, %cst_116 [1] : vector<16x16xf32> to vector<16xf32>
    %166 = vector.shape_cast %165 : vector<16xf32> to vector<16x1xf32>
    %167 = arith.truncf %164 : vector<16x16xf32> to vector<16x16xbf16>
    %168 = arith.truncf %156 : vector<16x32xf32> to vector<16x32xbf16>
    %cst_117 = arith.constant dense<0.000000e+00> : vector<16x32xf32>
    %169 = tpu.matmul %167, %168, %cst_117 {dimension_numbers = #tpu.dot_dimension_numbers<[1], [0], [0], [1], [0, 0, 1, 1], [], []>} : vector<16x16xbf16>, vector<16x32xbf16>, vector<16x32xf32> -> vector<16x32xf32>
    %170 = tpu.reciprocal %166 {approx = true} : vector<16x1xf32> -> vector<16x1xf32>
    %171 = vector.broadcast %170 : vector<16x1xf32> to vector<16x32xf32>
    %172 = arith.mulf %169, %171 : vector<16x32xf32>
    %173 = arith.truncf %172 : vector<16x32xf32> to vector<16x32xbf16>
    %cst_118 = arith.constant dense<0.000000e+00> : vector<16x128xf32>
    %174 = tpu.matmul %173, %141, %cst_118 {dimension_numbers = #tpu.dot_dimension_numbers<[1], [0], [0], [1], [0, 0, 1, 1], [], []>} : vector<16x32xbf16>, vector<32x128xbf16>, vector<16x128xf32> -> vector<16x128xf32>
    %175 = arith.addf %133, %174 : vector<16x128xf32>
    %176 = arith.addf %175, %1 : vector<16x128xf32>
    %c0_119 = arith.constant 0 : index
    %c0_120 = arith.constant 0 : index
    %177 = vector.load %arg11[%c0_119, %c0_120] : memref<1x128xf32, #tpu.memory_space<vmem>>, vector<1x128xf32>
    %c0_121 = arith.constant 0 : index
    %c0_122 = arith.constant 0 : index
    %178 = vector.load %arg12[%c0_121, %c0_122] : memref<1x128xf32, #tpu.memory_space<vmem>>, vector<1x128xf32>
    %cst_123 = arith.constant dense<0.000000e+00> : vector<16xf32>
    %179 = vector.multi_reduction <add>, %176, %cst_123 [1] : vector<16x128xf32> to vector<16xf32>
    %180 = vector.shape_cast %179 : vector<16xf32> to vector<16x1xf32>
    %cst_124 = arith.constant 1.280000e+02 : f32
    %181 = vector.broadcast %cst_124 : f32 to vector<16x1xf32>
    %182 = arith.divf %180, %181 : vector<16x1xf32>
    %183 = vector.broadcast %182 : vector<16x1xf32> to vector<16x128xf32>
    %184 = arith.subf %176, %183 : vector<16x128xf32>
    %185 = arith.mulf %184, %184 : vector<16x128xf32>
    %cst_125 = arith.constant dense<0.000000e+00> : vector<16xf32>
    %186 = vector.multi_reduction <add>, %185, %cst_125 [1] : vector<16x128xf32> to vector<16xf32>
    %187 = vector.shape_cast %186 : vector<16xf32> to vector<16x1xf32>
    %cst_126 = arith.constant 1.280000e+02 : f32
    %188 = vector.broadcast %cst_126 : f32 to vector<16x1xf32>
    %189 = arith.divf %187, %188 : vector<16x1xf32>
    %190 = vector.broadcast %182 : vector<16x1xf32> to vector<16x128xf32>
    %191 = arith.subf %176, %190 : vector<16x128xf32>
    %cst_127 = arith.constant 9.99999974E-6 : f32
    %192 = vector.broadcast %cst_127 : f32 to vector<16x1xf32>
    %193 = arith.addf %189, %192 : vector<16x1xf32>
    %194 = math.rsqrt %193 : vector<16x1xf32>
    %195 = vector.broadcast %194 : vector<16x1xf32> to vector<16x128xf32>
    %196 = arith.mulf %191, %195 : vector<16x128xf32>
    %197 = vector.broadcast %177 : vector<1x128xf32> to vector<16x128xf32>
    %198 = arith.mulf %196, %197 : vector<16x128xf32>
    %199 = vector.broadcast %178 : vector<1x128xf32> to vector<16x128xf32>
    %200 = arith.addf %198, %199 : vector<16x128xf32>
    %201 = arith.truncf %200 : vector<16x128xf32> to vector<16x128xbf16>
    %202 = arith.truncf %3 : vector<16x128xf32> to vector<16x128xbf16>
    %c0_128 = arith.constant 0 : index
    %c0_129 = arith.constant 0 : index
    %203 = vector.load %arg20[%c0_128, %c0_129] : memref<1x128xf32, #tpu.memory_space<vmem>>, vector<1x128xf32>
    %c0_130 = arith.constant 0 : index
    %c0_131 = arith.constant 0 : index
    %c0_132 = arith.constant 0 : index
    %204 = vector.load %arg13[%c0_130, %c0_131, %c0_132] : memref<4x128x32xbf16, #tpu.memory_space<vmem>>, vector<1x128x32xbf16>
    %205 = vector.shape_cast %204 : vector<1x128x32xbf16> to vector<128x32xbf16>
    %c0_133 = arith.constant 0 : index
    %c0_134 = arith.constant 0 : index
    %c0_135 = arith.constant 0 : index
    %206 = vector.load %arg15[%c0_133, %c0_134, %c0_135] : memref<4x128x32xbf16, #tpu.memory_space<vmem>>, vector<1x128x32xbf16>
    %207 = vector.shape_cast %206 : vector<1x128x32xbf16> to vector<128x32xbf16>
    %c0_136 = arith.constant 0 : index
    %c0_137 = arith.constant 0 : index
    %c0_138 = arith.constant 0 : index
    %208 = vector.load %arg17[%c0_136, %c0_137, %c0_138] : memref<4x128x32xbf16, #tpu.memory_space<vmem>>, vector<1x128x32xbf16>
    %209 = vector.shape_cast %208 : vector<1x128x32xbf16> to vector<128x32xbf16>
    %c0_139 = arith.constant 0 : index
    %c0_140 = arith.constant 0 : index
    %c0_141 = arith.constant 0 : index
    %210 = vector.load %arg19[%c0_139, %c0_140, %c0_141] : memref<4x32x128xbf16, #tpu.memory_space<vmem>>, vector<1x32x128xbf16>
    %211 = vector.shape_cast %210 : vector<1x32x128xbf16> to vector<32x128xbf16>
    %cst_142 = arith.constant dense<0.000000e+00> : vector<16x32xf32>
    %212 = tpu.matmul %201, %205, %cst_142 {dimension_numbers = #tpu.dot_dimension_numbers<[1], [0], [0], [1], [0, 0, 1, 1], [], []>} : vector<16x128xbf16>, vector<128x32xbf16>, vector<16x32xf32> -> vector<16x32xf32>
    %c0_143 = arith.constant 0 : index
    %c0_144 = arith.constant 0 : index
    %c0_145 = arith.constant 0 : index
    %213 = vector.load %arg14[%c0_143, %c0_144, %c0_145] : memref<4x1x32xf32, #tpu.memory_space<vmem>>, vector<1x1x32xf32>
    %214 = vector.shape_cast %213 : vector<1x1x32xf32> to vector<1x32xf32>
    %215 = vector.broadcast %214 : vector<1x32xf32> to vector<16x32xf32>
    %216 = arith.addf %212, %215 : vector<16x32xf32>
    %cst_146 = arith.constant dense<0.000000e+00> : vector<16x32xf32>
    %217 = tpu.matmul %202, %207, %cst_146 {dimension_numbers = #tpu.dot_dimension_numbers<[1], [0], [0], [1], [0, 0, 1, 1], [], []>} : vector<16x128xbf16>, vector<128x32xbf16>, vector<16x32xf32> -> vector<16x32xf32>
    %c0_147 = arith.constant 0 : index
    %c0_148 = arith.constant 0 : index
    %c0_149 = arith.constant 0 : index
    %218 = vector.load %arg16[%c0_147, %c0_148, %c0_149] : memref<4x1x32xf32, #tpu.memory_space<vmem>>, vector<1x1x32xf32>
    %219 = vector.shape_cast %218 : vector<1x1x32xf32> to vector<1x32xf32>
    %220 = vector.broadcast %219 : vector<1x32xf32> to vector<16x32xf32>
    %221 = arith.addf %217, %220 : vector<16x32xf32>
    %cst_150 = arith.constant dense<0.000000e+00> : vector<16x32xf32>
    %222 = tpu.matmul %202, %209, %cst_150 {dimension_numbers = #tpu.dot_dimension_numbers<[1], [0], [0], [1], [0, 0, 1, 1], [], []>} : vector<16x128xbf16>, vector<128x32xbf16>, vector<16x32xf32> -> vector<16x32xf32>
    %c0_151 = arith.constant 0 : index
    %c0_152 = arith.constant 0 : index
    %c0_153 = arith.constant 0 : index
    %223 = vector.load %arg18[%c0_151, %c0_152, %c0_153] : memref<4x1x32xf32, #tpu.memory_space<vmem>>, vector<1x1x32xf32>
    %224 = vector.shape_cast %223 : vector<1x1x32xf32> to vector<1x32xf32>
    %225 = vector.broadcast %224 : vector<1x32xf32> to vector<16x32xf32>
    %226 = arith.addf %222, %225 : vector<16x32xf32>
    %227 = arith.truncf %216 : vector<16x32xf32> to vector<16x32xbf16>
    %228 = arith.truncf %221 : vector<16x32xf32> to vector<16x32xbf16>
    %cst_154 = arith.constant dense<0.000000e+00> : vector<16x16xf32>
    %229 = tpu.matmul %227, %228, %cst_154 {dimension_numbers = #tpu.dot_dimension_numbers<[1], [1], [0], [0], [0, 0, 1, 0], [], []>} : vector<16x32xbf16>, vector<16x32xbf16>, vector<16x16xf32> -> vector<16x16xf32>
    %cst_155 = arith.constant dense<0xFF800000> : vector<16xf32>
    %230 = vector.multi_reduction <maximumf>, %229, %cst_155 [1] : vector<16x16xf32> to vector<16xf32>
    %231 = vector.shape_cast %230 : vector<16xf32> to vector<16x1xf32>
    %232 = vector.broadcast %231 : vector<16x1xf32> to vector<16x16xf32>
    %233 = arith.subf %229, %232 : vector<16x16xf32>
    %234 = math.exp %233 : vector<16x16xf32>
    %cst_156 = arith.constant dense<0.000000e+00> : vector<16xf32>
    %235 = vector.multi_reduction <add>, %234, %cst_156 [1] : vector<16x16xf32> to vector<16xf32>
    %236 = vector.shape_cast %235 : vector<16xf32> to vector<16x1xf32>
    %237 = arith.truncf %234 : vector<16x16xf32> to vector<16x16xbf16>
    %238 = arith.truncf %226 : vector<16x32xf32> to vector<16x32xbf16>
    %cst_157 = arith.constant dense<0.000000e+00> : vector<16x32xf32>
    %239 = tpu.matmul %237, %238, %cst_157 {dimension_numbers = #tpu.dot_dimension_numbers<[1], [0], [0], [1], [0, 0, 1, 1], [], []>} : vector<16x16xbf16>, vector<16x32xbf16>, vector<16x32xf32> -> vector<16x32xf32>
    %240 = tpu.reciprocal %236 {approx = true} : vector<16x1xf32> -> vector<16x1xf32>
    %241 = vector.broadcast %240 : vector<16x1xf32> to vector<16x32xf32>
    %242 = arith.mulf %239, %241 : vector<16x32xf32>
    %243 = arith.truncf %242 : vector<16x32xf32> to vector<16x32xbf16>
    %cst_158 = arith.constant dense<0.000000e+00> : vector<16x128xf32>
    %244 = tpu.matmul %243, %211, %cst_158 {dimension_numbers = #tpu.dot_dimension_numbers<[1], [0], [0], [1], [0, 0, 1, 1], [], []>} : vector<16x32xbf16>, vector<32x128xbf16>, vector<16x128xf32> -> vector<16x128xf32>
    %245 = vector.broadcast %203 : vector<1x128xf32> to vector<16x128xf32>
    %246 = arith.addf %245, %244 : vector<16x128xf32>
    %c1_159 = arith.constant 1 : index
    %c0_160 = arith.constant 0 : index
    %c0_161 = arith.constant 0 : index
    %247 = vector.load %arg13[%c1_159, %c0_160, %c0_161] : memref<4x128x32xbf16, #tpu.memory_space<vmem>>, vector<1x128x32xbf16>
    %248 = vector.shape_cast %247 : vector<1x128x32xbf16> to vector<128x32xbf16>
    %c1_162 = arith.constant 1 : index
    %c0_163 = arith.constant 0 : index
    %c0_164 = arith.constant 0 : index
    %249 = vector.load %arg15[%c1_162, %c0_163, %c0_164] : memref<4x128x32xbf16, #tpu.memory_space<vmem>>, vector<1x128x32xbf16>
    %250 = vector.shape_cast %249 : vector<1x128x32xbf16> to vector<128x32xbf16>
    %c1_165 = arith.constant 1 : index
    %c0_166 = arith.constant 0 : index
    %c0_167 = arith.constant 0 : index
    %251 = vector.load %arg17[%c1_165, %c0_166, %c0_167] : memref<4x128x32xbf16, #tpu.memory_space<vmem>>, vector<1x128x32xbf16>
    %252 = vector.shape_cast %251 : vector<1x128x32xbf16> to vector<128x32xbf16>
    %c1_168 = arith.constant 1 : index
    %c0_169 = arith.constant 0 : index
    %c0_170 = arith.constant 0 : index
    %253 = vector.load %arg19[%c1_168, %c0_169, %c0_170] : memref<4x32x128xbf16, #tpu.memory_space<vmem>>, vector<1x32x128xbf16>
    %254 = vector.shape_cast %253 : vector<1x32x128xbf16> to vector<32x128xbf16>
    %cst_171 = arith.constant dense<0.000000e+00> : vector<16x32xf32>
    %255 = tpu.matmul %201, %248, %cst_171 {dimension_numbers = #tpu.dot_dimension_numbers<[1], [0], [0], [1], [0, 0, 1, 1], [], []>} : vector<16x128xbf16>, vector<128x32xbf16>, vector<16x32xf32> -> vector<16x32xf32>
    %c1_172 = arith.constant 1 : index
    %c0_173 = arith.constant 0 : index
    %c0_174 = arith.constant 0 : index
    %256 = vector.load %arg14[%c1_172, %c0_173, %c0_174] : memref<4x1x32xf32, #tpu.memory_space<vmem>>, vector<1x1x32xf32>
    %257 = vector.shape_cast %256 : vector<1x1x32xf32> to vector<1x32xf32>
    %258 = vector.broadcast %257 : vector<1x32xf32> to vector<16x32xf32>
    %259 = arith.addf %255, %258 : vector<16x32xf32>
    %cst_175 = arith.constant dense<0.000000e+00> : vector<16x32xf32>
    %260 = tpu.matmul %202, %250, %cst_175 {dimension_numbers = #tpu.dot_dimension_numbers<[1], [0], [0], [1], [0, 0, 1, 1], [], []>} : vector<16x128xbf16>, vector<128x32xbf16>, vector<16x32xf32> -> vector<16x32xf32>
    %c1_176 = arith.constant 1 : index
    %c0_177 = arith.constant 0 : index
    %c0_178 = arith.constant 0 : index
    %261 = vector.load %arg16[%c1_176, %c0_177, %c0_178] : memref<4x1x32xf32, #tpu.memory_space<vmem>>, vector<1x1x32xf32>
    %262 = vector.shape_cast %261 : vector<1x1x32xf32> to vector<1x32xf32>
    %263 = vector.broadcast %262 : vector<1x32xf32> to vector<16x32xf32>
    %264 = arith.addf %260, %263 : vector<16x32xf32>
    %cst_179 = arith.constant dense<0.000000e+00> : vector<16x32xf32>
    %265 = tpu.matmul %202, %252, %cst_179 {dimension_numbers = #tpu.dot_dimension_numbers<[1], [0], [0], [1], [0, 0, 1, 1], [], []>} : vector<16x128xbf16>, vector<128x32xbf16>, vector<16x32xf32> -> vector<16x32xf32>
    %c1_180 = arith.constant 1 : index
    %c0_181 = arith.constant 0 : index
    %c0_182 = arith.constant 0 : index
    %266 = vector.load %arg18[%c1_180, %c0_181, %c0_182] : memref<4x1x32xf32, #tpu.memory_space<vmem>>, vector<1x1x32xf32>
    %267 = vector.shape_cast %266 : vector<1x1x32xf32> to vector<1x32xf32>
    %268 = vector.broadcast %267 : vector<1x32xf32> to vector<16x32xf32>
    %269 = arith.addf %265, %268 : vector<16x32xf32>
    %270 = arith.truncf %259 : vector<16x32xf32> to vector<16x32xbf16>
    %271 = arith.truncf %264 : vector<16x32xf32> to vector<16x32xbf16>
    %cst_183 = arith.constant dense<0.000000e+00> : vector<16x16xf32>
    %272 = tpu.matmul %270, %271, %cst_183 {dimension_numbers = #tpu.dot_dimension_numbers<[1], [1], [0], [0], [0, 0, 1, 0], [], []>} : vector<16x32xbf16>, vector<16x32xbf16>, vector<16x16xf32> -> vector<16x16xf32>
    %cst_184 = arith.constant dense<0xFF800000> : vector<16xf32>
    %273 = vector.multi_reduction <maximumf>, %272, %cst_184 [1] : vector<16x16xf32> to vector<16xf32>
    %274 = vector.shape_cast %273 : vector<16xf32> to vector<16x1xf32>
    %275 = vector.broadcast %274 : vector<16x1xf32> to vector<16x16xf32>
    %276 = arith.subf %272, %275 : vector<16x16xf32>
    %277 = math.exp %276 : vector<16x16xf32>
    %cst_185 = arith.constant dense<0.000000e+00> : vector<16xf32>
    %278 = vector.multi_reduction <add>, %277, %cst_185 [1] : vector<16x16xf32> to vector<16xf32>
    %279 = vector.shape_cast %278 : vector<16xf32> to vector<16x1xf32>
    %280 = arith.truncf %277 : vector<16x16xf32> to vector<16x16xbf16>
    %281 = arith.truncf %269 : vector<16x32xf32> to vector<16x32xbf16>
    %cst_186 = arith.constant dense<0.000000e+00> : vector<16x32xf32>
    %282 = tpu.matmul %280, %281, %cst_186 {dimension_numbers = #tpu.dot_dimension_numbers<[1], [0], [0], [1], [0, 0, 1, 1], [], []>} : vector<16x16xbf16>, vector<16x32xbf16>, vector<16x32xf32> -> vector<16x32xf32>
    %283 = tpu.reciprocal %279 {approx = true} : vector<16x1xf32> -> vector<16x1xf32>
    %284 = vector.broadcast %283 : vector<16x1xf32> to vector<16x32xf32>
    %285 = arith.mulf %282, %284 : vector<16x32xf32>
    %286 = arith.truncf %285 : vector<16x32xf32> to vector<16x32xbf16>
    %cst_187 = arith.constant dense<0.000000e+00> : vector<16x128xf32>
    %287 = tpu.matmul %286, %254, %cst_187 {dimension_numbers = #tpu.dot_dimension_numbers<[1], [0], [0], [1], [0, 0, 1, 1], [], []>} : vector<16x32xbf16>, vector<32x128xbf16>, vector<16x128xf32> -> vector<16x128xf32>
    %288 = arith.addf %246, %287 : vector<16x128xf32>
    %c2_188 = arith.constant 2 : index
    %c0_189 = arith.constant 0 : index
    %c0_190 = arith.constant 0 : index
    %289 = vector.load %arg13[%c2_188, %c0_189, %c0_190] : memref<4x128x32xbf16, #tpu.memory_space<vmem>>, vector<1x128x32xbf16>
    %290 = vector.shape_cast %289 : vector<1x128x32xbf16> to vector<128x32xbf16>
    %c2_191 = arith.constant 2 : index
    %c0_192 = arith.constant 0 : index
    %c0_193 = arith.constant 0 : index
    %291 = vector.load %arg15[%c2_191, %c0_192, %c0_193] : memref<4x128x32xbf16, #tpu.memory_space<vmem>>, vector<1x128x32xbf16>
    %292 = vector.shape_cast %291 : vector<1x128x32xbf16> to vector<128x32xbf16>
    %c2_194 = arith.constant 2 : index
    %c0_195 = arith.constant 0 : index
    %c0_196 = arith.constant 0 : index
    %293 = vector.load %arg17[%c2_194, %c0_195, %c0_196] : memref<4x128x32xbf16, #tpu.memory_space<vmem>>, vector<1x128x32xbf16>
    %294 = vector.shape_cast %293 : vector<1x128x32xbf16> to vector<128x32xbf16>
    %c2_197 = arith.constant 2 : index
    %c0_198 = arith.constant 0 : index
    %c0_199 = arith.constant 0 : index
    %295 = vector.load %arg19[%c2_197, %c0_198, %c0_199] : memref<4x32x128xbf16, #tpu.memory_space<vmem>>, vector<1x32x128xbf16>
    %296 = vector.shape_cast %295 : vector<1x32x128xbf16> to vector<32x128xbf16>
    %cst_200 = arith.constant dense<0.000000e+00> : vector<16x32xf32>
    %297 = tpu.matmul %201, %290, %cst_200 {dimension_numbers = #tpu.dot_dimension_numbers<[1], [0], [0], [1], [0, 0, 1, 1], [], []>} : vector<16x128xbf16>, vector<128x32xbf16>, vector<16x32xf32> -> vector<16x32xf32>
    %c2_201 = arith.constant 2 : index
    %c0_202 = arith.constant 0 : index
    %c0_203 = arith.constant 0 : index
    %298 = vector.load %arg14[%c2_201, %c0_202, %c0_203] : memref<4x1x32xf32, #tpu.memory_space<vmem>>, vector<1x1x32xf32>
    %299 = vector.shape_cast %298 : vector<1x1x32xf32> to vector<1x32xf32>
    %300 = vector.broadcast %299 : vector<1x32xf32> to vector<16x32xf32>
    %301 = arith.addf %297, %300 : vector<16x32xf32>
    %cst_204 = arith.constant dense<0.000000e+00> : vector<16x32xf32>
    %302 = tpu.matmul %202, %292, %cst_204 {dimension_numbers = #tpu.dot_dimension_numbers<[1], [0], [0], [1], [0, 0, 1, 1], [], []>} : vector<16x128xbf16>, vector<128x32xbf16>, vector<16x32xf32> -> vector<16x32xf32>
    %c2_205 = arith.constant 2 : index
    %c0_206 = arith.constant 0 : index
    %c0_207 = arith.constant 0 : index
    %303 = vector.load %arg16[%c2_205, %c0_206, %c0_207] : memref<4x1x32xf32, #tpu.memory_space<vmem>>, vector<1x1x32xf32>
    %304 = vector.shape_cast %303 : vector<1x1x32xf32> to vector<1x32xf32>
    %305 = vector.broadcast %304 : vector<1x32xf32> to vector<16x32xf32>
    %306 = arith.addf %302, %305 : vector<16x32xf32>
    %cst_208 = arith.constant dense<0.000000e+00> : vector<16x32xf32>
    %307 = tpu.matmul %202, %294, %cst_208 {dimension_numbers = #tpu.dot_dimension_numbers<[1], [0], [0], [1], [0, 0, 1, 1], [], []>} : vector<16x128xbf16>, vector<128x32xbf16>, vector<16x32xf32> -> vector<16x32xf32>
    %c2_209 = arith.constant 2 : index
    %c0_210 = arith.constant 0 : index
    %c0_211 = arith.constant 0 : index
    %308 = vector.load %arg18[%c2_209, %c0_210, %c0_211] : memref<4x1x32xf32, #tpu.memory_space<vmem>>, vector<1x1x32xf32>
    %309 = vector.shape_cast %308 : vector<1x1x32xf32> to vector<1x32xf32>
    %310 = vector.broadcast %309 : vector<1x32xf32> to vector<16x32xf32>
    %311 = arith.addf %307, %310 : vector<16x32xf32>
    %312 = arith.truncf %301 : vector<16x32xf32> to vector<16x32xbf16>
    %313 = arith.truncf %306 : vector<16x32xf32> to vector<16x32xbf16>
    %cst_212 = arith.constant dense<0.000000e+00> : vector<16x16xf32>
    %314 = tpu.matmul %312, %313, %cst_212 {dimension_numbers = #tpu.dot_dimension_numbers<[1], [1], [0], [0], [0, 0, 1, 0], [], []>} : vector<16x32xbf16>, vector<16x32xbf16>, vector<16x16xf32> -> vector<16x16xf32>
    %cst_213 = arith.constant dense<0xFF800000> : vector<16xf32>
    %315 = vector.multi_reduction <maximumf>, %314, %cst_213 [1] : vector<16x16xf32> to vector<16xf32>
    %316 = vector.shape_cast %315 : vector<16xf32> to vector<16x1xf32>
    %317 = vector.broadcast %316 : vector<16x1xf32> to vector<16x16xf32>
    %318 = arith.subf %314, %317 : vector<16x16xf32>
    %319 = math.exp %318 : vector<16x16xf32>
    %cst_214 = arith.constant dense<0.000000e+00> : vector<16xf32>
    %320 = vector.multi_reduction <add>, %319, %cst_214 [1] : vector<16x16xf32> to vector<16xf32>
    %321 = vector.shape_cast %320 : vector<16xf32> to vector<16x1xf32>
    %322 = arith.truncf %319 : vector<16x16xf32> to vector<16x16xbf16>
    %323 = arith.truncf %311 : vector<16x32xf32> to vector<16x32xbf16>
    %cst_215 = arith.constant dense<0.000000e+00> : vector<16x32xf32>
    %324 = tpu.matmul %322, %323, %cst_215 {dimension_numbers = #tpu.dot_dimension_numbers<[1], [0], [0], [1], [0, 0, 1, 1], [], []>} : vector<16x16xbf16>, vector<16x32xbf16>, vector<16x32xf32> -> vector<16x32xf32>
    %325 = tpu.reciprocal %321 {approx = true} : vector<16x1xf32> -> vector<16x1xf32>
    %326 = vector.broadcast %325 : vector<16x1xf32> to vector<16x32xf32>
    %327 = arith.mulf %324, %326 : vector<16x32xf32>
    %328 = arith.truncf %327 : vector<16x32xf32> to vector<16x32xbf16>
    %cst_216 = arith.constant dense<0.000000e+00> : vector<16x128xf32>
    %329 = tpu.matmul %328, %296, %cst_216 {dimension_numbers = #tpu.dot_dimension_numbers<[1], [0], [0], [1], [0, 0, 1, 1], [], []>} : vector<16x32xbf16>, vector<32x128xbf16>, vector<16x128xf32> -> vector<16x128xf32>
    %330 = arith.addf %288, %329 : vector<16x128xf32>
    %c3_217 = arith.constant 3 : index
    %c0_218 = arith.constant 0 : index
    %c0_219 = arith.constant 0 : index
    %331 = vector.load %arg13[%c3_217, %c0_218, %c0_219] : memref<4x128x32xbf16, #tpu.memory_space<vmem>>, vector<1x128x32xbf16>
    %332 = vector.shape_cast %331 : vector<1x128x32xbf16> to vector<128x32xbf16>
    %c3_220 = arith.constant 3 : index
    %c0_221 = arith.constant 0 : index
    %c0_222 = arith.constant 0 : index
    %333 = vector.load %arg15[%c3_220, %c0_221, %c0_222] : memref<4x128x32xbf16, #tpu.memory_space<vmem>>, vector<1x128x32xbf16>
    %334 = vector.shape_cast %333 : vector<1x128x32xbf16> to vector<128x32xbf16>
    %c3_223 = arith.constant 3 : index
    %c0_224 = arith.constant 0 : index
    %c0_225 = arith.constant 0 : index
    %335 = vector.load %arg17[%c3_223, %c0_224, %c0_225] : memref<4x128x32xbf16, #tpu.memory_space<vmem>>, vector<1x128x32xbf16>
    %336 = vector.shape_cast %335 : vector<1x128x32xbf16> to vector<128x32xbf16>
    %c3_226 = arith.constant 3 : index
    %c0_227 = arith.constant 0 : index
    %c0_228 = arith.constant 0 : index
    %337 = vector.load %arg19[%c3_226, %c0_227, %c0_228] : memref<4x32x128xbf16, #tpu.memory_space<vmem>>, vector<1x32x128xbf16>
    %338 = vector.shape_cast %337 : vector<1x32x128xbf16> to vector<32x128xbf16>
    %cst_229 = arith.constant dense<0.000000e+00> : vector<16x32xf32>
    %339 = tpu.matmul %201, %332, %cst_229 {dimension_numbers = #tpu.dot_dimension_numbers<[1], [0], [0], [1], [0, 0, 1, 1], [], []>} : vector<16x128xbf16>, vector<128x32xbf16>, vector<16x32xf32> -> vector<16x32xf32>
    %c3_230 = arith.constant 3 : index
    %c0_231 = arith.constant 0 : index
    %c0_232 = arith.constant 0 : index
    %340 = vector.load %arg14[%c3_230, %c0_231, %c0_232] : memref<4x1x32xf32, #tpu.memory_space<vmem>>, vector<1x1x32xf32>
    %341 = vector.shape_cast %340 : vector<1x1x32xf32> to vector<1x32xf32>
    %342 = vector.broadcast %341 : vector<1x32xf32> to vector<16x32xf32>
    %343 = arith.addf %339, %342 : vector<16x32xf32>
    %cst_233 = arith.constant dense<0.000000e+00> : vector<16x32xf32>
    %344 = tpu.matmul %202, %334, %cst_233 {dimension_numbers = #tpu.dot_dimension_numbers<[1], [0], [0], [1], [0, 0, 1, 1], [], []>} : vector<16x128xbf16>, vector<128x32xbf16>, vector<16x32xf32> -> vector<16x32xf32>
    %c3_234 = arith.constant 3 : index
    %c0_235 = arith.constant 0 : index
    %c0_236 = arith.constant 0 : index
    %345 = vector.load %arg16[%c3_234, %c0_235, %c0_236] : memref<4x1x32xf32, #tpu.memory_space<vmem>>, vector<1x1x32xf32>
    %346 = vector.shape_cast %345 : vector<1x1x32xf32> to vector<1x32xf32>
    %347 = vector.broadcast %346 : vector<1x32xf32> to vector<16x32xf32>
    %348 = arith.addf %344, %347 : vector<16x32xf32>
    %cst_237 = arith.constant dense<0.000000e+00> : vector<16x32xf32>
    %349 = tpu.matmul %202, %336, %cst_237 {dimension_numbers = #tpu.dot_dimension_numbers<[1], [0], [0], [1], [0, 0, 1, 1], [], []>} : vector<16x128xbf16>, vector<128x32xbf16>, vector<16x32xf32> -> vector<16x32xf32>
    %c3_238 = arith.constant 3 : index
    %c0_239 = arith.constant 0 : index
    %c0_240 = arith.constant 0 : index
    %350 = vector.load %arg18[%c3_238, %c0_239, %c0_240] : memref<4x1x32xf32, #tpu.memory_space<vmem>>, vector<1x1x32xf32>
    %351 = vector.shape_cast %350 : vector<1x1x32xf32> to vector<1x32xf32>
    %352 = vector.broadcast %351 : vector<1x32xf32> to vector<16x32xf32>
    %353 = arith.addf %349, %352 : vector<16x32xf32>
    %354 = arith.truncf %343 : vector<16x32xf32> to vector<16x32xbf16>
    %355 = arith.truncf %348 : vector<16x32xf32> to vector<16x32xbf16>
    %cst_241 = arith.constant dense<0.000000e+00> : vector<16x16xf32>
    %356 = tpu.matmul %354, %355, %cst_241 {dimension_numbers = #tpu.dot_dimension_numbers<[1], [1], [0], [0], [0, 0, 1, 0], [], []>} : vector<16x32xbf16>, vector<16x32xbf16>, vector<16x16xf32> -> vector<16x16xf32>
    %cst_242 = arith.constant dense<0xFF800000> : vector<16xf32>
    %357 = vector.multi_reduction <maximumf>, %356, %cst_242 [1] : vector<16x16xf32> to vector<16xf32>
    %358 = vector.shape_cast %357 : vector<16xf32> to vector<16x1xf32>
    %359 = vector.broadcast %358 : vector<16x1xf32> to vector<16x16xf32>
    %360 = arith.subf %356, %359 : vector<16x16xf32>
    %361 = math.exp %360 : vector<16x16xf32>
    %cst_243 = arith.constant dense<0.000000e+00> : vector<16xf32>
    %362 = vector.multi_reduction <add>, %361, %cst_243 [1] : vector<16x16xf32> to vector<16xf32>
    %363 = vector.shape_cast %362 : vector<16xf32> to vector<16x1xf32>
    %364 = arith.truncf %361 : vector<16x16xf32> to vector<16x16xbf16>
    %365 = arith.truncf %353 : vector<16x32xf32> to vector<16x32xbf16>
    %cst_244 = arith.constant dense<0.000000e+00> : vector<16x32xf32>
    %366 = tpu.matmul %364, %365, %cst_244 {dimension_numbers = #tpu.dot_dimension_numbers<[1], [0], [0], [1], [0, 0, 1, 1], [], []>} : vector<16x16xbf16>, vector<16x32xbf16>, vector<16x32xf32> -> vector<16x32xf32>
    %367 = tpu.reciprocal %363 {approx = true} : vector<16x1xf32> -> vector<16x1xf32>
    %368 = vector.broadcast %367 : vector<16x1xf32> to vector<16x32xf32>
    %369 = arith.mulf %366, %368 : vector<16x32xf32>
    %370 = arith.truncf %369 : vector<16x32xf32> to vector<16x32xbf16>
    %cst_245 = arith.constant dense<0.000000e+00> : vector<16x128xf32>
    %371 = tpu.matmul %370, %338, %cst_245 {dimension_numbers = #tpu.dot_dimension_numbers<[1], [0], [0], [1], [0, 0, 1, 1], [], []>} : vector<16x32xbf16>, vector<32x128xbf16>, vector<16x128xf32> -> vector<16x128xf32>
    %372 = arith.addf %330, %371 : vector<16x128xf32>
    %373 = arith.addf %372, %200 : vector<16x128xf32>
    %c0_246 = arith.constant 0 : index
    %c0_247 = arith.constant 0 : index
    %374 = vector.load %arg21[%c0_246, %c0_247] : memref<1x128xf32, #tpu.memory_space<vmem>>, vector<1x128xf32>
    %c0_248 = arith.constant 0 : index
    %c0_249 = arith.constant 0 : index
    %375 = vector.load %arg22[%c0_248, %c0_249] : memref<1x128xf32, #tpu.memory_space<vmem>>, vector<1x128xf32>
    %cst_250 = arith.constant dense<0.000000e+00> : vector<16xf32>
    %376 = vector.multi_reduction <add>, %373, %cst_250 [1] : vector<16x128xf32> to vector<16xf32>
    %377 = vector.shape_cast %376 : vector<16xf32> to vector<16x1xf32>
    %cst_251 = arith.constant 1.280000e+02 : f32
    %378 = vector.broadcast %cst_251 : f32 to vector<16x1xf32>
    %379 = arith.divf %377, %378 : vector<16x1xf32>
    %380 = vector.broadcast %379 : vector<16x1xf32> to vector<16x128xf32>
    %381 = arith.subf %373, %380 : vector<16x128xf32>
    %382 = arith.mulf %381, %381 : vector<16x128xf32>
    %cst_252 = arith.constant dense<0.000000e+00> : vector<16xf32>
    %383 = vector.multi_reduction <add>, %382, %cst_252 [1] : vector<16x128xf32> to vector<16xf32>
    %384 = vector.shape_cast %383 : vector<16xf32> to vector<16x1xf32>
    %cst_253 = arith.constant 1.280000e+02 : f32
    %385 = vector.broadcast %cst_253 : f32 to vector<16x1xf32>
    %386 = arith.divf %384, %385 : vector<16x1xf32>
    %387 = vector.broadcast %379 : vector<16x1xf32> to vector<16x128xf32>
    %388 = arith.subf %373, %387 : vector<16x128xf32>
    %cst_254 = arith.constant 9.99999974E-6 : f32
    %389 = vector.broadcast %cst_254 : f32 to vector<16x1xf32>
    %390 = arith.addf %386, %389 : vector<16x1xf32>
    %391 = math.rsqrt %390 : vector<16x1xf32>
    %392 = vector.broadcast %391 : vector<16x1xf32> to vector<16x128xf32>
    %393 = arith.mulf %388, %392 : vector<16x128xf32>
    %394 = vector.broadcast %374 : vector<1x128xf32> to vector<16x128xf32>
    %395 = arith.mulf %393, %394 : vector<16x128xf32>
    %396 = vector.broadcast %375 : vector<1x128xf32> to vector<16x128xf32>
    %397 = arith.addf %395, %396 : vector<16x128xf32>
    %398 = arith.truncf %397 : vector<16x128xf32> to vector<16x128xbf16>
    %c0_255 = arith.constant 0 : index
    %c0_256 = arith.constant 0 : index
    %399 = vector.load %arg23[%c0_255, %c0_256] : memref<128x256xbf16, #tpu.memory_space<vmem>>, vector<128x256xbf16>
    %cst_257 = arith.constant dense<0.000000e+00> : vector<16x256xf32>
    %400 = tpu.matmul %398, %399, %cst_257 {dimension_numbers = #tpu.dot_dimension_numbers<[1], [0], [0], [1], [0, 0, 1, 1], [], []>} : vector<16x128xbf16>, vector<128x256xbf16>, vector<16x256xf32> -> vector<16x256xf32>
    %c0_258 = arith.constant 0 : index
    %c0_259 = arith.constant 0 : index
    %401 = vector.load %arg24[%c0_258, %c0_259] : memref<1x256xf32, #tpu.memory_space<vmem>>, vector<1x256xf32>
    %402 = vector.broadcast %401 : vector<1x256xf32> to vector<16x256xf32>
    %403 = arith.addf %400, %402 : vector<16x256xf32>
    %cst_260 = arith.constant 0.000000e+00 : f32
    %404 = vector.broadcast %cst_260 : f32 to vector<16x256xf32>
    %405 = arith.maximumf %403, %404 : vector<16x256xf32>
    %406 = arith.truncf %405 : vector<16x256xf32> to vector<16x256xbf16>
    %c0_261 = arith.constant 0 : index
    %c0_262 = arith.constant 0 : index
    %407 = vector.load %arg25[%c0_261, %c0_262] : memref<256x128xbf16, #tpu.memory_space<vmem>>, vector<256x128xbf16>
    %cst_263 = arith.constant dense<0.000000e+00> : vector<16x128xf32>
    %408 = tpu.matmul %406, %407, %cst_263 {dimension_numbers = #tpu.dot_dimension_numbers<[1], [0], [0], [1], [0, 0, 1, 1], [], []>} : vector<16x256xbf16>, vector<256x128xbf16>, vector<16x128xf32> -> vector<16x128xf32>
    %c0_264 = arith.constant 0 : index
    %c0_265 = arith.constant 0 : index
    %409 = vector.load %arg26[%c0_264, %c0_265] : memref<1x128xf32, #tpu.memory_space<vmem>>, vector<1x128xf32>
    %410 = vector.broadcast %409 : vector<1x128xf32> to vector<16x128xf32>
    %411 = arith.addf %408, %410 : vector<16x128xf32>
    %412 = arith.addf %411, %397 : vector<16x128xf32>
    %c0_266 = arith.constant 0 : index
    %c0_267 = arith.constant 0 : index
    %413 = vector.load %arg27[%c0_266, %c0_267] : memref<1x128xf32, #tpu.memory_space<vmem>>, vector<1x128xf32>
    %c0_268 = arith.constant 0 : index
    %c0_269 = arith.constant 0 : index
    %414 = vector.load %arg28[%c0_268, %c0_269] : memref<1x128xf32, #tpu.memory_space<vmem>>, vector<1x128xf32>
    %cst_270 = arith.constant dense<0.000000e+00> : vector<16xf32>
    %415 = vector.multi_reduction <add>, %412, %cst_270 [1] : vector<16x128xf32> to vector<16xf32>
    %416 = vector.shape_cast %415 : vector<16xf32> to vector<16x1xf32>
    %cst_271 = arith.constant 1.280000e+02 : f32
    %417 = vector.broadcast %cst_271 : f32 to vector<16x1xf32>
    %418 = arith.divf %416, %417 : vector<16x1xf32>
    %419 = vector.broadcast %418 : vector<16x1xf32> to vector<16x128xf32>
    %420 = arith.subf %412, %419 : vector<16x128xf32>
    %421 = arith.mulf %420, %420 : vector<16x128xf32>
    %cst_272 = arith.constant dense<0.000000e+00> : vector<16xf32>
    %422 = vector.multi_reduction <add>, %421, %cst_272 [1] : vector<16x128xf32> to vector<16xf32>
    %423 = vector.shape_cast %422 : vector<16xf32> to vector<16x1xf32>
    %cst_273 = arith.constant 1.280000e+02 : f32
    %424 = vector.broadcast %cst_273 : f32 to vector<16x1xf32>
    %425 = arith.divf %423, %424 : vector<16x1xf32>
    %426 = vector.broadcast %418 : vector<16x1xf32> to vector<16x128xf32>
    %427 = arith.subf %412, %426 : vector<16x128xf32>
    %cst_274 = arith.constant 9.99999974E-6 : f32
    %428 = vector.broadcast %cst_274 : f32 to vector<16x1xf32>
    %429 = arith.addf %425, %428 : vector<16x1xf32>
    %430 = math.rsqrt %429 : vector<16x1xf32>
    %431 = vector.broadcast %430 : vector<16x1xf32> to vector<16x128xf32>
    %432 = arith.mulf %427, %431 : vector<16x128xf32>
    %433 = vector.broadcast %413 : vector<1x128xf32> to vector<16x128xf32>
    %434 = arith.mulf %432, %433 : vector<16x128xf32>
    %435 = vector.broadcast %414 : vector<1x128xf32> to vector<16x128xf32>
    %436 = arith.addf %434, %435 : vector<16x128xf32>
    %c0_275 = arith.constant 0 : index
    %c0_276 = arith.constant 0 : index
    %c0_277 = arith.constant 0 : index
    %437 = vector.load %arg29[%c0_275, %c0_276, %c0_277] : memref<1x16x128xf32, #tpu.memory_space<vmem>>, vector<1x16x128xf32>
    %438 = vector.shape_cast %437 : vector<1x16x128xf32> to vector<16x128xf32>
    %439 = vector.shape_cast %436 : vector<16x128xf32> to vector<1x16x128xf32>
    tpu.vector_store %arg29[%c0_275, %c0_276, %c0_277], %439 {strides = array<i32>} : memref<1x16x128xf32, #tpu.memory_space<vmem>>, vector<1x16x128xf32>,
    return
  }
  func.func @transform_0(%arg0: i32) -> (i32, i32, i32) {
    %c0_i32 = arith.constant 0 : i32
    %c0_i32_0 = arith.constant 0 : i32
    %c0_i32_1 = arith.constant 0 : i32
    return %arg0, %c0_i32, %c0_i32_0 : i32, i32, i32
  }
  func.func @transform_1(%arg0: i32) -> (i32, i32, i32) {
    %c0_i32 = arith.constant 0 : i32
    %c0_i32_0 = arith.constant 0 : i32
    %c0_i32_1 = arith.constant 0 : i32
    return %arg0, %c0_i32, %c0_i32_0 : i32, i32, i32
  }
  func.func @transform_2(%arg0: i32) -> (i32, i32, i32) {
    %c0_i32 = arith.constant 0 : i32
    %c0_i32_0 = arith.constant 0 : i32
    %c0_i32_1 = arith.constant 0 : i32
    %c0_i32_2 = arith.constant 0 : i32
    return %c0_i32, %c0_i32_0, %c0_i32_1 : i32, i32, i32
  }
  func.func @transform_3(%arg0: i32) -> (i32, i32, i32) {
    %c0_i32 = arith.constant 0 : i32
    %c0_i32_0 = arith.constant 0 : i32
    %c0_i32_1 = arith.constant 0 : i32
    %c0_i32_2 = arith.constant 0 : i32
    return %c0_i32, %c0_i32_0, %c0_i32_1 : i32, i32, i32
  }
  func.func @transform_4(%arg0: i32) -> (i32, i32, i32) {
    %c0_i32 = arith.constant 0 : i32
    %c0_i32_0 = arith.constant 0 : i32
    %c0_i32_1 = arith.constant 0 : i32
    %c0_i32_2 = arith.constant 0 : i32
    return %c0_i32, %c0_i32_0, %c0_i32_1 : i32, i32, i32
  }
  func.func @transform_5(%arg0: i32) -> (i32, i32, i32) {
    %c0_i32 = arith.constant 0 : i32
    %c0_i32_0 = arith.constant 0 : i32
    %c0_i32_1 = arith.constant 0 : i32
    %c0_i32_2 = arith.constant 0 : i32
    return %c0_i32, %c0_i32_0, %c0_i32_1 : i32, i32, i32
  }
  func.func @transform_6(%arg0: i32) -> (i32, i32, i32) {
    %c0_i32 = arith.constant 0 : i32
    %c0_i32_0 = arith.constant 0 : i32
    %c0_i32_1 = arith.constant 0 : i32
    %c0_i32_2 = arith.constant 0 : i32
    return %c0_i32, %c0_i32_0, %c0_i32_1 : i32, i32, i32
  }
  func.func @transform_7(%arg0: i32) -> (i32, i32, i32) {
    %c0_i32 = arith.constant 0 : i32
    %c0_i32_0 = arith.constant 0 : i32
    %c0_i32_1 = arith.constant 0 : i32
    %c0_i32_2 = arith.constant 0 : i32
    return %c0_i32, %c0_i32_0, %c0_i32_1 : i32, i32, i32
  }
  func.func @transform_8(%arg0: i32) -> (i32, i32, i32) {
    %c0_i32 = arith.constant 0 : i32
    %c0_i32_0 = arith.constant 0 : i32
    %c0_i32_1 = arith.constant 0 : i32
    %c0_i32_2 = arith.constant 0 : i32
    return %c0_i32, %c0_i32_0, %c0_i32_1 : i32, i32, i32
  }
  func.func @transform_9(%arg0: i32) -> (i32, i32) {
    %c0_i32 = arith.constant 0 : i32
    %c0_i32_0 = arith.constant 0 : i32
    %c0_i32_1 = arith.constant 0 : i32
    return %c0_i32, %c0_i32_0 : i32, i32
  }
  func.func @transform_10(%arg0: i32) -> (i32, i32) {
    %c0_i32 = arith.constant 0 : i32
    %c0_i32_0 = arith.constant 0 : i32
    %c0_i32_1 = arith.constant 0 : i32
    return %c0_i32, %c0_i32_0 : i32, i32
  }
  func.func @transform_11(%arg0: i32) -> (i32, i32) {
    %c0_i32 = arith.constant 0 : i32
    %c0_i32_0 = arith.constant 0 : i32
    %c0_i32_1 = arith.constant 0 : i32
    return %c0_i32, %c0_i32_0 : i32, i32
  }
  func.func @transform_12(%arg0: i32) -> (i32, i32, i32) {
    %c0_i32 = arith.constant 0 : i32
    %c0_i32_0 = arith.constant 0 : i32
    %c0_i32_1 = arith.constant 0 : i32
    %c0_i32_2 = arith.constant 0 : i32
    return %c0_i32, %c0_i32_0, %c0_i32_1 : i32, i32, i32
  }
  func.func @transform_13(%arg0: i32) -> (i32, i32, i32) {
    %c0_i32 = arith.constant 0 : i32
    %c0_i32_0 = arith.constant 0 : i32
    %c0_i32_1 = arith.constant 0 : i32
    %c0_i32_2 = arith.constant 0 : i32
    return %c0_i32, %c0_i32_0, %c0_i32_1 : i32, i32, i32
  }
  func.func @transform_14(%arg0: i32) -> (i32, i32, i32) {
    %c0_i32 = arith.constant 0 : i32
    %c0_i32_0 = arith.constant 0 : i32
    %c0_i32_1 = arith.constant 0 : i32
    %c0_i32_2 = arith.constant 0 : i32
    return %c0_i32, %c0_i32_0, %c0_i32_1 : i32, i32, i32
  }
  func.func @transform_15(%arg0: i32) -> (i32, i32, i32) {
    %c0_i32 = arith.constant 0 : i32
    %c0_i32_0 = arith.constant 0 : i32
    %c0_i32_1 = arith.constant 0 : i32
    %c0_i32_2 = arith.constant 0 : i32
    return %c0_i32, %c0_i32_0, %c0_i32_1 : i32, i32, i32
  }
  func.func @transform_16(%arg0: i32) -> (i32, i32, i32) {
    %c0_i32 = arith.constant 0 : i32
    %c0_i32_0 = arith.constant 0 : i32
    %c0_i32_1 = arith.constant 0 : i32
    %c0_i32_2 = arith.constant 0 : i32
    return %c0_i32, %c0_i32_0, %c0_i32_1 : i32, i32, i32
  }
  func.func @transform_17(%arg0: i32) -> (i32, i32, i32) {
    %c0_i32 = arith.constant 0 : i32
    %c0_i32_0 = arith.constant 0 : i32
    %c0_i32_1 = arith.constant 0 : i32
    %c0_i32_2 = arith.constant 0 : i32
    return %c0_i32, %c0_i32_0, %c0_i32_1 : i32, i32, i32
  }
  func.func @transform_18(%arg0: i32) -> (i32, i32, i32) {
    %c0_i32 = arith.constant 0 : i32
    %c0_i32_0 = arith.constant 0 : i32
    %c0_i32_1 = arith.constant 0 : i32
    %c0_i32_2 = arith.constant 0 : i32
    return %c0_i32, %c0_i32_0, %c0_i32_1 : i32, i32, i32
  }
  func.func @transform_19(%arg0: i32) -> (i32, i32) {
    %c0_i32 = arith.constant 0 : i32
    %c0_i32_0 = arith.constant 0 : i32
    %c0_i32_1 = arith.constant 0 : i32
    return %c0_i32, %c0_i32_0 : i32, i32
  }
  func.func @transform_20(%arg0: i32) -> (i32, i32) {
    %c0_i32 = arith.constant 0 : i32
    %c0_i32_0 = arith.constant 0 : i32
    %c0_i32_1 = arith.constant 0 : i32
    return %c0_i32, %c0_i32_0 : i32, i32
  }
  func.func @transform_21(%arg0: i32) -> (i32, i32) {
    %c0_i32 = arith.constant 0 : i32
    %c0_i32_0 = arith.constant 0 : i32
    %c0_i32_1 = arith.constant 0 : i32
    return %c0_i32, %c0_i32_0 : i32, i32
  }
  func.func @transform_22(%arg0: i32) -> (i32, i32) {
    %c0_i32 = arith.constant 0 : i32
    %c0_i32_0 = arith.constant 0 : i32
    %c0_i32_1 = arith.constant 0 : i32
    return %c0_i32, %c0_i32_0 : i32, i32
  }
  func.func @transform_23(%arg0: i32) -> (i32, i32) {
    %c0_i32 = arith.constant 0 : i32
    %c0_i32_0 = arith.constant 0 : i32
    %c0_i32_1 = arith.constant 0 : i32
    return %c0_i32, %c0_i32_0 : i32, i32
  }
  func.func @transform_24(%arg0: i32) -> (i32, i32) {
    %c0_i32 = arith.constant 0 : i32
    %c0_i32_0 = arith.constant 0 : i32
    %c0_i32_1 = arith.constant 0 : i32
    return %c0_i32, %c0_i32_0 : i32, i32
  }
  func.func @transform_25(%arg0: i32) -> (i32, i32) {
    %c0_i32 = arith.constant 0 : i32
    %c0_i32_0 = arith.constant 0 : i32
    %c0_i32_1 = arith.constant 0 : i32
    return %c0_i32, %c0_i32_0 : i32, i32
  }
  func.func @transform_26(%arg0: i32) -> (i32, i32) {
    %c0_i32 = arith.constant 0 : i32
    %c0_i32_0 = arith.constant 0 : i32
    %c0_i32_1 = arith.constant 0 : i32
    return %c0_i32, %c0_i32_0 : i32, i32
  }
  func.func @transform_27(%arg0: i32) -> (i32, i32) {
    %c0_i32 = arith.constant 0 : i32
    %c0_i32_0 = arith.constant 0 : i32
    %c0_i32_1 = arith.constant 0 : i32
    return %c0_i32, %c0_i32_0 : i32, i32
  }
  func.func @transform_28(%arg0: i32) -> (i32, i32, i32) {
    %c0_i32 = arith.constant 0 : i32
    %c0_i32_0 = arith.constant 0 : i32
    %c0_i32_1 = arith.constant 0 : i32
    return %arg0, %c0_i32, %c0_i32_0 : i32, i32, i32
  }
}

</mosaic_0001>

<bundles_post_ra>
// kernel: tpu_custom_call.1
= control target key start
LH: loop header
LB: loop body
LE: loop exit
PB: predicated region body
PF: predicated region fallthrough
CT: control target
= control target key end

     0   :  { %s9178_s0 = inlined_call_operand.vmem [shape: f32[2,16,128], index: 0, kind: input, shape index: {}]   ;;  %s9179_s1 = inlined_call_operand.vmem [shape: f32[2,16,128], index: 1, kind: input, shape index: {}]   ;;  %s9180_s2 = inlined_call_operand.vmem [shape: bf16[4,128,32], index: 2, kind: input, shape index: {}]   ;;  %s9181_s3 = inlined_call_operand.vmem [shape: f32[4,1,32], index: 3, kind: input, shape index: {}]   ;;  %s9182_s4 = inlined_call_operand.vmem [shape: bf16[4,128,32], index: 4, kind: input, shape index: {}]   ;;  %s9183_s5 = inlined_call_operand.vmem [shape: f32[4,1,32], index: 5, kind: input, shape index: {}]   ;;  %s9184_s6 = inlined_call_operand.vmem [shape: bf16[4,128,32], index: 6, kind: input, shape index: {}]   ;;  %s9185_s7 = inlined_call_operand.vmem [shape: f32[4,1,32], index: 7, kind: input, shape index: {}]   ;;  %s9186_s8 = inlined_call_operand.vmem [shape: bf16[4,32,128], index: 8, kind: input, shape index: {}]   ;;  %s9187_s9 = inlined_call_operand.vmem [shape: f32[1,128], index: 9, kind: input, shape index: {}]   ;;  %s9188_s10 = inlined_call_operand.vmem [shape: f32[1,128], index: 10, kind: input, shape index: {}]   ;;  %s9189_s11 = inlined_call_operand.vmem [shape: f32[1,128], index: 11, kind: input, shape index: {}]   ;;  %s9190_s12 = inlined_call_operand.vmem [shape: bf16[4,128,32], index: 12, kind: input, shape index: {}]   ;;  %s9191_s13 = inlined_call_operand.vmem [shape: f32[4,1,32], index: 13, kind: input, shape index: {}]   ;;  %s9192_s14 = inlined_call_operand.vmem [shape: bf16[4,128,32], index: 14, kind: input, shape index: {}]   ;;  %s9193_s15 = inlined_call_operand.vmem [shape: f32[4,1,32], index: 15, kind: input, shape index: {}]   ;;  %s9194_s16 = inlined_call_operand.vmem [shape: bf16[4,128,32], index: 16, kind: input, shape index: {}]   ;;  %s9195_s17 = inlined_call_operand.vmem [shape: f32[4,1,32], index: 17, kind: input, shape index: {}]   ;;  %s9196_s18 = inlined_call_operand.vmem [shape: bf16[4,32,128], index: 18, kind: input, shape index: {}]   ;;  %s9197_s19 = inlined_call_operand.vmem [shape: f32[1,128], index: 19, kind: input, shape index: {}]   ;;  %s9198_s20 = inlined_call_operand.vmem [shape: f32[1,128], index: 20, kind: input, shape index: {}]   ;;  %s9199_s21 = inlined_call_operand.vmem [shape: f32[1,128], index: 21, kind: input, shape index: {}]   ;;  %s9200_s22 = inlined_call_operand.vmem [shape: bf16[128,256], index: 22, kind: input, shape index: {}]   ;;  %s9201_s23 = inlined_call_operand.vmem [shape: f32[1,256], index: 23, kind: input, shape index: {}]   ;;  %s9202_s24 = inlined_call_operand.vmem [shape: bf16[256,128], index: 24, kind: input, shape index: {}]   ;;  %s9203_s25 = inlined_call_operand.vmem [shape: f32[1,128], index: 25, kind: input, shape index: {}]   ;;  %s9204_s26 = inlined_call_operand.vmem [shape: f32[1,128], index: 26, kind: input, shape index: {}]   ;;  %s9205_s27 = inlined_call_operand.vmem [shape: f32[1,128], index: 27, kind: input, shape index: {}]   ;;  %s9206_s28 = inlined_call_operand.hbm [shape: f32[2,16,128], index: 28, kind: output, shape index: {}]  }
   0x1   :  { %9231 = sst [smem:[#allocation13_spill]] %s9178_s0 }
   0x2   :  { %9232 = sst [smem:[#allocation14_spill]] %s9179_s1 }
   0x3   :  { %9233 = sst [smem:[#allocation15_spill]] %s9180_s2 }
   0x4   :  { %9234 = sst [smem:[#allocation16_spill]] %s9181_s3 }
   0x5   :  { %9235 = sst [smem:[#allocation17_spill]] %s9182_s4 }
   0x6   :  { %9236 = sst [smem:[#allocation18_spill]] %s9183_s5 }
   0x7   :  { %9237 = sst [smem:[#allocation19_spill]] %s9184_s6 }
   0x8   :  { %9238 = sst [smem:[#allocation20_spill]] %s9185_s7 }
   0x9   :  { %9239 = sst [smem:[#allocation21_spill]] %s9186_s8 }
   0xa   :  { %9240 = sst [smem:[#allocation22_spill]] %s9187_s9 }
   0xb   :  { %9241 = sst [smem:[#allocation23_spill]] %s9188_s10 }
   0xc   :  { %9242 = sst [smem:[#allocation24_spill]] %s9189_s11 }
   0xd   :  { %9243 = sst [smem:[#allocation25_spill]] %s9190_s12 }
   0xe   :  { %9244 = sst [smem:[#allocation26_spill]] %s9191_s13 }
   0xf   :  { %9245 = sst [smem:[#allocation27_spill]] %s9204_s26 }
  0x10   :  { %9246 = sst [smem:[#allocation28_spill]] %s9205_s27 }
  0x11   :  { %9247 = sst [smem:[#allocation29_spill]] %s9206_s28 }
  0x12   :  { %33 = vsyncpa [#allocation3], 0 }
  0x13   :  { %35 = vsyncpa [#allocation3 + $0x1], 0  ;;  %s7770_s8 = smov 0   ;;  %s7772_s5 = smov 0  }
  0x14   :  { %s7774_s9 = smov 0   ;;  %s7776_s30 = smov 0  }
  0x15 LB: > { %9248 = sst [smem:[#allocation5_spill]] %s7605_s8  ;;  %s7791_s3 = sadd.s32 4294967295, %s7617_s30   ;;  %s7617_s30 = sphi %s7776_s30, %s9282_s30   ;;  %s7613_s9 = sphi %s7774_s9, %s9284_s9   ;;  %s7609_s5 = sphi %s7772_s5, %s9286_s5   ;;  %s7605_s8 = sphi %s7770_s8, %s9285_s8  }
  0x16   : > { %9249 = sst [smem:[#allocation6_spill]] %s7613_s9  ;;  %s5609_s6 = sadd.s32 4294967294, %s7617_s30  }
  0x17   : > { %9250 = sst [smem:[#allocation7_spill]] %s7617_s30  ;;  %s7795_s10 = sadd.s32 1, %s7617_s30  }
  0x18   : > { %9251 = sst [smem:[#allocation8_spill]] %s7791_s3  ;;  %s646_s0 = sadd.s32 1, %s7613_s9 }
  0x19   : > { %9252 = sst [smem:[#allocation9_spill]] %s7795_s10  ;;  %s643_s11 = ssub.s32 %s7617_s30, %s7795_s10 }
  0x1a   : > { %p656_p0 = scmp.ne.s32.totalorder %s7613_s9, %s7609_s5  ;;  %p644_p1 = scmp.eq.s32.totalorder %s643_s11, 0 }
  0x1b   : > { %p657_p2 = scmp.eq.s32.totalorder %s7791_s3, 1  ;;  %p662_p3 = scmp.ne.s32.totalorder %s7609_s5, %s7605_s8 }
  0x1c   : > { %p663_p4 = scmp.eq.s32.totalorder %s5609_s6, 1  ;;  %p5612_p7 = scmp.ge.s32.totalorder %s7617_s30, 1 }
  0x1d   : > { %s7806_s29 = scalar_select %p644_p1, %s7613_s9, %s646_s0  }
  0x1e   : > { %p7808_p5 = por %p657_p2, %p656_p0  ;;  %p7812_p6 = por %p663_p4, %p662_p3 }
  0x1f   : > { %9253 = sst [smem:[#allocation10_spill]] %s7806_s29  ;;  %p775_p8 = scmp.lt.s32.totalorder %s7617_s30, 3 }
  0x20   : > { %s9254_s2 = scalar_select %p7808_p5, 1, 0 }
  0x21   : > { %s9256_s7 = scalar_select %p7812_p6, 1, 0 }
  0x22   : > { %9255 = sst [smem:[#allocation11_spill]] %s9254_s2  ;;  %p776_p9 = pnand %p5612_p7, %p775_p8 }
  0x23   : > { %9257 = sst [smem:[#allocation12_spill]] %s9256_s7  ;;  %p854_p10 = scmp.lt.s32.totalorder (!%p776_p9), %s7791_s3, 1 }
  0x24   : > { %779 = sbr.rel (%p776_p9) target bundleno = 8087 (0x1f97), region = 132  ;;  %s9258_s4 = sld [smem:[#allocation17_spill]] (!%p776_p9) }
  0x25   : > { %s9259_s11 = sld [smem:[#allocation15_spill]] (!%p776_p9) }
  0x26   : > { %s9260_s28 = sld [smem:[#allocation13_spill]] (!%p776_p9) }
  0x27   : > { %s9261_s9 = sld [smem:[#allocation19_spill]] (!%p776_p9) }
  0x28   : > { %s9263_s1 = sld [smem:[#allocation18_spill]] (!%p776_p9) }
  0x29   : > { %v7619_v1 = vmov 0.0   ;;  %vm7620_vm0 = vmmov 0   ;;  %s7856_s10 = scalar_select %p854_p10, %s7791_s3, 1  ;;  %vm1213_vm1 = vcmask 261120   ;;  %vm1261_vm2 = vcmask 130048  }
  0x2a   : > { %v7231_v0 = vld [vmem:[%s9258_s4 + $0x38] sm:$0xff]   ;;  %6567 = vmatprep.subr.bf16.mxu1 %v7619_v1  ;;  %6547 = vmatprep.subr.bf16.mxu0 %v7619_v1  ;;  %v7233_v3 = vld [vmem:[%s9258_s4 + $0x30] sm:$0xff]   ;;  %v7235_v5 = vld [vmem:[%s9258_s4 + $0x28] sm:$0xff]   ;;  %s9264_s6 = sld [smem:[#allocation16_spill]] }
  0x2b   : > { %v7232_v2 = vld [vmem:[%s9259_s11 + $0x38] sm:$0xff]   ;;  %6568 = vmatpush3.bf16.msra.mxu1 %v7231_v0  ;;  %6583 = vmatprep.mubr.msk.bf16.mxu1 %vm7620_vm0, %v7619_v1  ;;  %v7234_v4 = vld [vmem:[%s9259_s11 + $0x30] sm:$0xff]   ;;  %v7236_v6 = vld [vmem:[%s9259_s11 + $0x28] sm:$0xff]   ;;  %s9222_s7 = sshll.u32 %s7856_s10, 4  ;;  %s9265_s0 = sld [smem:[#allocation20_spill]] }
  0x2c   : > { %6548 = vmatpush3.bf16.msra.mxu0 %v7232_v2  ;;  %6569 = vmatprep.subr.bf16.mxu1 %v7619_v1  ;;  %v7237_v7 = vld [vmem:[%s9258_s4 + $0x20] sm:$0xff]   ;;  %v7239_v9 = vld [vmem:[%s9258_s4 + $0x18] sm:$0xff]   ;;  %v7241_v11 = vld [vmem:[%s9258_s4 + $0x10] sm:$0xff]   ;;  %s7886_s8 = scalar_lea.vmem %s9260_s28, %s9222_s7  ;;  %s9266_s27 = sld [smem:[#allocation21_spill]] }
  0x2d   : > { %6549 = vmatprep.subr.bf16.mxu0 %v7619_v1  ;;  %6563 = vmatprep.mubr.msk.bf16.mxu0 %vm7620_vm0, %v7619_v1  ;;  %v7238_v8 = vld [vmem:[%s9259_s11 + $0x20] sm:$0xff]   ;;  %v7240_v10 = vld [vmem:[%s9259_s11 + $0x18] sm:$0xff]   ;;  %v7242_v12 = vld [vmem:[%s9259_s11 + $0x10] sm:$0xff]   ;;  %s9262_s29 = smov %s9261_s9  ;;  %s9268_s28 = sld [smem:[#allocation25_spill]] }
  0x2e   : > { %v7243_v13 = vld [vmem:[%s9258_s4 + $0x8] sm:$0xff]   ;;  %v7245_v15 = vld [vmem:[%s9258_s4] sm:$0xff]   ;;  %v7247_v20 = vld [vmem:[%s9261_s9 + $0x38] sm:$0xff]   ;;  %s9267_s9 = sld [smem:[#allocation22_spill]] }
  0x2f   : > { %6570 = vmatpush3.bf16.msra.mxu1 %v7233_v3  ;;  %v7244_v14 = vld [vmem:[%s9259_s11 + $0x8] sm:$0xff]   ;;  %v865_v16 = vld [vmem:[%s7886_s8] sm:$0xff]  ;;  %v7248_v21 = vld [vmem:[%s9262_s29 + $0x30] sm:$0xff]   ;;  %s9271_s3 = sld [smem:[#allocation23_spill]] }
  0x30   : > { %6550 = vmatpush3.bf16.msra.mxu0 %v7234_v4  ;;  %6571 = vmatprep.subr.bf16.mxu1 %v7619_v1  ;;  %v866_v17 = vld [vmem:[%s7886_s8 + $0x8] sm:$0xff]  ;;  %v7246_v18 = vld [vmem:[%s9259_s11] sm:$0xff]   ;;  %v7251_v24 = vld [vmem:[%s9262_s29 + $0x18] sm:$0xff]   ;;  %s9272_s12 = sld [smem:[#allocation24_spill]] }
  0x31   : > { %6551 = vmatprep.subr.bf16.mxu0 %v7619_v1  ;;  %v7900_v19 = vpack.c.bf16 %v866_v17, %v865_v16  ;;  %v7249_v22 = vld [vmem:[%s9262_s29 + $0x28] sm:$0xff]   ;;  %v7250_v23 = vld [vmem:[%s9262_s29 + $0x20] sm:$0xff]   ;;  %v7252_v25 = vld [vmem:[%s9262_s29 + $0x10] sm:$0xff]   ;;  %s9273_s13 = sld [smem:[#allocation26_spill]] }
  0x32   : > { %v7253_v26 = vld [vmem:[%s9262_s29 + $0x8] sm:$0xff]   ;;  %v7254_v27 = vld [vmem:[%s9262_s29] sm:$0xff]   ;;  %s9274_s7 = sld [smem:[#allocation8_spill]] }
  0x33   : > { %6572 = vmatpush3.bf16.msra.mxu1 %v7235_v5  ;;  %v5627_v30 = vld [vmem:[%s9263_s1] ss:$0 sm:$0xff] }
  0x34   : > { %6552 = vmatpush3.bf16.msra.mxu0 %v7236_v6  ;;  %6573 = vmatprep.subr.bf16.mxu1 %v7619_v1  ;;  %v5618_v40 = vld [vmem:[%s9264_s6] ss:$0 sm:$0xff] }
  0x35   : > { %6553 = vmatprep.subr.bf16.mxu0 %v7619_v1  ;;  %v5636_v51 = vld [vmem:[%s9265_s0] ss:$0 sm:$0xff] }
  0x36   : > { %v7268_v16 = vld [vmem:[%s9258_s4 + $0x40] sm:$0xff]  }
  0x37   : > { %6574 = vmatpush3.bf16.msra.mxu1 %v7237_v7  ;;  %v7255_v7 = vld [vmem:[%s9258_s4 + $0x78] sm:$0xff]  }
  0x38   : > { %6554 = vmatpush3.bf16.msra.mxu0 %v7238_v8  ;;  %6575 = vmatprep.subr.bf16.mxu1 %v7619_v1  ;;  %v7256_v8 = vld [vmem:[%s9258_s4 + $0x70] sm:$0xff]  }
  0x39   : > { %6555 = vmatprep.subr.bf16.mxu0 %v7619_v1 }
  0x3b   : > { %6576 = vmatpush3.bf16.msra.mxu1 %v7239_v9  ;;  %v7257_v9 = vld [vmem:[%s9266_s27 + $0x8] sm:$0xff]  }
  0x3c   : > { %6556 = vmatpush3.bf16.msra.mxu0 %v7240_v10  ;;  %6577 = vmatprep.subr.bf16.mxu1 %v7619_v1  ;;  %v7258_v10 = vld [vmem:[%s9258_s4 + $0x68] sm:$0xff]  }
  0x3d   : > { %6557 = vmatprep.subr.bf16.mxu0 %v7619_v1 }
  0x3f   : > { %6578 = vmatpush3.bf16.msra.mxu1 %v7241_v11  ;;  %v7259_v11 = vld [vmem:[%s9266_s27] sm:$0xff]  }
  0x40   : > { %6558 = vmatpush3.bf16.msra.mxu0 %v7242_v12  ;;  %6579 = vmatprep.subr.bf16.mxu1 %v7619_v1  ;;  %v7260_v12 = vld [vmem:[%s9258_s4 + $0x60] sm:$0xff]  }
  0x41   : > { %6559 = vmatprep.subr.bf16.mxu0 %v7619_v1 }
  0x43   : > { %6580 = vmatpush3.bf16.msra.mxu1 %v7243_v13  ;;  %v7262_v13 = vld [vmem:[%s9258_s4 + $0x58] sm:$0xff]  }
  0x44   : > { %6560 = vmatpush3.bf16.msra.mxu0 %v7244_v14  ;;  %6581 = vmatprep.subr.bf16.mxu1 %v7619_v1  ;;  %v7264_v14 = vld [vmem:[%s9258_s4 + $0x50] sm:$0xff]  }
  0x45   : > { %6561 = vmatprep.subr.bf16.mxu0 %v7619_v1 }
  0x47   : > { %6582 = vmatpush3.bf16.msra.mxu1 %v7245_v15  ;;  %v7266_v15 = vld [vmem:[%s9258_s4 + $0x48] sm:$0xff]  }
  0x48   : > { %6562 = vmatpush3.bf16.msra.mxu0 %v7246_v18  ;;  %6607 = vmatprep.subr.bf16.mxu1 %v7619_v1 }
  0x49   : > { %6587 = vmatprep.subr.bf16.mxu0 %v7619_v1 }
  0x4a   : > { %6584 = vmatmul.mubr.bf16.vlgmr.msra.gmra.mxu1 %v7900_v19 }
  0x4b   : > { %6564 = vmatmul.mubr.bf16.vlgmr.msra.gmra.mxu0 %v7900_v19  ;;  %6609 = vmatprep.mubr.msk.bf16.mxu1 %vm7620_vm0, %v7619_v1 }
  0x4c   : > { %6603 = vmatprep.mubr.msk.bf16.mxu0 %vm7620_vm0, %v7619_v1  ;;  %6588 = vmatpush3.bf16.msra.mxu0 %v7247_v20 }
  0x4d   : > { %6589 = vmatprep.subr.bf16.mxu0 %v7619_v1 }
  0x50   : > { %6590 = vmatpush3.bf16.msra.mxu0 %v7248_v21 }
  0x51   : > { %6591 = vmatprep.subr.bf16.mxu0 %v7619_v1 }
  0x54   : > { %6592 = vmatpush3.bf16.msra.mxu0 %v7249_v22 }
  0x55   : > { %6593 = vmatprep.subr.bf16.mxu0 %v7619_v1 }
  0x58   : > { %6594 = vmatpush3.bf16.msra.mxu0 %v7250_v23 }
  0x59   : > { %6595 = vmatprep.subr.bf16.mxu0 %v7619_v1 }
  0x5c   : > { %6596 = vmatpush3.bf16.msra.mxu0 %v7251_v24 }
  0x5d   : > { %6597 = vmatprep.subr.bf16.mxu0 %v7619_v1 }
  0x60   : > { %6598 = vmatpush3.bf16.msra.mxu0 %v7252_v25 }
  0x61   : > { %6599 = vmatprep.subr.bf16.mxu0 %v7619_v1 }
  0x64   : > { %6600 = vmatpush3.bf16.msra.mxu0 %v7253_v26 }
  0x65   : > { %6601 = vmatprep.subr.bf16.mxu0 %v7619_v1 }
  0x68   : > { %6602 = vmatpush3.bf16.msra.mxu0 %v7254_v27 }
  0x69   : > { %6647 = vmatprep.subr.bf16.mxu0 %v7619_v1 }
  0x6b   : > { %6604 = vmatmul.mubr.bf16.vlgmr.msra.gmra.mxu0 %v7900_v19 }
  0x6c   : > { %6663 = vmatprep.mubr.msk.bf16.mxu0 %vm7620_vm0, %v7619_v1  ;;  %6648 = vmatpush3.bf16.msra.mxu0 %v7255_v7 }
  0x6d   : > { %6649 = vmatprep.subr.bf16.mxu0 %v7619_v1 }
  0x70   : > { %6650 = vmatpush3.bf16.msra.mxu0 %v7256_v8 }
  0x71   : > { %6651 = vmatprep.subr.bf16.mxu0 %v7619_v1 }
  0x74   : > { %6652 = vmatpush3.bf16.msra.mxu0 %v7258_v10 }
  0x75   : > { %6653 = vmatprep.subr.bf16.mxu0 %v7619_v1 }
  0x78   : > { %6654 = vmatpush3.bf16.msra.mxu0 %v7260_v12 }
  0x79   : > { %6655 = vmatprep.subr.bf16.mxu0 %v7619_v1 }
  0x7c   : > { %6656 = vmatpush3.bf16.msra.mxu0 %v7262_v13 }
  0x7d   : > { %6657 = vmatprep.subr.bf16.mxu0 %v7619_v1 }
  0x80   : > { %6658 = vmatpush3.bf16.msra.mxu0 %v7264_v14 }
  0x81   : > { %6659 = vmatprep.subr.bf16.mxu0 %v7619_v1 }
  0x84   : > { %6660 = vmatpush3.bf16.msra.mxu0 %v7266_v15 }
  0x85   : > { %6661 = vmatprep.subr.bf16.mxu0 %v7619_v1 }
  0x88   : > { %6662 = vmatpush3.bf16.msra.mxu0 %v7268_v16 }
  0x89   : > { %6687 = vmatprep.subr.bf16.mxu0 %v7619_v1 }
  0x8b   : > { %6664 = vmatmul.mubr.bf16.vlgmr.msra.gmra.mxu0 %v7900_v19 }
  0x8c   : > { %6689 = vmatprep.mubr.msk.bf16.mxu0 %vm7620_vm0, %v7619_v1 }
 0x10a   : > { %v1108_v28 = vpop.f32.mrf.mxu1 }
 0x10b   : > { %v1012_v29 = vpop.f32.mrf.mxu0  ;;  %v1109_v34 = vadd.f32 %v5627_v30, %v1108_v28  ;;  %v7261_v28 = vld [vmem:[%s9259_s11 + $0x78] sm:$0xff]  }
 0x10c   : > { %v6585_v31 = vpop.f32.mrf.mxu1  ;;  %v1013_v42 = vadd.f32 %v5618_v40, %v1012_v29 }
 0x10d   : > { %v6565_v32 = vpop.f32.mrf.mxu0  ;;  %v7265_v31 = vld [vmem:[%s9259_s11 + $0x68] sm:$0xff]  }
 0x10e   : > { %v1111_v33 = vpop.f32.mrf.mxu1  ;;  %v7267_v32 = vld [vmem:[%s9259_s11 + $0x60] sm:$0xff]  }
 0x10f   : > { %v1112_v35 = vadd.f32 %v5627_v30, %v1111_v33  ;;  %v1015_v36 = vpop.f32.mrf.mxu0  ;;  %v7263_v30 = vld [vmem:[%s9259_s11 + $0x70] sm:$0xff]   ;;  %v7269_v33 = vld [vmem:[%s9259_s11 + $0x58] sm:$0xff]  }
 0x110   : > { %v6586_v37 = vpop.f32.mrf.mxu1  ;;  %v1016_v43 = vadd.f32 %v5618_v40, %v1015_v36  ;;  %v7272_v36 = vld [vmem:[%s9259_s11 + $0x40] sm:$0xff]  }
 0x111   : > { %v1212_v38 = vpack.c.bf16 %v1112_v35, %v1109_v34  ;;  %v6566_v39 = vpop.f32.mrf.mxu0  ;;  %v7270_v34 = vld [vmem:[%s9259_s11 + $0x50] sm:$0xff]   ;;  %v7271_v35 = vld [vmem:[%s9259_s11 + $0x48] sm:$0xff]   ;;  %v5714_v37 = vld [vmem:[%s9263_s1 + $0x1] ss:$0 sm:$0xff] }
 0x112   : > { %v1211_v44 = vpack.c.bf16 %v1016_v43, %v1013_v42 }
 0x113   : > { %v1218_v41 = vsel %vm1213_vm1, %v1212_v38, 0 }
 0x114   : > { %6608 = vmatpush3.bf16.xpose.msra.mxu1 %v1218_v41 }
 0x115   : > { %6613 = vmatprep.subr.bf16.mxu1 %v7619_v1 }
 0x11b   : > { %6610 = vmatmul.mubr.msk.bf16.vlgmr.msra.gmra.mxu1 %vm1213_vm1, %v1211_v44 }
 0x11c   : > { %6615 = vmatprep.mubr.msk.bf16.mxu1 %vm7620_vm0, %v7619_v1 }
 0x12b   : > { %v1204_v52 = vpop.f32.mrf.mxu0 }
 0x12c   : > { %v1205_v54 = vadd.f32 %v5636_v51, %v1204_v52  ;;  %v7279_v52 = vld [vmem:[%s9262_s29 + $0x48] sm:$0xff]  }
 0x12d   : > { %v6605_v53 = vpop.f32.mrf.mxu0 }
 0x12e   : > { %v7280_v53 = vld [vmem:[%s9262_s29 + $0x40] sm:$0xff]  }
 0x12f   : > { %v1207_v55 = vpop.f32.mrf.mxu0 }
 0x130   : > { %v1208_v56 = vadd.f32 %v5636_v51, %v1207_v55  ;;  %v7278_v51 = vld [vmem:[%s9262_s29 + $0x50] sm:$0xff]  }
 0x131   : > { %v6606_v57 = vpop.f32.mrf.mxu0 }
 0x132   : > { %v1281_v58 = vpack.c.bf16 %v1208_v56, %v1205_v54 }
 0x134   : > { %6614 = vmatpush3.bf16.msra.mxu1 %v1281_v58 }
 0x135   : > { %6619 = vmatprep.subr.bf16.mxu1 %v7619_v1 }
 0x14b   : > { %v1638_v38 = vpop.f32.mrf.mxu0 }
 0x14c   : > { %v1639_v40 = vadd.f32 %v5714_v37, %v1638_v38  ;;  %v7294_v38 = vld [vmem:[%s9258_s4 + $0x80] sm:$0xff]  }
 0x14d   : > { %v6665_v39 = vpop.f32.mrf.mxu0 }
 0x14f   : > { %v1641_v41 = vpop.f32.mrf.mxu0 }
 0x150   : > { %v1642_v42 = vadd.f32 %v5714_v37, %v1641_v41  ;;  %v7292_v37 = vld [vmem:[%s9258_s4 + $0x88] sm:$0xff]  }
 0x151   : > { %v6666_v43 = vpop.f32.mrf.mxu0 }
 0x152   : > { %v1743_v44 = vpack.c.bf16 %v1642_v42, %v1639_v40 }
 0x1db   : > { %v1254_v45 = vpop.f32.mrf.mxu1 }
 0x1dc   : > { %v1262_v46 = vsel %vm1261_vm2, %v1254_v45, -inf }
 0x1dd   : > { %1263 = vmax.xlane.f32.xlu0 %v1262_v46  ;;  %v6611_v47 = vpop.f32.mrf.mxu1  ;;  %v7273_v46 = vld [vmem:[%s9262_s29 + $0x78] sm:$0xff]  }
 0x1de   : > { %v7274_v47 = vld [vmem:[%s9262_s29 + $0x70] sm:$0xff]  }
 0x1df   : > { %v1257_v48 = vpop.f32.mrf.mxu1 }
 0x1e0   : > { %v1265_v49 = vsel %vm1261_vm2, %v1257_v48, -inf }
 0x1e1   : > { %1266 = vmax.xlane.f32.xlu0 %v1265_v49  ;;  %v6612_v50 = vpop.f32.mrf.mxu1  ;;  %v7276_v49 = vld [vmem:[%s9262_s29 + $0x60] sm:$0xff]  }
 0x1e2   : > { %v7277_v50 = vld [vmem:[%s9262_s29 + $0x58] sm:$0xff]  }
 0x266   : > { %v1264_v59 = vpop.xlane.xlu0 %1263 }
 0x267   : > { %v1268_v60 = vsub.f32 %v1254_v45, %v1264_v59  ;;  %v1748_v45 = vsel %vm1213_vm1, %v1743_v44, 0  ;;  %v5704_v59 = vld [vmem:[%s9264_s6 + $0x1] ss:$0 sm:$0xff] }
 0x268   : > { %6688 = vmatpush3.bf16.xpose.msra.mxu0 %v1748_v45 }
 0x269   : > { %v1270_v61 = vmul.f32 1.442695, %v1268_v60  ;;  %6693 = vmatprep.subr.bf16.mxu0 %v7619_v1 }
 0x26a   : > { %v1267_v62 = vpop.xlane.xlu0 %1266 }
 0x26b   : > { %7479 = vpow2.f32 %v1270_v61  ;;  %v1269_v63 = vsub.f32 %v1257_v48, %v1267_v62  ;;  %v7275_v48 = vld [vmem:[%s9262_s29 + $0x68] sm:$0xff]  }
 0x26d   : > { %v1272_v0 = vmul.f32 1.442695, %v1269_v63 }
 0x26f   : > { %7481 = vpow2.f32 %v1272_v0 }
 0x278   : > { %v7480_v2 = vpop.eup %7479 }
 0x279   : > { %v1274_v3 = vsel %vm1261_vm2, %v7480_v2, 0.0 }
 0x27a   : > { %1275 = vadd.xlane.f32.xlu1 %v1274_v3 }
 0x27c   : > { %v7482_v4 = vpop.eup %7481 }
 0x27d   : > { %v1277_v5 = vsel %vm1261_vm2, %v7482_v4, 0.0  ;;  %v1280_v6 = vpack.c.bf16 %v7482_v4, %v7480_v2 }
 0x27e   : > { %1278 = vadd.xlane.f32.xlu1 %v1277_v5 }
 0x27f   : > { %6616 = vmatmul.mubr.msk.bf16.vlgmr.msra.gmra.mxu1 %vm1261_vm2, %v1280_v6 }
 0x280   : > { %6623 = vmatprep.mubr.msk.bf16.mxu1 %vm7620_vm0, %v7619_v1  ;;  %6620 = vmatpush3.bf16.msra.mxu1 %v7257_v9  ;;  %v5724_v9 = vld [vmem:[%s9265_s0 + $0x1] ss:$0 sm:$0xff] }
 0x281   : > { %6621 = vmatprep.subr.bf16.mxu1 %v7619_v1 }
 0x284   : > { %6622 = vmatpush3.bf16.msra.mxu1 %v7259_v11 }
 0x285   : > { %6627 = vmatprep.subr.bf16.mxu1 %v7619_v1 }
 0x303   : > { %v1276_v17 = vpop.xlane.xlu1 %1275 }
 0x304   : > { %7483 = vrcp.f32 %v1276_v17 }
 0x307   : > { %v1279_v18 = vpop.xlane.xlu1 %1278 }
 0x308   : > { %7485 = vrcp.f32 %v1279_v18 }
 0x311   : > { %v7484_v22 = vpop.eup %7483 }
 0x315   : > { %v7486_v23 = vpop.eup %7485 }
 0x33f   : > { %v1319_v20 = vpop.f32.mrf.mxu1 }
 0x340   : > { %v1328_v25 = vmul.f32 %v7484_v22, %v1319_v20 }
 0x341   : > { %v6617_v21 = vpop.f32.mrf.mxu1 }
 0x343   : > { %v1322_v24 = vpop.f32.mrf.mxu1 }
 0x344   : > { %v1329_v26 = vmul.f32 %v7486_v23, %v1322_v24 }
 0x345   : > { %v6618_v27 = vpop.f32.mrf.mxu1 }
 0x346   : > { %v1330_v29 = vpack.c.bf16 %v1329_v26, %v1328_v25 }
 0x348   : > { %6624 = vmatmul.mubr.msk.bf16.vlgmr.msra.gmra.mxu1 %vm1213_vm1, %v1330_v29  ;;  %v7281_v29 = vld [vmem:[%s9258_s4 + $0xb8] sm:$0xff]  }
 0x349   : > { %6628 = vmatpush3.bf16.msra.mxu1 %v7261_v28  ;;  %6643 = vmatprep.mubr.msk.bf16.mxu1 %vm7620_vm0, %v7619_v1 }
 0x34a   : > { %6629 = vmatprep.subr.bf16.mxu1 %v7619_v1 }
 0x34d   : > { %6630 = vmatpush3.bf16.msra.mxu1 %v7263_v30  ;;  %v7282_v30 = vld [vmem:[%s9258_s4 + $0xb0] sm:$0xff]  }
 0x34e   : > { %6631 = vmatprep.subr.bf16.mxu1 %v7619_v1 }
 0x351   : > { %6632 = vmatpush3.bf16.msra.mxu1 %v7265_v31  ;;  %v7283_v31 = vld [vmem:[%s9266_s27 + $0x18] sm:$0xff]  }
 0x352   : > { %6633 = vmatprep.subr.bf16.mxu1 %v7619_v1 }
 0x355   : > { %6634 = vmatpush3.bf16.msra.mxu1 %v7267_v32  ;;  %v7284_v32 = vld [vmem:[%s9258_s4 + $0xa8] sm:$0xff]  }
 0x356   : > { %6635 = vmatprep.subr.bf16.mxu1 %v7619_v1 }
 0x359   : > { %6636 = vmatpush3.bf16.msra.mxu1 %v7269_v33  ;;  %v7285_v33 = vld [vmem:[%s9266_s27 + $0x10] sm:$0xff]  }
 0x35a   : > { %6637 = vmatprep.subr.bf16.mxu1 %v7619_v1 }
 0x35d   : > { %6638 = vmatpush3.bf16.msra.mxu1 %v7270_v34  ;;  %v7286_v34 = vld [vmem:[%s9258_s4 + $0xa0] sm:$0xff]  }
 0x35e   : > { %6639 = vmatprep.subr.bf16.mxu1 %v7619_v1 }
 0x361   : > { %6640 = vmatpush3.bf16.msra.mxu1 %v7271_v35  ;;  %v7288_v35 = vld [vmem:[%s9258_s4 + $0x98] sm:$0xff]  }
 0x362   : > { %6641 = vmatprep.subr.bf16.mxu1 %v7619_v1 }
 0x365   : > { %6642 = vmatpush3.bf16.msra.mxu1 %v7272_v36  ;;  %v7290_v36 = vld [vmem:[%s9258_s4 + $0x90] sm:$0xff]  }
 0x366   : > { %6667 = vmatprep.subr.bf16.mxu1 %v7619_v1 }
 0x368   : > { %6644 = vmatmul.mubr.bf16.vlgmr.msra.gmra.mxu1 %v7900_v19 }
 0x369   : > { %6683 = vmatprep.mubr.msk.bf16.mxu1 %vm7620_vm0, %v7619_v1  ;;  %6668 = vmatpush3.bf16.msra.mxu1 %v7273_v46 }
 0x36a   : > { %6669 = vmatprep.subr.bf16.mxu1 %v7619_v1 }
 0x36d   : > { %6670 = vmatpush3.bf16.msra.mxu1 %v7274_v47 }
 0x36e   : > { %6671 = vmatprep.subr.bf16.mxu1 %v7619_v1 }
 0x371   : > { %6672 = vmatpush3.bf16.msra.mxu1 %v7275_v48 }
 0x372   : > { %6673 = vmatprep.subr.bf16.mxu1 %v7619_v1 }
 0x375   : > { %6674 = vmatpush3.bf16.msra.mxu1 %v7276_v49  ;;  %v7287_v49 = vld [vmem:[%s9259_s11 + $0xb8] sm:$0xff]  }
 0x376   : > { %6675 = vmatprep.subr.bf16.mxu1 %v7619_v1 }
 0x379   : > { %6676 = vmatpush3.bf16.msra.mxu1 %v7277_v50 }
 0x37a   : > { %6677 = vmatprep.subr.bf16.mxu1 %v7619_v1 }
 0x37d   : > { %6678 = vmatpush3.bf16.msra.mxu1 %v7278_v51  ;;  %v7289_v51 = vld [vmem:[%s9259_s11 + $0xb0] sm:$0xff]  }
 0x37e   : > { %6679 = vmatprep.subr.bf16.mxu1 %v7619_v1 }
 0x381   : > { %6680 = vmatpush3.bf16.msra.mxu1 %v7279_v52  ;;  %v7291_v52 = vld [vmem:[%s9259_s11 + $0xa8] sm:$0xff]  }
 0x382   : > { %6681 = vmatprep.subr.bf16.mxu1 %v7619_v1 }
 0x385   : > { %6682 = vmatpush3.bf16.msra.mxu1 %v7280_v53  ;;  %v7293_v53 = vld [vmem:[%s9259_s11 + $0xa0] sm:$0xff]  }
 0x386   : > { %6727 = vmatprep.subr.bf16.mxu1 %v7619_v1 }
 0x388   : > { %6684 = vmatmul.mubr.bf16.vlgmr.msra.gmra.mxu1 %v7900_v19 }
 0x389   : > { %6743 = vmatprep.mubr.msk.bf16.mxu1 %vm7620_vm0, %v7619_v1  ;;  %6728 = vmatpush3.bf16.msra.mxu1 %v7281_v29 }
 0x38a   : > { %6729 = vmatprep.subr.bf16.mxu1 %v7619_v1 }
 0x38d   : > { %6730 = vmatpush3.bf16.msra.mxu1 %v7282_v30 }
 0x38e   : > { %6731 = vmatprep.subr.bf16.mxu1 %v7619_v1 }
 0x391   : > { %6732 = vmatpush3.bf16.msra.mxu1 %v7284_v32 }
 0x392   : > { %6733 = vmatprep.subr.bf16.mxu1 %v7619_v1 }
 0x395   : > { %6734 = vmatpush3.bf16.msra.mxu1 %v7286_v34 }
 0x396   : > { %6735 = vmatprep.subr.bf16.mxu1 %v7619_v1 }
 0x399   : > { %6736 = vmatpush3.bf16.msra.mxu1 %v7288_v35 }
 0x39a   : > { %6737 = vmatprep.subr.bf16.mxu1 %v7619_v1 }
 0x39d   : > { %6738 = vmatpush3.bf16.msra.mxu1 %v7290_v36  ;;  %v5811_v36 = vld [vmem:[%s9265_s0 + $0x2] ss:$0 sm:$0xff] }
 0x39e   : > { %6739 = vmatprep.subr.bf16.mxu1 %v7619_v1 }
 0x3a1   : > { %6740 = vmatpush3.bf16.msra.mxu1 %v7292_v37 }
 0x3a2   : > { %6741 = vmatprep.subr.bf16.mxu1 %v7619_v1 }
 0x3a5   : > { %6742 = vmatpush3.bf16.msra.mxu1 %v7294_v38 }
 0x3a6   : > { %6767 = vmatprep.subr.bf16.mxu1 %v7619_v1 }
 0x3a8   : > { %6744 = vmatmul.mubr.bf16.vlgmr.msra.gmra.mxu1 %v7900_v19 }
 0x3a9   : > { %6769 = vmatprep.mubr.msk.bf16.mxu1 %vm7620_vm0, %v7619_v1 }
 0x408   : > { %v8088_v54 = vpop.f32.mrf.mxu1 }
 0x40a   : > { %v6625_v55 = vpop.f32.mrf.mxu1 }
 0x40b   : > { %v7295_v55 = vld [vmem:[%s9259_s11 + $0x98] sm:$0xff]  }
 0x40c   : > { %v8090_v56 = vpop.f32.mrf.mxu1 }
 0x40e   : > { %v6626_v57 = vpop.f32.mrf.mxu1 }
 0x40f   : > { %v7296_v57 = vld [vmem:[%s9259_s11 + $0x90] sm:$0xff]  }
 0x428   : > { %v1541_v58 = vpop.f32.mrf.mxu1 }
 0x429   : > { %v1542_v62 = vadd.f32 %v5704_v59, %v1541_v58  ;;  %v7297_v58 = vld [vmem:[%s9259_s11 + $0x88] sm:$0xff]  }
 0x42a   : > { %v6645_v60 = vpop.f32.mrf.mxu1 }
 0x42b   : > { %v5801_v60 = vld [vmem:[%s9263_s1 + $0x2] ss:$0 sm:$0xff] }
 0x42c   : > { %v1544_v61 = vpop.f32.mrf.mxu1 }
 0x42d   : > { %v1545_v63 = vadd.f32 %v5704_v59, %v1544_v61  ;;  %v7298_v59 = vld [vmem:[%s9259_s11 + $0x80] sm:$0xff]  }
 0x42e   : > { %v6646_v0 = vpop.f32.mrf.mxu1 }
 0x42f   : > { %v1742_v2 = vpack.c.bf16 %v1545_v63, %v1542_v62 }
 0x431   : > { %6690 = vmatmul.mubr.msk.bf16.vlgmr.msra.gmra.mxu0 %vm1213_vm1, %v1742_v2 }
 0x432   : > { %6695 = vmatprep.mubr.msk.bf16.mxu0 %vm7620_vm0, %v7619_v1 }
 0x448   : > { %v1735_v10 = vpop.f32.mrf.mxu1 }
 0x449   : > { %v1736_v12 = vadd.f32 %v5724_v9, %v1735_v10  ;;  %v7303_v10 = vld [vmem:[%s9262_s29 + $0x98] sm:$0xff]  }
 0x44a   : > { %v6685_v11 = vpop.f32.mrf.mxu1 }
 0x44b   : > { %v7304_v11 = vld [vmem:[%s9262_s29 + $0x90] sm:$0xff]  }
 0x44c   : > { %v1738_v13 = vpop.f32.mrf.mxu1 }
 0x44d   : > { %v1739_v14 = vadd.f32 %v5724_v9, %v1738_v13  ;;  %v7302_v9 = vld [vmem:[%s9262_s29 + $0xa0] sm:$0xff]  }
 0x44e   : > { %v6686_v15 = vpop.f32.mrf.mxu1  ;;  %v7306_v13 = vld [vmem:[%s9262_s29 + $0x80] sm:$0xff]  }
 0x44f   : > { %v1810_v16 = vpack.c.bf16 %v1739_v14, %v1736_v12  ;;  %v7305_v12 = vld [vmem:[%s9262_s29 + $0x88] sm:$0xff]   ;;  %v5650_v14 = vld [vmem:[%s9267_s9] ss:$0 sm:$0xff] }
 0x450   : > { %v1393_v15 = vadd.f32 %v5650_v14, %v8088_v54 }
 0x451   : > { %6694 = vmatpush3.bf16.msra.mxu0 %v1810_v16 }
 0x452   : > { %6699 = vmatprep.subr.bf16.mxu0 %v7619_v1 }
 0x468   : > { %v2161_v61 = vpop.f32.mrf.mxu1 }
 0x469   : > { %v2162_v63 = vadd.f32 %v5801_v60, %v2161_v61  ;;  %v7311_v61 = vld [vmem:[%s9266_s27 + $0x20] sm:$0xff]  }
 0x46a   : > { %v6745_v62 = vpop.f32.mrf.mxu1 }
 0x46b   : > { %v7312_v62 = vld [vmem:[%s9258_s4 + $0xe0] sm:$0xff]  }
 0x46c   : > { %v2164_v0 = vpop.f32.mrf.mxu1 }
 0x46d   : > { %v2165_v2 = vadd.f32 %v5801_v60, %v2164_v0  ;;  %v7310_v60 = vld [vmem:[%s9258_s4 + $0xe8] sm:$0xff]   ;;  %v7316_v0 = vld [vmem:[%s9258_s4 + $0xd0] sm:$0xff]  }
 0x4f1   : > { %v1784_v3 = vpop.f32.mrf.mxu0 }
 0x4f2   : > { %v1791_v4 = vsel %vm1261_vm2, %v1784_v3, -inf }
 0x4f3   : > { %1792 = vmax.xlane.f32.xlu0 %v1791_v4  ;;  %v6691_v5 = vpop.f32.mrf.mxu0  ;;  %v2266_v4 = vpack.c.bf16 %v2165_v2, %v2162_v63  ;;  %v7314_v63 = vld [vmem:[%s9258_s4 + $0xd8] sm:$0xff]   ;;  %v7318_v2 = vld [vmem:[%s9258_s4 + $0xc8] sm:$0xff]  }
 0x4f5   : > { %v1787_v6 = vpop.f32.mrf.mxu0  ;;  %v2271_v5 = vsel %vm1213_vm1, %v2266_v4, 0 }
 0x4f6   : > { %v1794_v7 = vsel %vm1261_vm2, %v1787_v6, -inf  ;;  %6768 = vmatpush3.bf16.xpose.msra.mxu1 %v2271_v5 }
 0x4f7   : > { %1795 = vmax.xlane.f32.xlu1 %v1794_v7  ;;  %v6692_v8 = vpop.f32.mrf.mxu0  ;;  %6773 = vmatprep.subr.bf16.mxu1 %v7619_v1  ;;  %v7300_v7 = vld [vmem:[%s9262_s29 + $0xb0] sm:$0xff]  }
 0x4f8   : > { %v7301_v8 = vld [vmem:[%s9262_s29 + $0xa8] sm:$0xff]  }
 0x57c   : > { %v1793_v17 = vpop.xlane.xlu0 %1792 }
 0x57d   : > { %v1797_v18 = vsub.f32 %v1784_v3, %v1793_v17  ;;  %v6746_v3 = vpop.f32.mrf.mxu1 }
 0x57e   : > { %v7320_v3 = vld [vmem:[%s9258_s4 + $0xc0] sm:$0xff]  }
 0x57f   : > { %v1799_v20 = vmul.f32 1.442695, %v1797_v18 }
 0x580   : > { %v1796_v21 = vpop.xlane.xlu1 %1795 }
 0x581   : > { %7487 = vpow2.f32 %v1799_v20  ;;  %v1798_v22 = vsub.f32 %v1787_v6, %v1796_v21  ;;  %v7299_v6 = vld [vmem:[%s9262_s29 + $0xb8] sm:$0xff]   ;;  %v1394_v20 = vadd.f32 %v5650_v14, %v8090_v56 }
 0x582   : > { %v7313_v14 = vld [vmem:[%s9259_s11 + $0xf8] sm:$0xff]  }
 0x583   : > { %v1801_v23 = vmul.f32 1.442695, %v1798_v22 }
 0x585   : > { %7489 = vpow2.f32 %v1801_v23 }
 0x58e   : > { %v7488_v24 = vpop.eup %7487 }
 0x58f   : > { %v1803_v25 = vsel %vm1261_vm2, %v7488_v24, 0.0 }
 0x590   : > { %1804 = vadd.xlane.f32.xlu0 %v1803_v25  ;;  %v5791_v25 = vld [vmem:[%s9264_s6 + $0x2] ss:$0 sm:$0xff] }
 0x592   : > { %v7490_v26 = vpop.eup %7489 }
 0x593   : > { %v1806_v27 = vsel %vm1261_vm2, %v7490_v26, 0.0  ;;  %v1809_v28 = vpack.c.bf16 %v7490_v26, %v7488_v24 }
 0x594   : > { %1807 = vadd.xlane.f32.xlu1 %v1806_v27 }
 0x595   : > { %6696 = vmatmul.mubr.msk.bf16.vlgmr.msra.gmra.mxu0 %vm1261_vm2, %v1809_v28 }
 0x596   : > { %6703 = vmatprep.mubr.msk.bf16.mxu0 %vm7620_vm0, %v7619_v1  ;;  %6700 = vmatpush3.bf16.msra.mxu0 %v7283_v31 }
 0x597   : > { %6701 = vmatprep.subr.bf16.mxu0 %v7619_v1 }
 0x59a   : > { %6702 = vmatpush3.bf16.msra.mxu0 %v7285_v33 }
 0x59b   : > { %6707 = vmatprep.subr.bf16.mxu0 %v7619_v1 }
 0x619   : > { %v1805_v39 = vpop.xlane.xlu0 %1804 }
 0x61a   : > { %7491 = vrcp.f32 %v1805_v39 }
 0x61d   : > { %v1808_v40 = vpop.xlane.xlu1 %1807 }
 0x61e   : > { %7493 = vrcp.f32 %v1808_v40 }
 0x627   : > { %v7492_v43 = vpop.eup %7491 }
 0x62b   : > { %v7494_v44 = vpop.eup %7493 }
 0x655   : > { %v1848_v41 = vpop.f32.mrf.mxu0 }
 0x656   : > { %v1857_v46 = vmul.f32 %v7492_v43, %v1848_v41 }
 0x657   : > { %v6697_v42 = vpop.f32.mrf.mxu0 }
 0x659   : > { %v1851_v45 = vpop.f32.mrf.mxu0 }
 0x65a   : > { %v1858_v47 = vmul.f32 %v7494_v44, %v1851_v45 }
 0x65b   : > { %v6698_v48 = vpop.f32.mrf.mxu0 }
 0x65c   : > { %v1859_v50 = vpack.c.bf16 %v1858_v47, %v1857_v46 }
 0x65e   : > { %6704 = vmatmul.mubr.msk.bf16.vlgmr.msra.gmra.mxu0 %vm1213_vm1, %v1859_v50 }
 0x65f   : > { %6708 = vmatpush3.bf16.msra.mxu0 %v7287_v49  ;;  %6723 = vmatprep.mubr.msk.bf16.mxu0 %vm7620_vm0, %v7619_v1 }
 0x660   : > { %6709 = vmatprep.subr.bf16.mxu0 %v7619_v1 }
 0x663   : > { %6710 = vmatpush3.bf16.msra.mxu0 %v7289_v51 }
 0x664   : > { %6711 = vmatprep.subr.bf16.mxu0 %v7619_v1 }
 0x667   : > { %6712 = vmatpush3.bf16.msra.mxu0 %v7291_v52 }
 0x668   : > { %6713 = vmatprep.subr.bf16.mxu0 %v7619_v1 }
 0x66b   : > { %6714 = vmatpush3.bf16.msra.mxu0 %v7293_v53 }
 0x66c   : > { %6715 = vmatprep.subr.bf16.mxu0 %v7619_v1 }
 0x66f   : > { %6716 = vmatpush3.bf16.msra.mxu0 %v7295_v55 }
 0x670   : > { %6717 = vmatprep.subr.bf16.mxu0 %v7619_v1 }
 0x673   : > { %6718 = vmatpush3.bf16.msra.mxu0 %v7296_v57  ;;  %v7307_v57 = vld [vmem:[%s9258_s4 + $0xf8] sm:$0xff]  }
 0x674   : > { %6719 = vmatprep.subr.bf16.mxu0 %v7619_v1 }
 0x677   : > { %6720 = vmatpush3.bf16.msra.mxu0 %v7297_v58  ;;  %v7308_v58 = vld [vmem:[%s9258_s4 + $0xf0] sm:$0xff]  }
 0x678   : > { %6721 = vmatprep.subr.bf16.mxu0 %v7619_v1 }
 0x67b   : > { %6722 = vmatpush3.bf16.msra.mxu0 %v7298_v59  ;;  %v7309_v59 = vld [vmem:[%s9266_s27 + $0x28] sm:$0xff]  }
 0x67c   : > { %6747 = vmatprep.subr.bf16.mxu0 %v7619_v1 }
 0x67e   : > { %6724 = vmatmul.mubr.bf16.vlgmr.msra.gmra.mxu0 %v7900_v19 }
 0x67f   : > { %6763 = vmatprep.mubr.msk.bf16.mxu0 %vm7620_vm0, %v7619_v1  ;;  %6748 = vmatpush3.bf16.msra.mxu0 %v7299_v6 }
 0x680   : > { %6749 = vmatprep.subr.bf16.mxu0 %v7619_v1 }
 0x683   : > { %6750 = vmatpush3.bf16.msra.mxu0 %v7300_v7 }
 0x684   : > { %6751 = vmatprep.subr.bf16.mxu0 %v7619_v1 }
 0x687   : > { %6752 = vmatpush3.bf16.msra.mxu0 %v7301_v8 }
 0x688   : > { %6753 = vmatprep.subr.bf16.mxu0 %v7619_v1 }
 0x68b   : > { %6754 = vmatpush3.bf16.msra.mxu0 %v7302_v9 }
 0x68c   : > { %6755 = vmatprep.subr.bf16.mxu0 %v7619_v1 }
 0x68f   : > { %6756 = vmatpush3.bf16.msra.mxu0 %v7303_v10 }
 0x690   : > { %6757 = vmatprep.subr.bf16.mxu0 %v7619_v1 }
 0x693   : > { %6758 = vmatpush3.bf16.msra.mxu0 %v7304_v11 }
 0x694   : > { %6759 = vmatprep.subr.bf16.mxu0 %v7619_v1 }
 0x697   : > { %6760 = vmatpush3.bf16.msra.mxu0 %v7305_v12 }
 0x698   : > { %6761 = vmatprep.subr.bf16.mxu0 %v7619_v1 }
 0x69b   : > { %6762 = vmatpush3.bf16.msra.mxu0 %v7306_v13 }
 0x69c   : > { %6807 = vmatprep.subr.bf16.mxu0 %v7619_v1 }
 0x69e   : > { %6764 = vmatmul.mubr.bf16.vlgmr.msra.gmra.mxu0 %v7900_v19 }
 0x69f   : > { %6823 = vmatprep.mubr.msk.bf16.mxu0 %vm7620_vm0, %v7619_v1  ;;  %6808 = vmatpush3.bf16.msra.mxu0 %v7307_v57 }
 0x6a0   : > { %6809 = vmatprep.subr.bf16.mxu0 %v7619_v1 }
 0x6a3   : > { %6810 = vmatpush3.bf16.msra.mxu0 %v7308_v58 }
 0x6a4   : > { %6811 = vmatprep.subr.bf16.mxu0 %v7619_v1 }
 0x6a7   : > { %6812 = vmatpush3.bf16.msra.mxu0 %v7310_v60  ;;  %v5898_v60 = vld [vmem:[%s9265_s0 + $0x3] ss:$0 sm:$0xff] }
 0x6a8   : > { %6813 = vmatprep.subr.bf16.mxu0 %v7619_v1 }
 0x6ab   : > { %6814 = vmatpush3.bf16.msra.mxu0 %v7312_v62 }
 0x6ac   : > { %6815 = vmatprep.subr.bf16.mxu0 %v7619_v1 }
 0x6af   : > { %6816 = vmatpush3.bf16.msra.mxu0 %v7314_v63 }
 0x6b0   : > { %6817 = vmatprep.subr.bf16.mxu0 %v7619_v1 }
 0x6b3   : > { %6818 = vmatpush3.bf16.msra.mxu0 %v7316_v0 }
 0x6b4   : > { %6819 = vmatprep.subr.bf16.mxu0 %v7619_v1 }
 0x6b7   : > { %6820 = vmatpush3.bf16.msra.mxu0 %v7318_v2 }
 0x6b8   : > { %6821 = vmatprep.subr.bf16.mxu0 %v7619_v1 }
 0x6bb   : > { %6822 = vmatpush3.bf16.msra.mxu0 %v7320_v3 }
 0x6bc   : > { %6847 = vmatprep.subr.bf16.mxu0 %v7619_v1 }
 0x6be   : > { %6824 = vmatmul.mubr.bf16.vlgmr.msra.gmra.mxu0 %v7900_v19 }
 0x6bf   : > { %6849 = vmatprep.mubr.msk.bf16.mxu0 %vm7620_vm0, %v7619_v1 }
 0x71e   : > { %v1909_v16 = vpop.f32.mrf.mxu0 }
 0x71f   : > { %v8234_v17 = vadd.f32 %v1909_v16, %v1393_v15  ;;  %v7315_v16 = vld [vmem:[%s9259_s11 + $0xf0] sm:$0xff]  }
 0x720   : > { %v6705_v18 = vpop.f32.mrf.mxu0 }
 0x721   : > { %v7317_v18 = vld [vmem:[%s9259_s11 + $0xe8] sm:$0xff]  }
 0x722   : > { %v1912_v21 = vpop.f32.mrf.mxu0 }
 0x723   : > { %v8237_v22 = vadd.f32 %v1912_v21, %v1394_v20  ;;  %v7319_v20 = vld [vmem:[%s9259_s11 + $0xe0] sm:$0xff]   ;;  %v7321_v21 = vld [vmem:[%s9259_s11 + $0xd8] sm:$0xff]  }
 0x724   : > { %v6706_v23 = vpop.f32.mrf.mxu0 }
 0x725   : > { %v7322_v23 = vld [vmem:[%s9259_s11 + $0xd0] sm:$0xff]  }
 0x73e   : > { %v2064_v24 = vpop.f32.mrf.mxu0 }
 0x73f   : > { %v2065_v28 = vadd.f32 %v5791_v25, %v2064_v24  ;;  %v7323_v24 = vld [vmem:[%s9259_s11 + $0xc8] sm:$0xff]  }
 0x740   : > { %v6725_v26 = vpop.f32.mrf.mxu0 }
 0x741   : > { %v5888_v26 = vld [vmem:[%s9263_s1 + $0x3] ss:$0 sm:$0xff]  ;;  %s9270_s1 = sld [smem:[#allocation14_spill]] }
 0x742   : > { %v2067_v27 = vpop.f32.mrf.mxu0 }
 0x743   : > { %v2068_v29 = vadd.f32 %v5791_v25, %v2067_v27  ;;  %v7324_v25 = vld [vmem:[%s9259_s11 + $0xc0] sm:$0xff]  }
 0x744   : > { %v6726_v54 = vpop.f32.mrf.mxu0 }
 0x745   : > { %v2265_v30 = vpack.c.bf16 %v2068_v29, %v2065_v28 }
 0x747   : > { %6770 = vmatmul.mubr.msk.bf16.vlgmr.msra.gmra.mxu1 %vm1213_vm1, %v2265_v30 }
 0x748   : > { %6775 = vmatprep.mubr.msk.bf16.mxu1 %vm7620_vm0, %v7619_v1 }
 0x75e   : > { %v2258_v37 = vpop.f32.mrf.mxu0 }
 0x75f   : > { %v2259_v39 = vadd.f32 %v5811_v36, %v2258_v37  ;;  %v7329_v37 = vld [vmem:[%s9262_s29 + $0xd8] sm:$0xff]  }
 0x760   : > { %v6765_v38 = vpop.f32.mrf.mxu0 }
 0x761   : > { %v7330_v38 = vld [vmem:[%s9262_s29 + $0xd0] sm:$0xff]  }
 0x762   : > { %v2261_v40 = vpop.f32.mrf.mxu0 }
 0x763   : > { %v2262_v41 = vadd.f32 %v5811_v36, %v2261_v40  ;;  %v7328_v36 = vld [vmem:[%s9262_s29 + $0xe0] sm:$0xff]  }
 0x764   : > { %v6766_v42 = vpop.f32.mrf.mxu0  ;;  %v7332_v40 = vld [vmem:[%s9262_s29 + $0xc0] sm:$0xff]  }
 0x765   : > { %v2333_v43 = vpack.c.bf16 %v2262_v41, %v2259_v39  ;;  %v7331_v39 = vld [vmem:[%s9262_s29 + $0xc8] sm:$0xff]  }
 0x767   : > { %6774 = vmatpush3.bf16.msra.mxu1 %v2333_v43 }
 0x768   : > { %6779 = vmatprep.subr.bf16.mxu1 %v7619_v1 }
 0x77e   : > { %v2684_v27 = vpop.f32.mrf.mxu0 }
 0x77f   : > { %v2685_v29 = vadd.f32 %v5888_v26, %v2684_v27 }
 0x780   : > { %v6825_v28 = vpop.f32.mrf.mxu0 }
 0x782   : > { %v2687_v54 = vpop.f32.mrf.mxu0 }
 0x783   : > { %v2688_v30 = vadd.f32 %v5888_v26, %v2687_v54 }
 0x807   : > { %v2307_v56 = vpop.f32.mrf.mxu1 }
 0x808   : > { %v2314_v31 = vsel %vm1261_vm2, %v2307_v56, -inf }
 0x809   : > { %2315 = vmax.xlane.f32.xlu0 %v2314_v31  ;;  %v6771_v32 = vpop.f32.mrf.mxu1  ;;  %v2789_v31 = vpack.c.bf16 %v2688_v30, %v2685_v29 }
 0x80b   : > { %v2310_v33 = vpop.f32.mrf.mxu1  ;;  %v2794_v32 = vsel %vm1213_vm1, %v2789_v31, 0 }
 0x80c   : > { %v2317_v34 = vsel %vm1261_vm2, %v2310_v33, -inf  ;;  %6848 = vmatpush3.bf16.xpose.msra.mxu0 %v2794_v32 }
 0x80d   : > { %2318 = vmax.xlane.f32.xlu1 %v2317_v34  ;;  %v6772_v35 = vpop.f32.mrf.mxu1  ;;  %6853 = vmatprep.subr.bf16.mxu0 %v7619_v1  ;;  %v7326_v34 = vld [vmem:[%s9262_s29 + $0xf0] sm:$0xff]  }
 0x80e   : > { %v7327_v35 = vld [vmem:[%s9262_s29 + $0xe8] sm:$0xff]  }
 0x892   : > { %v2316_v44 = vpop.xlane.xlu0 %2315 }
 0x893   : > { %v2320_v45 = vsub.f32 %v2307_v56, %v2316_v44  ;;  %v6826_v56 = vpop.f32.mrf.mxu0 }
 0x895   : > { %v2322_v46 = vmul.f32 1.442695, %v2320_v45 }
 0x896   : > { %v2319_v47 = vpop.xlane.xlu1 %2318 }
 0x897   : > { %7495 = vpow2.f32 %v2322_v46  ;;  %v2321_v48 = vsub.f32 %v2310_v33, %v2319_v47  ;;  %v7325_v33 = vld [vmem:[%s9262_s29 + $0xf8] sm:$0xff]  }
 0x899   : > { %v2324_v49 = vmul.f32 1.442695, %v2321_v48  ;;  %v5878_v48 = vld [vmem:[%s9264_s6 + $0x3] ss:$0 sm:$0xff] }
 0x89b   : > { %7497 = vpow2.f32 %v2324_v49 }
 0x8a4   : > { %v7496_v50 = vpop.eup %7495 }
 0x8a5   : > { %v2326_v51 = vsel %vm1261_vm2, %v7496_v50, 0.0 }
 0x8a6   : > { %2327 = vadd.xlane.f32.xlu0 %v2326_v51 }
 0x8a8   : > { %v7498_v52 = vpop.eup %7497 }
 0x8a9   : > { %v2329_v53 = vsel %vm1261_vm2, %v7498_v52, 0.0  ;;  %v2332_v55 = vpack.c.bf16 %v7498_v52, %v7496_v50 }
 0x8aa   : > { %2330 = vadd.xlane.f32.xlu1 %v2329_v53 }
 0x8ab   : > { %6776 = vmatmul.mubr.msk.bf16.vlgmr.msra.gmra.mxu1 %vm1261_vm2, %v2332_v55 }
 0x8ac   : > { %6783 = vmatprep.mubr.msk.bf16.mxu1 %vm7620_vm0, %v7619_v1  ;;  %6780 = vmatpush3.bf16.msra.mxu1 %v7309_v59 }
 0x8ad   : > { %6781 = vmatprep.subr.bf16.mxu1 %v7619_v1 }
 0x8b0   : > { %6782 = vmatpush3.bf16.msra.mxu1 %v7311_v61 }
 0x8b1   : > { %6787 = vmatprep.subr.bf16.mxu1 %v7619_v1 }
 0x92f   : > { %v2328_v4 = vpop.xlane.xlu0 %2327 }
 0x930   : > { %7499 = vrcp.f32 %v2328_v4 }
 0x933   : > { %v2331_v5 = vpop.xlane.xlu1 %2330 }
 0x934   : > { %7501 = vrcp.f32 %v2331_v5 }
 0x93d   : > { %v7500_v8 = vpop.eup %7499 }
 0x941   : > { %v7502_v9 = vpop.eup %7501 }
 0x96b   : > { %v2371_v6 = vpop.f32.mrf.mxu1 }
 0x96c   : > { %v2380_v11 = vmul.f32 %v7500_v8, %v2371_v6 }
 0x96d   : > { %v6777_v7 = vpop.f32.mrf.mxu1 }
 0x96f   : > { %v2374_v10 = vpop.f32.mrf.mxu1 }
 0x970   : > { %v2381_v12 = vmul.f32 %v7502_v9, %v2374_v10 }
 0x971   : > { %v6778_v13 = vpop.f32.mrf.mxu1 }
 0x972   : > { %v2382_v15 = vpack.c.bf16 %v2381_v12, %v2380_v11 }
 0x974   : > { %6784 = vmatmul.mubr.msk.bf16.vlgmr.msra.gmra.mxu1 %vm1213_vm1, %v2382_v15 }
 0x975   : > { %6788 = vmatpush3.bf16.msra.mxu1 %v7313_v14  ;;  %6803 = vmatprep.mubr.msk.bf16.mxu1 %vm7620_vm0, %v7619_v1 }
 0x976   : > { %6789 = vmatprep.subr.bf16.mxu1 %v7619_v1 }
 0x979   : > { %6790 = vmatpush3.bf16.msra.mxu1 %v7315_v16  ;;  %v7333_v16 = vld [vmem:[%s9266_s27 + $0x38] sm:$0xff]  }
 0x97a   : > { %6791 = vmatprep.subr.bf16.mxu1 %v7619_v1 }
 0x97d   : > { %6792 = vmatpush3.bf16.msra.mxu1 %v7317_v18  ;;  %v7334_v18 = vld [vmem:[%s9266_s27 + $0x30] sm:$0xff]  }
 0x97e   : > { %6793 = vmatprep.subr.bf16.mxu1 %v7619_v1 }
 0x981   : > { %6794 = vmatpush3.bf16.msra.mxu1 %v7319_v20 }
 0x982   : > { %6795 = vmatprep.subr.bf16.mxu1 %v7619_v1 }
 0x985   : > { %6796 = vmatpush3.bf16.msra.mxu1 %v7321_v21 }
 0x986   : > { %6797 = vmatprep.subr.bf16.mxu1 %v7619_v1 }
 0x989   : > { %6798 = vmatpush3.bf16.msra.mxu1 %v7322_v23 }
 0x98a   : > { %6799 = vmatprep.subr.bf16.mxu1 %v7619_v1 }
 0x98d   : > { %6800 = vmatpush3.bf16.msra.mxu1 %v7323_v24 }
 0x98e   : > { %6801 = vmatprep.subr.bf16.mxu1 %v7619_v1 }
 0x991   : > { %6802 = vmatpush3.bf16.msra.mxu1 %v7324_v25 }
 0x992   : > { %6827 = vmatprep.subr.bf16.mxu1 %v7619_v1 }
 0x994   : > { %6804 = vmatmul.mubr.bf16.vlgmr.msra.gmra.mxu1 %v7900_v19 }
 0x995   : > { %6843 = vmatprep.mubr.msk.bf16.mxu1 %vm7620_vm0, %v7619_v1  ;;  %6828 = vmatpush3.bf16.msra.mxu1 %v7325_v33  ;;  %v7555_v33 = vld [vmem:[%s7886_s8] sm:$0xff] }
 0x996   : > { %6829 = vmatprep.subr.bf16.mxu1 %v7619_v1 }
 0x999   : > { %6830 = vmatpush3.bf16.msra.mxu1 %v7326_v34 }
 0x99a   : > { %6831 = vmatprep.subr.bf16.mxu1 %v7619_v1 }
 0x99d   : > { %6832 = vmatpush3.bf16.msra.mxu1 %v7327_v35 }
 0x99e   : > { %6833 = vmatprep.subr.bf16.mxu1 %v7619_v1 }
 0x9a1   : > { %6834 = vmatpush3.bf16.msra.mxu1 %v7328_v36 }
 0x9a2   : > { %6835 = vmatprep.subr.bf16.mxu1 %v7619_v1 }
 0x9a5   : > { %6836 = vmatpush3.bf16.msra.mxu1 %v7329_v37 }
 0x9a6   : > { %6837 = vmatprep.subr.bf16.mxu1 %v7619_v1 }
 0x9a9   : > { %6838 = vmatpush3.bf16.msra.mxu1 %v7330_v38  ;;  %v7556_v38 = vld [vmem:[%s7886_s8 + $0x8] sm:$0xff]  ;;  %s9269_s8 = sshll.u32 %s7856_s10, 4  ;;  %s9278_s10 = sld [smem:[#allocation29_spill]] }
 0x9aa   : > { %6839 = vmatprep.subr.bf16.mxu1 %v7619_v1  ;;  %s863_s4 = scalar_lea.vmem %s9270_s1, %s9269_s8  ;;  %s9276_s8 = sld [smem:[#allocation28_spill]] }
 0x9ad   : > { %6840 = vmatpush3.bf16.msra.mxu1 %v7331_v39 }
 0x9ae   : > { %6841 = vmatprep.subr.bf16.mxu1 %v7619_v1 }
 0x9b1   : > { %6842 = vmatpush3.bf16.msra.mxu1 %v7332_v40  ;;  %v7335_v40 = vld [vmem:[%s9192_s14 + $0x38] sm:$0xff]  }
 0x9b2   : > { %6887 = vmatprep.subr.bf16.mxu1 %v7619_v1 }
 0x9b4   : > { %6844 = vmatmul.mubr.bf16.vlgmr.msra.gmra.mxu1 %v7900_v19 }
 0x9b5   : > { %6903 = vmatprep.mubr.msk.bf16.mxu1 %vm7620_vm0, %v7619_v1  ;;  %6888 = vmatpush3.bf16.msra.mxu1 %v7335_v40 }
 0x9b6   : > { %6889 = vmatprep.subr.bf16.mxu1 %v7619_v1 }
 0xa34   : > { %v2432_v41 = vpop.f32.mrf.mxu1 }
 0xa35   : > { %v8378_v42 = vadd.f32 %v2432_v41, %v8234_v17  ;;  %v7339_v41 = vld [vmem:[%s9268_s28 + $0x38] sm:$0xff]  }
 0xa36   : > { %v6785_v43 = vpop.f32.mrf.mxu1 }
 0xa37   : > { %v7337_v43 = vld [vmem:[%s9192_s14 + $0x28] sm:$0xff]  }
 0xa38   : > { %v2435_v44 = vpop.f32.mrf.mxu1 }
 0xa39   : > { %v8381_v45 = vadd.f32 %v2435_v44, %v8237_v22  ;;  %v7338_v44 = vld [vmem:[%s9192_s14 + $0x20] sm:$0xff]  }
 0xa3a   : > { %v6786_v46 = vpop.f32.mrf.mxu1 }
 0xa54   : > { %v2587_v47 = vpop.f32.mrf.mxu1 }
 0xa55   : > { %v2588_v50 = vadd.f32 %v5878_v48, %v2587_v47 }
 0xa56   : > { %v6805_v49 = vpop.f32.mrf.mxu1 }
 0xa58   : > { %v2590_v19 = vpop.f32.mrf.mxu1 }
 0xa59   : > { %v2591_v51 = vadd.f32 %v5878_v48, %v2590_v19 }
 0xa5a   : > { %v6806_v52 = vpop.f32.mrf.mxu1 }
 0xa5b   : > { %v2788_v53 = vpack.c.bf16 %v2591_v51, %v2588_v50  ;;  %v7340_v52 = vld [vmem:[%s9192_s14 + $0x18] sm:$0xff]  }
 0xa5d   : > { %6850 = vmatmul.mubr.msk.bf16.vlgmr.msra.gmra.mxu0 %vm1213_vm1, %v2788_v53  ;;  %v7341_v53 = vld [vmem:[%s9268_s28 + $0x30] sm:$0xff]  }
 0xa5e   : > { %6855 = vmatprep.mubr.msk.bf16.mxu0 %vm7620_vm0, %v7619_v1 }
 0xa74   : > { %v2781_v61 = vpop.f32.mrf.mxu1 }
 0xa75   : > { %v2782_v63 = vadd.f32 %v5898_v60, %v2781_v61  ;;  %v7347_v61 = vld [vmem:[%s9268_s28 + $0x18] sm:$0xff]  }
 0xa76   : > { %v6845_v62 = vpop.f32.mrf.mxu1 }
 0xa78   : > { %v2784_v0 = vpop.f32.mrf.mxu1 }
 0xa79   : > { %v2785_v2 = vadd.f32 %v5898_v60, %v2784_v0  ;;  %v868_v60 = vld [vmem:[%s863_s4 + $0x8] sm:$0xff] }
 0xa7a   : > { %v6846_v3 = vpop.f32.mrf.mxu1  ;;  %v7349_v0 = vld [vmem:[%s9268_s28 + $0x8] sm:$0xff]  }
 0xa7b   : > { %v2856_v4 = vpack.c.bf16 %v2785_v2, %v2782_v63  ;;  %v7348_v63 = vld [vmem:[%s9268_s28 + $0x10] sm:$0xff]   ;;  %v7350_v2 = vld [vmem:[%s9268_s28] sm:$0xff]  }
 0xa7d   : > { %6854 = vmatpush3.bf16.msra.mxu0 %v2856_v4 }
 0xa7e   : > { %6859 = vmatprep.subr.bf16.mxu0 %v7619_v1 }
 0xb1d   : > { %v2830_v17 = vpop.f32.mrf.mxu0 }
 0xb1e   : > { %v2837_v22 = vsel %vm1261_vm2, %v2830_v17, -inf }
 0xb1f   : > { %2838 = vmax.xlane.f32.xlu0 %v2837_v22  ;;  %v6851_v55 = vpop.f32.mrf.mxu0  ;;  %v7343_v22 = vld [vmem:[%s9268_s28 + $0x28] sm:$0xff]  }
 0xb20   : > { %v7344_v55 = vld [vmem:[%s9192_s14 + $0x8] sm:$0xff]  }
 0xb21   : > { %v2833_v57 = vpop.f32.mrf.mxu0 }
 0xb22   : > { %v2840_v58 = vsel %vm1261_vm2, %v2833_v57, -inf }
 0xb23   : > { %2841 = vmax.xlane.f32.xlu1 %v2840_v58  ;;  %v6852_v59 = vpop.f32.mrf.mxu0  ;;  %v7346_v58 = vld [vmem:[%s9192_s14] sm:$0xff]  }
 0xb24   : > { %v867_v59 = vld [vmem:[%s863_s4] sm:$0xff]  ;;  %s9275_s4 = sld [smem:[#allocation27_spill]] }
 0xb25   : > { %v8470_v62 = vpack.c.bf16 %v868_v60, %v867_v59 }
 0xba8   : > { %v2839_v5 = vpop.xlane.xlu0 %2838 }
 0xba9   : > { %v2843_v6 = vsub.f32 %v2830_v17, %v2839_v5  ;;  %v7342_v17 = vld [vmem:[%s9192_s14 + $0x10] sm:$0xff]  }
 0xbab   : > { %v2845_v7 = vmul.f32 1.442695, %v2843_v6 }
 0xbac   : > { %v2842_v8 = vpop.xlane.xlu1 %2841 }
 0xbad   : > { %7503 = vpow2.f32 %v2845_v7  ;;  %v2844_v9 = vsub.f32 %v2833_v57, %v2842_v8  ;;  %v7345_v57 = vld [vmem:[%s9268_s28 + $0x20] sm:$0xff]  }
 0xbaf   : > { %v2847_v10 = vmul.f32 1.442695, %v2844_v9 }
 0xbb1   : > { %7505 = vpow2.f32 %v2847_v10 }
 0xbba   : > { %v7504_v11 = vpop.eup %7503 }
 0xbbb   : > { %v2849_v12 = vsel %vm1261_vm2, %v7504_v11, 0.0 }
 0xbbc   : > { %2850 = vadd.xlane.f32.xlu0 %v2849_v12 }
 0xbbe   : > { %v7506_v13 = vpop.eup %7505 }
 0xbbf   : > { %v2852_v14 = vsel %vm1261_vm2, %v7506_v13, 0.0  ;;  %v2855_v15 = vpack.c.bf16 %v7506_v13, %v7504_v11  ;;  %v5912_v11 = vld [vmem:[%s9271_s3] ss:$0 sm:$0xff]  ;;  %s6252_s3 = sshll.u32 %s9274_s7, 8  ;;  %s7622_s7 = smov [#allocation2]  }
 0xbc0   : > { %2853 = vadd.xlane.f32.xlu1 %v2852_v14  ;;  %s9134_s1 = scalar_lea.hbm %s9278_s10, %s6252_s3 }
 0xbc1   : > { %6856 = vmatmul.mubr.msk.bf16.vlgmr.msra.gmra.mxu0 %vm1261_vm2, %v2855_v15  ;;  %v5913_v15 = vld [vmem:[%s9272_s12] ss:$0 sm:$0xff]  ;;  %s851_s12 = sand.u32 1, %s7609_s5  }
 0xbc2   : > { %6863 = vmatprep.mubr.msk.bf16.mxu0 %vm7620_vm0, %v7619_v1  ;;  %6860 = vmatpush3.bf16.msra.mxu0 %v7333_v16  ;;  %s5613_s0 = sshll.u32 %s851_s12, 4 }
 0xbc3   : > { %6861 = vmatprep.subr.bf16.mxu0 %v7619_v1  ;;  %s853_s2 = scalar_lea.vmem [#allocation2], %s5613_s0  ;;  %s7561_s0 = sshll.u32 %s7622_s7, 4  ;;  %s7562_s0 = int_to_ptr.vmem [resolvable:$false] %s7561_s0 }
 0xbc4   : > { %s5535_s6 = sshll.u32 %s853_s2, 4  ;;  %s9136_s6 = int_to_ptr.vmem [resolvable:$true] %s5535_s6 }
 0xbc5   : > { %s7557_s9 = scalar_lea.vmem %s9136_s6, 256  ;;  %p7564_p0 = scmp.lt.s32.totalorder %s9136_s6, %s7562_s0 }
 0xbc6   : > { %6862 = vmatpush3.bf16.msra.mxu0 %v7334_v18  ;;  %p7558_p11 = scmp.ne.s32.totalorder %s9136_s6, %s7557_s9 }
 0xbc7   : > { %6867 = vmatprep.subr.bf16.mxu0 %v7619_v1 }
 0xbc8   : > { %p7559_p12 = pnand %p7558_p11, %p7808_p5 }
 0xbca   : > { %p7560_p13 = pneg %p7559_p12 }
 0xc45   : > { %v2851_v20 = vpop.xlane.xlu0 %2850 }
 0xc46   : > { %7507 = vrcp.f32 %v2851_v20 }
 0xc49   : > { %v2854_v21 = vpop.xlane.xlu1 %2853 }
 0xc4a   : > { %7509 = vrcp.f32 %v2854_v21 }
 0xc53   : > { %v7508_v25 = vpop.eup %7507 }
 0xc57   : > { %v7510_v26 = vpop.eup %7509 }
 0xc81   : > { %v2894_v23 = vpop.f32.mrf.mxu0 }
 0xc82   : > { %v2903_v28 = vmul.f32 %v7508_v25, %v2894_v23  ;;  %v5923_v23 = vld [vmem:[%s9193_s15] ss:$0 sm:$0xff] }
 0xc83   : > { %v6857_v24 = vpop.f32.mrf.mxu0 }
 0xc85   : > { %v2897_v27 = vpop.f32.mrf.mxu0 }
 0xc86   : > { %v2904_v29 = vmul.f32 %v7510_v26, %v2897_v27 }
 0xc87   : > { %v6858_v54 = vpop.f32.mrf.mxu0 }
 0xc88   : > { %v2905_v30 = vpack.c.bf16 %v2904_v29, %v2903_v28 }
 0xc8a   : > { %6864 = vmatmul.mubr.msk.bf16.vlgmr.msra.gmra.mxu0 %vm1213_vm1, %v2905_v30 }
 0xc8b   : > { %6883 = vmatprep.mubr.msk.bf16.mxu0 %vm7620_vm0, %v7619_v1  ;;  %6868 = vmatpush3.bf16.msra.mxu0 %v7339_v41 }
 0xc8c   : > { %6869 = vmatprep.subr.bf16.mxu0 %v7619_v1 }
 0xc8f   : > { %6870 = vmatpush3.bf16.msra.mxu0 %v7341_v53 }
 0xc90   : > { %6871 = vmatprep.subr.bf16.mxu0 %v7619_v1 }
 0xc93   : > { %6872 = vmatpush3.bf16.msra.mxu0 %v7343_v22 }
 0xc94   : > { %6873 = vmatprep.subr.bf16.mxu0 %v7619_v1 }
 0xc97   : > { %6874 = vmatpush3.bf16.msra.mxu0 %v7345_v57 }
 0xc98   : > { %6875 = vmatprep.subr.bf16.mxu0 %v7619_v1 }
 0xc9b   : > { %6876 = vmatpush3.bf16.msra.mxu0 %v7347_v61 }
 0xc9c   : > { %6877 = vmatprep.subr.bf16.mxu0 %v7619_v1 }
 0xc9f   : > { %6878 = vmatpush3.bf16.msra.mxu0 %v7348_v63 }
 0xca0   : > { %6879 = vmatprep.subr.bf16.mxu0 %v7619_v1 }
 0xca3   : > { %6880 = vmatpush3.bf16.msra.mxu0 %v7349_v0 }
 0xca4   : > { %6881 = vmatprep.subr.bf16.mxu0 %v7619_v1 }
 0xca7   : > { %6882 = vmatpush3.bf16.msra.mxu0 %v7350_v2 }
 0xca8   : > { %6907 = vmatprep.subr.bf16.mxu0 %v7619_v1 }
 0xd4a   : > { %v2955_v56 = vpop.f32.mrf.mxu0 }
 0xd4b   : > { %v2962_v31 = vadd.f32 %v2955_v56, %v8378_v42  ;;  %v7336_v42 = vld [vmem:[%s9192_s14 + $0x30] sm:$0xff]   ;;  %v7351_v56 = vld [vmem:[%s9194_s16 + $0x38] sm:$0xff]  }
 0xd4c   : > { %v6865_v32 = vpop.f32.mrf.mxu0  ;;  %6890 = vmatpush3.bf16.msra.mxu1 %v7336_v42 }
 0xd4d   : > { %v2964_v34 = vadd.f32 %v7555_v33, %v2962_v31  ;;  %6891 = vmatprep.subr.bf16.mxu1 %v7619_v1  ;;  %v7352_v31 = vld [vmem:[%s9194_s16 + $0x30] sm:$0xff]   ;;  %v7353_v32 = vld [vmem:[%s9194_s16 + $0x28] sm:$0xff]   ;;  %v7354_v33 = vld [vmem:[%s9194_s16 + $0x20] sm:$0xff]  }
 0xd4e   : > { %v2958_v35 = vpop.f32.mrf.mxu0 }
 0xd4f   : > { %v2963_v36 = vadd.f32 %v2958_v35, %v8381_v45  ;;  %2968 = vadd.xlane.f32.xlu0 %v2964_v34  ;;  %v7356_v35 = vld [vmem:[%s9194_s16 + $0x10] sm:$0xff]  }
 0xd50   : > { %v6866_v37 = vpop.f32.mrf.mxu0  ;;  %6892 = vmatpush3.bf16.msra.mxu1 %v7337_v43 }
 0xd51   : > { %v2965_v39 = vadd.f32 %v7556_v38, %v2963_v36  ;;  %6893 = vmatprep.subr.bf16.mxu1 %v7619_v1  ;;  %v7357_v36 = vld [vmem:[%s9194_s16 + $0x8] sm:$0xff]   ;;  %v7358_v37 = vld [vmem:[%s9194_s16] sm:$0xff]  }
 0xd53   : > { %2970 = vadd.xlane.f32.xlu1 %v2965_v39 }
 0xd54   : > { %6894 = vmatpush3.bf16.msra.mxu1 %v7338_v44 }
 0xd55   : > { %6895 = vmatprep.subr.bf16.mxu1 %v7619_v1 }
 0xd58   : > { %6896 = vmatpush3.bf16.msra.mxu1 %v7340_v52 }
 0xd59   : > { %6897 = vmatprep.subr.bf16.mxu1 %v7619_v1 }
 0xd5c   : > { %6898 = vmatpush3.bf16.msra.mxu1 %v7342_v17 }
 0xd5d   : > { %6899 = vmatprep.subr.bf16.mxu1 %v7619_v1 }
 0xd60   : > { %6900 = vmatpush3.bf16.msra.mxu1 %v7344_v55 }
 0xd61   : > { %6901 = vmatprep.subr.bf16.mxu1 %v7619_v1 }
 0xd64   : > { %6902 = vmatpush3.bf16.msra.mxu1 %v7346_v58 }
 0xd65   : > { %6927 = vmatprep.subr.bf16.mxu1 %v7619_v1 }
 0xd67   : > { %6904 = vmatmul.mubr.bf16.vlgmr.msra.gmra.mxu1 %v8470_v62 }
 0xd68   : > { %6929 = vmatprep.mubr.msk.bf16.mxu1 %vm7620_vm0, %v7619_v1 }
 0xdd8   : > { %v2969_v45 = vpop.xlane.xlu0 %2968 }
 0xdd9   : > { %v2973_v46 = vmul.f32 0.0078125, %v2969_v45 }
 0xddb   : > { %v2975_v47 = vsub.f32 %v2964_v34, %v2973_v46  ;;  %v7355_v34 = vld [vmem:[%s9194_s16 + $0x18] sm:$0xff]  }
 0xddc   : > { %v2971_v48 = vpop.xlane.xlu1 %2970 }
 0xddd   : > { %v2974_v49 = vmul.f32 0.0078125, %v2971_v48  ;;  %v2977_v19 = vmul.f32 %v2975_v47, %v2975_v47 }
 0xddf   : > { %v2976_v50 = vsub.f32 %v2965_v39, %v2974_v49  ;;  %2979 = vadd.xlane.f32.xlu0 %v2977_v19  ;;  %v5914_v39 = vld [vmem:[%s9273_s13] ss:$0 sm:$0xff] }
 0xde1   : > { %v2978_v51 = vmul.f32 %v2976_v50, %v2976_v50 }
 0xde3   : > { %2981 = vadd.xlane.f32.xlu1 %v2978_v51  ;;  %v5932_v51 = vld [vmem:[%s9195_s17] ss:$0 sm:$0xff] }
 0xe27   : > { %v3247_v24 = vpop.f32.mrf.mxu1 }
 0xe28   : > { %v3248_v26 = vadd.f32 %v5923_v23, %v3247_v24 }
 0xe29   : > { %v6905_v25 = vpop.f32.mrf.mxu1 }
 0xe2b   : > { %v3250_v27 = vpop.f32.mrf.mxu1 }
 0xe2c   : > { %v3251_v28 = vadd.f32 %v5923_v23, %v3250_v27  ;;  %v7372_v23 = vld [vmem:[%s9192_s14 + $0x40] sm:$0xff]  }
 0xe2d   : > { %v6906_v29 = vpop.f32.mrf.mxu1 }
 0xe2e   : > { %v3351_v54 = vpack.c.bf16 %v3251_v28, %v3248_v26 }
 0xe30   : > { %v3356_v30 = vsel %vm1213_vm1, %v3351_v54, 0 }
 0xe31   : > { %6928 = vmatpush3.bf16.xpose.msra.mxu1 %v3356_v30 }
 0xe32   : > { %6933 = vmatprep.subr.bf16.mxu1 %v7619_v1 }
 0xe68   : > { %v2980_v3 = vpop.xlane.xlu0 %2979 }
 0xe69   : > { %v2983_v4 = vmul.f32 0.0078125, %v2980_v3 }
 0xe6b   : > { %v2985_v5 = vadd.f32 1e-05, %v2983_v4 }
 0xe6c   : > { %v2982_v6 = vpop.xlane.xlu1 %2981 }
 0xe6d   : > { %7511 = vrsqrt.f32 %v2985_v5  ;;  %v2984_v7 = vmul.f32 0.0078125, %v2982_v6 }
 0xe6f   : > { %v2986_v8 = vadd.f32 1e-05, %v2984_v7 }
 0xe71   : > { %7513 = vrsqrt.f32 %v2986_v8  ;;  %v7359_v8 = vld [vmem:[%s9192_s14 + $0x78] sm:$0xff]  }
 0xe7a   : > { %v7512_v9 = vpop.eup %7511 }
 0xe7b   : > { %v2989_v10 = vmul.f32 %v7512_v9, %v2975_v47  ;;  %v7360_v9 = vld [vmem:[%s9192_s14 + $0x70] sm:$0xff]  }
 0xe7d   : > { %v2997_v14 = vmul.f32 %v5912_v11, %v2989_v10  ;;  %v7361_v10 = vld [vmem:[%s9196_s18 + $0x8] sm:$0xff]  }
 0xe7e   : > { %v7514_v12 = vpop.eup %7513 }
 0xe7f   : > { %v2990_v13 = vmul.f32 %v7514_v12, %v2976_v50  ;;  %v8495_v18 = vadd.f32 %v5913_v15, %v2997_v14  ;;  %v7363_v12 = vld [vmem:[%s9196_s18] sm:$0xff]   ;;  %v7366_v14 = vld [vmem:[%s9192_s14 + $0x58] sm:$0xff]  }
 0xe81   : > { %v2998_v16 = vmul.f32 %v5912_v11, %v2990_v13  ;;  %v7362_v11 = vld [vmem:[%s9192_s14 + $0x68] sm:$0xff]   ;;  %v7364_v13 = vld [vmem:[%s9192_s14 + $0x60] sm:$0xff]  }
 0xe83   : > { %v8497_v20 = vadd.f32 %v5913_v15, %v2998_v16  ;;  %v7368_v15 = vld [vmem:[%s9192_s14 + $0x50] sm:$0xff]   ;;  %v7370_v16 = vld [vmem:[%s9192_s14 + $0x48] sm:$0xff]  }
 0xe85   : > { %v8501_v21 = vpack.c.bf16 %v8497_v20, %v8495_v18 }
 0xe87   : > { %6884 = vmatmul.mubr.bf16.vlgmr.msra.gmra.mxu0 %v8501_v21 }
 0xe88   : > { %6923 = vmatprep.mubr.msk.bf16.mxu0 %vm7620_vm0, %v7619_v1  ;;  %6908 = vmatpush3.bf16.msra.mxu0 %v7351_v56 }
 0xe89   : > { %6909 = vmatprep.subr.bf16.mxu0 %v7619_v1 }
 0xe8c   : > { %6910 = vmatpush3.bf16.msra.mxu0 %v7352_v31 }
 0xe8d   : > { %6911 = vmatprep.subr.bf16.mxu0 %v7619_v1 }
 0xe90   : > { %6912 = vmatpush3.bf16.msra.mxu0 %v7353_v32  ;;  %v7365_v32 = vld [vmem:[%s9268_s28 + $0x78] sm:$0xff]  }
 0xe91   : > { %6913 = vmatprep.subr.bf16.mxu0 %v7619_v1 }
 0xe94   : > { %6914 = vmatpush3.bf16.msra.mxu0 %v7354_v33 }
 0xe95   : > { %6915 = vmatprep.subr.bf16.mxu0 %v7619_v1 }
 0xe98   : > { %6916 = vmatpush3.bf16.msra.mxu0 %v7355_v34  ;;  %v7367_v34 = vld [vmem:[%s9268_s28 + $0x70] sm:$0xff]  }
 0xe99   : > { %6917 = vmatprep.subr.bf16.mxu0 %v7619_v1 }
 0xe9c   : > { %6918 = vmatpush3.bf16.msra.mxu0 %v7356_v35  ;;  %v7369_v35 = vld [vmem:[%s9268_s28 + $0x68] sm:$0xff]  }
 0xe9d   : > { %6919 = vmatprep.subr.bf16.mxu0 %v7619_v1 }
 0xea0   : > { %6920 = vmatpush3.bf16.msra.mxu0 %v7357_v36  ;;  %v7371_v36 = vld [vmem:[%s9268_s28 + $0x60] sm:$0xff]  }
 0xea1   : > { %6921 = vmatprep.subr.bf16.mxu0 %v7619_v1 }
 0xea4   : > { %6922 = vmatpush3.bf16.msra.mxu0 %v7358_v37  ;;  %v7373_v37 = vld [vmem:[%s9268_s28 + $0x58] sm:$0xff]  }
 0xea5   : > { %6967 = vmatprep.subr.bf16.mxu0 %v7619_v1 }
 0xea7   : > { %6924 = vmatmul.mubr.bf16.vlgmr.msra.gmra.mxu0 %v8470_v62 }
 0xea8   : > { %6983 = vmatprep.mubr.msk.bf16.mxu0 %vm7620_vm0, %v7619_v1  ;;  %6968 = vmatpush3.bf16.msra.mxu0 %v7359_v8 }
 0xea9   : > { %6969 = vmatprep.subr.bf16.mxu0 %v7619_v1 }
 0xeac   : > { %6970 = vmatpush3.bf16.msra.mxu0 %v7360_v9 }
 0xead   : > { %6971 = vmatprep.subr.bf16.mxu0 %v7619_v1 }
 0xeb0   : > { %6972 = vmatpush3.bf16.msra.mxu0 %v7362_v11 }
 0xeb1   : > { %6973 = vmatprep.subr.bf16.mxu0 %v7619_v1 }
 0xeb4   : > { %6974 = vmatpush3.bf16.msra.mxu0 %v7364_v13  ;;  %v6020_v13 = vld [vmem:[%s9195_s17 + $0x1] ss:$0 sm:$0xff] }
 0xeb5   : > { %6975 = vmatprep.subr.bf16.mxu0 %v7619_v1 }
 0xeb8   : > { %6976 = vmatpush3.bf16.msra.mxu0 %v7366_v14 }
 0xeb9   : > { %6977 = vmatprep.subr.bf16.mxu0 %v7619_v1 }
 0xebc   : > { %6978 = vmatpush3.bf16.msra.mxu0 %v7368_v15 }
 0xebd   : > { %6979 = vmatprep.subr.bf16.mxu0 %v7619_v1 }
 0xec0   : > { %6980 = vmatpush3.bf16.msra.mxu0 %v7370_v16 }
 0xec1   : > { %6981 = vmatprep.subr.bf16.mxu0 %v7619_v1 }
 0xec4   : > { %6982 = vmatpush3.bf16.msra.mxu0 %v7372_v23 }
 0xec5   : > { %7007 = vmatprep.subr.bf16.mxu0 %v7619_v1 }
 0xec7   : > { %6984 = vmatmul.mubr.bf16.vlgmr.msra.gmra.mxu0 %v8470_v62 }
 0xec8   : > { %7009 = vmatprep.mubr.msk.bf16.mxu0 %vm7620_vm0, %v7619_v1 }
 0xf47   : > { %v3151_v38 = vpop.f32.mrf.mxu0 }
 0xf48   : > { %v3152_v42 = vadd.f32 %v5914_v39, %v3151_v38  ;;  %v7374_v38 = vld [vmem:[%s9268_s28 + $0x50] sm:$0xff]  }
 0xf49   : > { %v6885_v40 = vpop.f32.mrf.mxu0 }
 0xf4a   : > { %v7376_v40 = vld [vmem:[%s9268_s28 + $0x40] sm:$0xff]  }
 0xf4b   : > { %v3154_v41 = vpop.f32.mrf.mxu0 }
 0xf4c   : > { %v3155_v43 = vadd.f32 %v5914_v39, %v3154_v41  ;;  %v7375_v39 = vld [vmem:[%s9268_s28 + $0x48] sm:$0xff]   ;;  %v6010_v41 = vld [vmem:[%s9193_s15 + $0x1] ss:$0 sm:$0xff] }
 0xf4d   : > { %v6886_v44 = vpop.f32.mrf.mxu0 }
 0xf4e   : > { %v3350_v45 = vpack.c.bf16 %v3155_v43, %v3152_v42 }
 0xf50   : > { %6930 = vmatmul.mubr.msk.bf16.vlgmr.msra.gmra.mxu1 %vm1213_vm1, %v3350_v45 }
 0xf51   : > { %6935 = vmatprep.mubr.msk.bf16.mxu1 %vm7620_vm0, %v7619_v1 }
 0xf67   : > { %v3343_v52 = vpop.f32.mrf.mxu0 }
 0xf68   : > { %v3344_v17 = vadd.f32 %v5932_v51, %v3343_v52  ;;  %v7380_v52 = vld [vmem:[%s9194_s16 + $0x60] sm:$0xff]  }
 0xf69   : > { %v6925_v53 = vpop.f32.mrf.mxu0 }
 0xf6a   : > { %v7381_v53 = vld [vmem:[%s9194_s16 + $0x58] sm:$0xff]  }
 0xf6b   : > { %v3346_v22 = vpop.f32.mrf.mxu0 }
 0xf6c   : > { %v3347_v55 = vadd.f32 %v5932_v51, %v3346_v22  ;;  %v7379_v51 = vld [vmem:[%s9194_s16 + $0x68] sm:$0xff]  }
 0xf6d   : > { %v6926_v57 = vpop.f32.mrf.mxu0  ;;  %v7383_v22 = vld [vmem:[%s9194_s16 + $0x48] sm:$0xff]  }
 0xf6e   : > { %v3418_v58 = vpack.c.bf16 %v3347_v55, %v3344_v17  ;;  %v7382_v17 = vld [vmem:[%s9194_s16 + $0x50] sm:$0xff]   ;;  %v7384_v55 = vld [vmem:[%s9194_s16 + $0x40] sm:$0xff]  }
 0xf70   : > { %6934 = vmatpush3.bf16.msra.mxu1 %v3418_v58 }
 0xf71   : > { %6939 = vmatprep.subr.bf16.mxu1 %v7619_v1 }
 0xf87   : > { %v3775_v42 = vpop.f32.mrf.mxu0 }
 0xf88   : > { %v3776_v44 = vadd.f32 %v6010_v41, %v3775_v42  ;;  %v7392_v42 = vld [vmem:[%s9192_s14 + $0x98] sm:$0xff]  }
 0xf89   : > { %v6985_v43 = vpop.f32.mrf.mxu0 }
 0xf8a   : > { %v7394_v43 = vld [vmem:[%s9192_s14 + $0x90] sm:$0xff]  }
 0xf8b   : > { %v3778_v45 = vpop.f32.mrf.mxu0 }
0x1010   : > { %v3392_v46 = vpop.f32.mrf.mxu1 }
0x1011   : > { %v3399_v47 = vsel %vm1261_vm2, %v3392_v46, -inf }
0x1012   : > { %3400 = vmax.xlane.f32.xlu0 %v3399_v47  ;;  %v6931_v48 = vpop.f32.mrf.mxu1  ;;  %v6986_v47 = vpop.f32.mrf.mxu0 }
0x1014   : > { %v3395_v49 = vpop.f32.mrf.mxu1 }
0x1015   : > { %v3402_v19 = vsel %vm1261_vm2, %v3395_v49, -inf }
0x1016   : > { %3403 = vmax.xlane.f32.xlu1 %v3402_v19  ;;  %v6932_v50 = vpop.f32.mrf.mxu1  ;;  %v7377_v19 = vld [vmem:[%s9194_s16 + $0x78] sm:$0xff]  }
0x1017   : > { %v7378_v50 = vld [vmem:[%s9194_s16 + $0x70] sm:$0xff]  }
0x109b   : > { %v3401_v59 = vpop.xlane.xlu0 %3400 }
0x109c   : > { %v3405_v60 = vsub.f32 %v3392_v46, %v3401_v59  ;;  %v3779_v46 = vadd.f32 %v6010_v41, %v3778_v45  ;;  %v7390_v41 = vld [vmem:[%s9192_s14 + $0xa0] sm:$0xff]  }
0x109d   : > { %v7398_v45 = vld [vmem:[%s9192_s14 + $0x80] sm:$0xff]  }
0x109e   : > { %v3407_v61 = vmul.f32 1.442695, %v3405_v60  ;;  %v3880_v48 = vpack.c.bf16 %v3779_v46, %v3776_v44  ;;  %v7396_v44 = vld [vmem:[%s9192_s14 + $0x88] sm:$0xff]  }
0x109f   : > { %v3404_v63 = vpop.xlane.xlu1 %3403 }
0x10a0   : > { %7515 = vpow2.f32 %v3407_v61  ;;  %v3406_v0 = vsub.f32 %v3395_v49, %v3404_v63  ;;  %v3885_v49 = vsel %vm1213_vm1, %v3880_v48, 0  ;;  %v6000_v63 = vld [vmem:[%s9273_s13 + $0x1] ss:$0 sm:$0xff] }
0x10a1   : > { %7008 = vmatpush3.bf16.xpose.msra.mxu0 %v3885_v49 }
0x10a2   : > { %v3409_v2 = vmul.f32 1.442695, %v3406_v0  ;;  %7013 = vmatprep.subr.bf16.mxu0 %v7619_v1 }
0x10a4   : > { %7517 = vpow2.f32 %v3409_v2 }
0x10ad   : > { %v7516_v3 = vpop.eup %7515 }
0x10ae   : > { %v3411_v4 = vsel %vm1261_vm2, %v7516_v3, 0.0 }
0x10af   : > { %3412 = vadd.xlane.f32.xlu0 %v3411_v4 }
0x10b1   : > { %v7518_v5 = vpop.eup %7517 }
0x10b2   : > { %v3414_v6 = vsel %vm1261_vm2, %v7518_v5, 0.0  ;;  %v3417_v7 = vpack.c.bf16 %v7518_v5, %v7516_v3 }
0x10b3   : > { %3415 = vadd.xlane.f32.xlu1 %v3414_v6 }
0x10b4   : > { %6936 = vmatmul.mubr.msk.bf16.vlgmr.msra.gmra.mxu1 %vm1261_vm2, %v3417_v7 }
0x10b5   : > { %6943 = vmatprep.mubr.msk.bf16.mxu1 %vm7620_vm0, %v7619_v1  ;;  %6940 = vmatpush3.bf16.msra.mxu1 %v7361_v10 }
0x10b6   : > { %6941 = vmatprep.subr.bf16.mxu1 %v7619_v1 }
0x10b9   : > { %6942 = vmatpush3.bf16.msra.mxu1 %v7363_v12 }
0x10ba   : > { %6947 = vmatprep.subr.bf16.mxu1 %v7619_v1 }
0x1138   : > { %v3413_v24 = vpop.xlane.xlu0 %3412 }
0x1139   : > { %7519 = vrcp.f32 %v3413_v24 }
0x113c   : > { %v3416_v25 = vpop.xlane.xlu1 %3415 }
0x113d   : > { %7521 = vrcp.f32 %v3416_v25 }
0x1146   : > { %v7520_v28 = vpop.eup %7519 }
0x114a   : > { %v7522_v29 = vpop.eup %7521 }
0x1174   : > { %v3456_v26 = vpop.f32.mrf.mxu1 }
0x1175   : > { %v3465_v30 = vmul.f32 %v7520_v28, %v3456_v26 }
0x1176   : > { %v6937_v27 = vpop.f32.mrf.mxu1 }
0x1178   : > { %v3459_v54 = vpop.f32.mrf.mxu1 }
0x1179   : > { %v3466_v56 = vmul.f32 %v7522_v29, %v3459_v54 }
0x117a   : > { %v6938_v31 = vpop.f32.mrf.mxu1 }
0x117b   : > { %v3467_v33 = vpack.c.bf16 %v3466_v56, %v3465_v30 }
0x117d   : > { %6944 = vmatmul.mubr.msk.bf16.vlgmr.msra.gmra.mxu1 %vm1213_vm1, %v3467_v33 }
0x117e   : > { %6948 = vmatpush3.bf16.msra.mxu1 %v7365_v32  ;;  %6963 = vmatprep.mubr.msk.bf16.mxu1 %vm7620_vm0, %v7619_v1 }
0x117f   : > { %6949 = vmatprep.subr.bf16.mxu1 %v7619_v1 }
0x1182   : > { %6950 = vmatpush3.bf16.msra.mxu1 %v7367_v34 }
0x1183   : > { %6951 = vmatprep.subr.bf16.mxu1 %v7619_v1 }
0x1186   : > { %6952 = vmatpush3.bf16.msra.mxu1 %v7369_v35 }
0x1187   : > { %6953 = vmatprep.subr.bf16.mxu1 %v7619_v1 }
0x118a   : > { %6954 = vmatpush3.bf16.msra.mxu1 %v7371_v36  ;;  %v7385_v36 = vld [vmem:[%s9192_s14 + $0xb8] sm:$0xff]  }
0x118b   : > { %6955 = vmatprep.subr.bf16.mxu1 %v7619_v1 }
0x118e   : > { %6956 = vmatpush3.bf16.msra.mxu1 %v7373_v37  ;;  %v7386_v37 = vld [vmem:[%s9192_s14 + $0xb0] sm:$0xff]  }
0x118f   : > { %6957 = vmatprep.subr.bf16.mxu1 %v7619_v1 }
0x1192   : > { %6958 = vmatpush3.bf16.msra.mxu1 %v7374_v38  ;;  %v7387_v38 = vld [vmem:[%s9196_s18 + $0x18] sm:$0xff]  }
0x1193   : > { %6959 = vmatprep.subr.bf16.mxu1 %v7619_v1 }
0x1196   : > { %6960 = vmatpush3.bf16.msra.mxu1 %v7375_v39  ;;  %v7388_v39 = vld [vmem:[%s9192_s14 + $0xa8] sm:$0xff]  }
0x1197   : > { %6961 = vmatprep.subr.bf16.mxu1 %v7619_v1 }
0x119a   : > { %6962 = vmatpush3.bf16.msra.mxu1 %v7376_v40  ;;  %v7389_v40 = vld [vmem:[%s9196_s18 + $0x10] sm:$0xff]  }
0x119b   : > { %6987 = vmatprep.subr.bf16.mxu1 %v7619_v1 }
0x119d   : > { %6964 = vmatmul.mubr.bf16.vlgmr.msra.gmra.mxu1 %v8501_v21 }
0x119e   : > { %7003 = vmatprep.mubr.msk.bf16.mxu1 %vm7620_vm0, %v7619_v1  ;;  %6988 = vmatpush3.bf16.msra.mxu1 %v7377_v19 }
0x119f   : > { %6989 = vmatprep.subr.bf16.mxu1 %v7619_v1 }
0x11a2   : > { %6990 = vmatpush3.bf16.msra.mxu1 %v7378_v50 }
0x11a3   : > { %6991 = vmatprep.subr.bf16.mxu1 %v7619_v1 }
0x11a6   : > { %6992 = vmatpush3.bf16.msra.mxu1 %v7379_v51 }
0x11a7   : > { %6993 = vmatprep.subr.bf16.mxu1 %v7619_v1 }
0x11aa   : > { %6994 = vmatpush3.bf16.msra.mxu1 %v7380_v52 }
0x11ab   : > { %6995 = vmatprep.subr.bf16.mxu1 %v7619_v1 }
0x11ae   : > { %6996 = vmatpush3.bf16.msra.mxu1 %v7381_v53 }
0x11af   : > { %6997 = vmatprep.subr.bf16.mxu1 %v7619_v1 }
0x11b2   : > { %6998 = vmatpush3.bf16.msra.mxu1 %v7382_v17 }
0x11b3   : > { %6999 = vmatprep.subr.bf16.mxu1 %v7619_v1 }
0x11b6   : > { %7000 = vmatpush3.bf16.msra.mxu1 %v7383_v22  ;;  %v7391_v22 = vld [vmem:[%s9268_s28 + $0xb8] sm:$0xff]  }
0x11b7   : > { %7001 = vmatprep.subr.bf16.mxu1 %v7619_v1 }
0x11ba   : > { %7002 = vmatpush3.bf16.msra.mxu1 %v7384_v55 }
0x11bb   : > { %7047 = vmatprep.subr.bf16.mxu1 %v7619_v1 }
0x11bd   : > { %7004 = vmatmul.mubr.bf16.vlgmr.msra.gmra.mxu1 %v8470_v62 }
0x11be   : > { %7063 = vmatprep.mubr.msk.bf16.mxu1 %vm7620_vm0, %v7619_v1  ;;  %7048 = vmatpush3.bf16.msra.mxu1 %v7385_v36 }
0x11bf   : > { %7049 = vmatprep.subr.bf16.mxu1 %v7619_v1 }
0x11c2   : > { %7050 = vmatpush3.bf16.msra.mxu1 %v7386_v37 }
0x11c3   : > { %7051 = vmatprep.subr.bf16.mxu1 %v7619_v1 }
0x11c6   : > { %7052 = vmatpush3.bf16.msra.mxu1 %v7388_v39 }
0x11c7   : > { %7053 = vmatprep.subr.bf16.mxu1 %v7619_v1 }
0x11ca   : > { %7054 = vmatpush3.bf16.msra.mxu1 %v7390_v41 }
0x11cb   : > { %7055 = vmatprep.subr.bf16.mxu1 %v7619_v1 }
0x11ce   : > { %7056 = vmatpush3.bf16.msra.mxu1 %v7392_v42 }
0x11cf   : > { %7057 = vmatprep.subr.bf16.mxu1 %v7619_v1 }
0x11d2   : > { %7058 = vmatpush3.bf16.msra.mxu1 %v7394_v43 }
0x11d3   : > { %7059 = vmatprep.subr.bf16.mxu1 %v7619_v1 }
0x11d6   : > { %7060 = vmatpush3.bf16.msra.mxu1 %v7396_v44 }
0x11d7   : > { %7061 = vmatprep.subr.bf16.mxu1 %v7619_v1 }
0x11da   : > { %7062 = vmatpush3.bf16.msra.mxu1 %v7398_v45 }
0x11db   : > { %7087 = vmatprep.subr.bf16.mxu1 %v7619_v1 }
0x11dd   : > { %7064 = vmatmul.mubr.bf16.vlgmr.msra.gmra.mxu1 %v8470_v62 }
0x11de   : > { %7089 = vmatprep.mubr.msk.bf16.mxu1 %vm7620_vm0, %v7619_v1 }
0x123d   : > { %v8684_v57 = vpop.f32.mrf.mxu1 }
0x123f   : > { %v6945_v58 = vpop.f32.mrf.mxu1 }
0x1240   : > { %v7393_v58 = vld [vmem:[%s9268_s28 + $0xb0] sm:$0xff]  }
0x1241   : > { %v8686_v59 = vpop.f32.mrf.mxu1 }
0x1243   : > { %v6946_v60 = vpop.f32.mrf.mxu1 }
0x1244   : > { %v7395_v60 = vld [vmem:[%s9268_s28 + $0xa8] sm:$0xff]  }
0x125d   : > { %v3678_v61 = vpop.f32.mrf.mxu1 }
0x125e   : > { %v3679_v3 = vadd.f32 %v6000_v63, %v3678_v61  ;;  %v7397_v61 = vld [vmem:[%s9268_s28 + $0xa0] sm:$0xff]  }
0x125f   : > { %v6965_v0 = vpop.f32.mrf.mxu1 }
0x1260   : > { %v7400_v0 = vld [vmem:[%s9268_s28 + $0x90] sm:$0xff]  }
0x1261   : > { %v3681_v2 = vpop.f32.mrf.mxu1 }
0x1262   : > { %v3682_v4 = vadd.f32 %v6000_v63, %v3681_v2  ;;  %v7399_v63 = vld [vmem:[%s9268_s28 + $0x98] sm:$0xff]   ;;  %v7401_v2 = vld [vmem:[%s9268_s28 + $0x88] sm:$0xff]  }
0x1263   : > { %v6966_v5 = vpop.f32.mrf.mxu1 }
0x1264   : > { %v3879_v6 = vpack.c.bf16 %v3682_v4, %v3679_v3  ;;  %v7402_v3 = vld [vmem:[%s9268_s28 + $0x80] sm:$0xff]  }
0x1265   : > { %v6097_v4 = vld [vmem:[%s9193_s15 + $0x2] ss:$0 sm:$0xff] }
0x1266   : > { %7010 = vmatmul.mubr.msk.bf16.vlgmr.msra.gmra.mxu0 %vm1213_vm1, %v3879_v6 }
0x1267   : > { %7015 = vmatprep.mubr.msk.bf16.mxu0 %vm7620_vm0, %v7619_v1 }
0x127d   : > { %v3872_v14 = vpop.f32.mrf.mxu1 }
0x127e   : > { %v3873_v16 = vadd.f32 %v6020_v13, %v3872_v14  ;;  %v7404_v14 = vld [vmem:[%s9194_s16 + $0xb0] sm:$0xff]  }
0x127f   : > { %v7005_v15 = vpop.f32.mrf.mxu1 }
0x1280   : > { %v7405_v15 = vld [vmem:[%s9194_s16 + $0xa8] sm:$0xff]  }
0x1281   : > { %v3875_v23 = vpop.f32.mrf.mxu1 }
0x1282   : > { %v3876_v24 = vadd.f32 %v6020_v13, %v3875_v23  ;;  %v7403_v13 = vld [vmem:[%s9194_s16 + $0xb8] sm:$0xff]  }
0x1283   : > { %v7006_v25 = vpop.f32.mrf.mxu1  ;;  %v7407_v23 = vld [vmem:[%s9194_s16 + $0x98] sm:$0xff]  }
0x1284   : > { %v3947_v26 = vpack.c.bf16 %v3876_v24, %v3873_v16  ;;  %v7406_v16 = vld [vmem:[%s9194_s16 + $0xa0] sm:$0xff]   ;;  %v7408_v24 = vld [vmem:[%s9194_s16 + $0x90] sm:$0xff]   ;;  %v7409_v25 = vld [vmem:[%s9194_s16 + $0x88] sm:$0xff]  }
0x1286   : > { %7014 = vmatpush3.bf16.msra.mxu0 %v3947_v26  ;;  %v7410_v26 = vld [vmem:[%s9194_s16 + $0x80] sm:$0xff]  }
0x1287   : > { %7019 = vmatprep.subr.bf16.mxu0 %v7619_v1 }
0x129d   : > { %v4298_v5 = vpop.f32.mrf.mxu1 }
0x129f   : > { %v7065_v6 = vpop.f32.mrf.mxu1 }
0x12a0   : > { %v7413_v6 = vld [vmem:[%s9196_s18 + $0x28] sm:$0xff]  }
0x1326   : > { %v3921_v7 = vpop.f32.mrf.mxu0 }
0x1327   : > { %v3928_v8 = vsel %vm1261_vm2, %v3921_v7, -inf }
0x1328   : > { %3929 = vmax.xlane.f32.xlu0 %v3928_v8  ;;  %v7011_v9 = vpop.f32.mrf.mxu0  ;;  %v4301_v8 = vpop.f32.mrf.mxu1 }
0x1329   : > { %v4302_v9 = vadd.f32 %v6097_v4, %v4301_v8  ;;  %v7415_v8 = vld [vmem:[%s9196_s18 + $0x20] sm:$0xff]  }
0x132a   : > { %v3924_v10 = vpop.f32.mrf.mxu0 }
0x132b   : > { %v3931_v11 = vsel %vm1261_vm2, %v3924_v10, -inf }
0x132c   : > { %3932 = vmax.xlane.f32.xlu1 %v3931_v11  ;;  %v7012_v12 = vpop.f32.mrf.mxu0 }
0x13b1   : > { %v3930_v27 = vpop.xlane.xlu0 %3929 }
0x13b2   : > { %v3934_v28 = vsub.f32 %v3921_v7, %v3930_v27  ;;  %v4299_v7 = vadd.f32 %v6097_v4, %v4298_v5  ;;  %v5946_v27 = vld [vmem:[%s9197_s19] ss:$0 sm:$0xff]  ;;  %v7411_v4 = vld [vmem:[%s9192_s14 + $0xf8] sm:$0xff]   ;;  %v7412_v5 = vld [vmem:[%s9192_s14 + $0xf0] sm:$0xff]  }
0x13b4   : > { %v3936_v29 = vmul.f32 1.442695, %v3934_v28  ;;  %v4403_v11 = vpack.c.bf16 %v4302_v9, %v4299_v7  ;;  %v3530_v28 = vadd.f32 %v5946_v27, %v8684_v57  ;;  %v7414_v7 = vld [vmem:[%s9192_s14 + $0xe8] sm:$0xff]   ;;  %v7416_v9 = vld [vmem:[%s9192_s14 + $0xe0] sm:$0xff]  }
0x13b5   : > { %v3933_v54 = vpop.xlane.xlu1 %3932 }
0x13b6   : > { %7523 = vpow2.f32 %v3936_v29  ;;  %v3935_v30 = vsub.f32 %v3924_v10, %v3933_v54  ;;  %v7066_v10 = vpop.f32.mrf.mxu1  ;;  %v4408_v12 = vsel %vm1213_vm1, %v4403_v11, 0  ;;  %v7420_v11 = vld [vmem:[%s9192_s14 + $0xd0] sm:$0xff]  }
0x13b7   : > { %7088 = vmatpush3.bf16.xpose.msra.mxu1 %v4408_v12  ;;  %v7418_v10 = vld [vmem:[%s9192_s14 + $0xd8] sm:$0xff]   ;;  %v7422_v12 = vld [vmem:[%s9192_s14 + $0xc8] sm:$0xff]  }
0x13b8   : > { %v3938_v56 = vmul.f32 1.442695, %v3935_v30  ;;  %7093 = vmatprep.subr.bf16.mxu1 %v7619_v1 }
0x13ba   : > { %7525 = vpow2.f32 %v3938_v56  ;;  %v3531_v56 = vadd.f32 %v5946_v27, %v8686_v59 }
0x13c3   : > { %v7524_v31 = vpop.eup %7523 }
0x13c4   : > { %v3940_v32 = vsel %vm1261_vm2, %v7524_v31, 0.0 }
0x13c5   : > { %3941 = vadd.xlane.f32.xlu0 %v3940_v32 }
0x13c7   : > { %v7526_v33 = vpop.eup %7525 }
0x13c8   : > { %v3943_v34 = vsel %vm1261_vm2, %v7526_v33, 0.0  ;;  %v3946_v35 = vpack.c.bf16 %v7526_v33, %v7524_v31 }
0x13c9   : > { %3944 = vadd.xlane.f32.xlu1 %v3943_v34 }
0x13ca   : > { %7016 = vmatmul.mubr.msk.bf16.vlgmr.msra.gmra.mxu0 %vm1261_vm2, %v3946_v35  ;;  %v6087_v35 = vld [vmem:[%s9273_s13 + $0x2] ss:$0 sm:$0xff] }
0x13cb   : > { %7023 = vmatprep.mubr.msk.bf16.mxu0 %vm7620_vm0, %v7619_v1  ;;  %7020 = vmatpush3.bf16.msra.mxu0 %v7387_v38 }
0x13cc   : > { %7021 = vmatprep.subr.bf16.mxu0 %v7619_v1 }
0x13cf   : > { %7022 = vmatpush3.bf16.msra.mxu0 %v7389_v40 }
0x13d0   : > { %7027 = vmatprep.subr.bf16.mxu0 %v7619_v1 }
0x144e   : > { %v3942_v46 = vpop.xlane.xlu0 %3941 }
0x144f   : > { %7527 = vrcp.f32 %v3942_v46  ;;  %v6107_v46 = vld [vmem:[%s9195_s17 + $0x2] ss:$0 sm:$0xff] }
0x1452   : > { %v3945_v47 = vpop.xlane.xlu1 %3944 }
0x1453   : > { %7529 = vrcp.f32 %v3945_v47 }
0x145c   : > { %v7528_v19 = vpop.eup %7527 }
0x1460   : > { %v7530_v50 = vpop.eup %7529 }
0x148a   : > { %v3985_v48 = vpop.f32.mrf.mxu0 }
0x148b   : > { %v3994_v52 = vmul.f32 %v7528_v19, %v3985_v48 }
0x148c   : > { %v7017_v49 = vpop.f32.mrf.mxu0 }
0x148e   : > { %v3988_v51 = vpop.f32.mrf.mxu0 }
0x148f   : > { %v3995_v53 = vmul.f32 %v7530_v50, %v3988_v51 }
0x1490   : > { %v7018_v17 = vpop.f32.mrf.mxu0 }
0x1491   : > { %v3996_v55 = vpack.c.bf16 %v3995_v53, %v3994_v52 }
0x1493   : > { %7024 = vmatmul.mubr.msk.bf16.vlgmr.msra.gmra.mxu0 %vm1213_vm1, %v3996_v55 }
0x1494   : > { %7028 = vmatpush3.bf16.msra.mxu0 %v7391_v22  ;;  %7043 = vmatprep.mubr.msk.bf16.mxu0 %vm7620_vm0, %v7619_v1 }
0x1495   : > { %7029 = vmatprep.subr.bf16.mxu0 %v7619_v1 }
0x1498   : > { %7030 = vmatpush3.bf16.msra.mxu0 %v7393_v58 }
0x1499   : > { %7031 = vmatprep.subr.bf16.mxu0 %v7619_v1 }
0x149c   : > { %7032 = vmatpush3.bf16.msra.mxu0 %v7395_v60 }
0x149d   : > { %7033 = vmatprep.subr.bf16.mxu0 %v7619_v1 }
0x14a0   : > { %7034 = vmatpush3.bf16.msra.mxu0 %v7397_v61 }
0x14a1   : > { %7035 = vmatprep.subr.bf16.mxu0 %v7619_v1 }
0x14a4   : > { %7036 = vmatpush3.bf16.msra.mxu0 %v7399_v63 }
0x14a5   : > { %7037 = vmatprep.subr.bf16.mxu0 %v7619_v1 }
0x14a8   : > { %7038 = vmatpush3.bf16.msra.mxu0 %v7400_v0 }
0x14a9   : > { %7039 = vmatprep.subr.bf16.mxu0 %v7619_v1 }
0x14ac   : > { %7040 = vmatpush3.bf16.msra.mxu0 %v7401_v2 }
0x14ad   : > { %7041 = vmatprep.subr.bf16.mxu0 %v7619_v1 }
0x14b0   : > { %7042 = vmatpush3.bf16.msra.mxu0 %v7402_v3 }
0x14b1   : > { %7067 = vmatprep.subr.bf16.mxu0 %v7619_v1 }
0x14b3   : > { %7044 = vmatmul.mubr.bf16.vlgmr.msra.gmra.mxu0 %v8501_v21 }
0x14b4   : > { %7083 = vmatprep.mubr.msk.bf16.mxu0 %vm7620_vm0, %v7619_v1  ;;  %7068 = vmatpush3.bf16.msra.mxu0 %v7403_v13  ;;  %v7424_v13 = vld [vmem:[%s9192_s14 + $0xc0] sm:$0xff]  }
0x14b5   : > { %7069 = vmatprep.subr.bf16.mxu0 %v7619_v1 }
0x14b8   : > { %7070 = vmatpush3.bf16.msra.mxu0 %v7404_v14 }
0x14b9   : > { %7071 = vmatprep.subr.bf16.mxu0 %v7619_v1 }
0x14bc   : > { %7072 = vmatpush3.bf16.msra.mxu0 %v7405_v15 }
0x14bd   : > { %7073 = vmatprep.subr.bf16.mxu0 %v7619_v1 }
0x14c0   : > { %7074 = vmatpush3.bf16.msra.mxu0 %v7406_v16 }
0x14c1   : > { %7075 = vmatprep.subr.bf16.mxu0 %v7619_v1 }
0x14c4   : > { %7076 = vmatpush3.bf16.msra.mxu0 %v7407_v23 }
0x14c5   : > { %7077 = vmatprep.subr.bf16.mxu0 %v7619_v1 }
0x14c8   : > { %7078 = vmatpush3.bf16.msra.mxu0 %v7408_v24 }
0x14c9   : > { %7079 = vmatprep.subr.bf16.mxu0 %v7619_v1 }
0x14cc   : > { %7080 = vmatpush3.bf16.msra.mxu0 %v7409_v25 }
0x14cd   : > { %7081 = vmatprep.subr.bf16.mxu0 %v7619_v1 }
0x14d0   : > { %7082 = vmatpush3.bf16.msra.mxu0 %v7410_v26 }
0x14d1   : > { %7127 = vmatprep.subr.bf16.mxu0 %v7619_v1 }
0x14d3   : > { %7084 = vmatmul.mubr.bf16.vlgmr.msra.gmra.mxu0 %v8470_v62 }
0x14d4   : > { %7143 = vmatprep.mubr.msk.bf16.mxu0 %vm7620_vm0, %v7619_v1  ;;  %7128 = vmatpush3.bf16.msra.mxu0 %v7411_v4 }
0x14d5   : > { %7129 = vmatprep.subr.bf16.mxu0 %v7619_v1 }
0x14d8   : > { %7130 = vmatpush3.bf16.msra.mxu0 %v7412_v5 }
0x14d9   : > { %7131 = vmatprep.subr.bf16.mxu0 %v7619_v1 }
0x14dc   : > { %7132 = vmatpush3.bf16.msra.mxu0 %v7414_v7 }
0x14dd   : > { %7133 = vmatprep.subr.bf16.mxu0 %v7619_v1 }
0x14e0   : > { %7134 = vmatpush3.bf16.msra.mxu0 %v7416_v9  ;;  %v6194_v9 = vld [vmem:[%s9195_s17 + $0x3] ss:$0 sm:$0xff] }
0x14e1   : > { %7135 = vmatprep.subr.bf16.mxu0 %v7619_v1 }
0x14e4   : > { %7136 = vmatpush3.bf16.msra.mxu0 %v7418_v10 }
0x14e5   : > { %7137 = vmatprep.subr.bf16.mxu0 %v7619_v1 }
0x14e8   : > { %7138 = vmatpush3.bf16.msra.mxu0 %v7420_v11 }
0x14e9   : > { %7139 = vmatprep.subr.bf16.mxu0 %v7619_v1 }
0x14ec   : > { %7140 = vmatpush3.bf16.msra.mxu0 %v7422_v12 }
0x14ed   : > { %7141 = vmatprep.subr.bf16.mxu0 %v7619_v1 }
0x14f0   : > { %7142 = vmatpush3.bf16.msra.mxu0 %v7424_v13 }
0x14f1   : > { %7167 = vmatprep.subr.bf16.mxu0 %v7619_v1 }
0x14f3   : > { %7144 = vmatmul.mubr.bf16.vlgmr.msra.gmra.mxu0 %v8470_v62 }
0x14f4   : > { %7169 = vmatprep.mubr.msk.bf16.mxu0 %vm7620_vm0, %v7619_v1 }
0x1553   : > { %v4046_v29 = vpop.f32.mrf.mxu0 }
0x1554   : > { %v8830_v54 = vadd.f32 %v4046_v29, %v3530_v28 }
0x1555   : > { %v7025_v30 = vpop.f32.mrf.mxu0 }
0x1556   : > { %v7417_v30 = vld [vmem:[%s9268_s28 + $0xf8] sm:$0xff]  }
0x1557   : > { %v4049_v31 = vpop.f32.mrf.mxu0 }
0x1558   : > { %v8833_v32 = vadd.f32 %v4049_v31, %v3531_v56  ;;  %v7419_v31 = vld [vmem:[%s9268_s28 + $0xf0] sm:$0xff]  }
0x1559   : > { %v7026_v33 = vpop.f32.mrf.mxu0 }
0x155a   : > { %v7421_v33 = vld [vmem:[%s9268_s28 + $0xe8] sm:$0xff]  }
0x1573   : > { %v4201_v34 = vpop.f32.mrf.mxu0 }
0x1574   : > { %v4202_v38 = vadd.f32 %v6087_v35, %v4201_v34  ;;  %v7423_v34 = vld [vmem:[%s9268_s28 + $0xe0] sm:$0xff]  }
0x1575   : > { %v7045_v36 = vpop.f32.mrf.mxu0 }
0x1576   : > { %v7426_v36 = vld [vmem:[%s9268_s28 + $0xd0] sm:$0xff]  }
0x1577   : > { %v4204_v37 = vpop.f32.mrf.mxu0 }
0x1578   : > { %v4205_v39 = vadd.f32 %v6087_v35, %v4204_v37  ;;  %v7425_v35 = vld [vmem:[%s9268_s28 + $0xd8] sm:$0xff]   ;;  %v7427_v37 = vld [vmem:[%s9268_s28 + $0xc8] sm:$0xff]  }
0x1579   : > { %v7046_v57 = vpop.f32.mrf.mxu0 }
0x157a   : > { %v4402_v40 = vpack.c.bf16 %v4205_v39, %v4202_v38  ;;  %v7428_v38 = vld [vmem:[%s9268_s28 + $0xc0] sm:$0xff]  }
0x157b   : > { %v6184_v39 = vld [vmem:[%s9193_s15 + $0x3] ss:$0 sm:$0xff] }
0x157c   : > { %7090 = vmatmul.mubr.msk.bf16.vlgmr.msra.gmra.mxu1 %vm1213_vm1, %v4402_v40 }
0x157d   : > { %7095 = vmatprep.mubr.msk.bf16.mxu1 %vm7620_vm0, %v7619_v1 }
0x1593   : > { %v4395_v47 = vpop.f32.mrf.mxu0 }
0x1594   : > { %v4396_v49 = vadd.f32 %v6107_v46, %v4395_v47  ;;  %v7431_v47 = vld [vmem:[%s9194_s16 + $0xe8] sm:$0xff]  }
0x1595   : > { %v7085_v48 = vpop.f32.mrf.mxu0 }
0x1596   : > { %v7432_v48 = vld [vmem:[%s9194_s16 + $0xe0] sm:$0xff]  }
0x1597   : > { %v4398_v19 = vpop.f32.mrf.mxu0 }
0x1598   : > { %v4399_v50 = vadd.f32 %v6107_v46, %v4398_v19  ;;  %v7430_v46 = vld [vmem:[%s9194_s16 + $0xf0] sm:$0xff]  }
0x1599   : > { %v7086_v51 = vpop.f32.mrf.mxu0  ;;  %v7434_v19 = vld [vmem:[%s9194_s16 + $0xd0] sm:$0xff]  }
0x159a   : > { %v4470_v52 = vpack.c.bf16 %v4399_v50, %v4396_v49  ;;  %v7433_v49 = vld [vmem:[%s9194_s16 + $0xd8] sm:$0xff]   ;;  %v7435_v50 = vld [vmem:[%s9194_s16 + $0xc8] sm:$0xff]   ;;  %v7436_v51 = vld [vmem:[%s9194_s16 + $0xc0] sm:$0xff]  }
0x159c   : > { %7094 = vmatpush3.bf16.msra.mxu1 %v4470_v52 }
0x159d   : > { %7099 = vmatprep.subr.bf16.mxu1 %v7619_v1 }
0x15b3   : > { %v4821_v57 = vpop.f32.mrf.mxu0 }
0x15b5   : > { %v7145_v40 = vpop.f32.mrf.mxu0 }
0x163c   : > { %v4444_v59 = vpop.f32.mrf.mxu1 }
0x163d   : > { %v4451_v41 = vsel %vm1261_vm2, %v4444_v59, -inf }
0x163e   : > { %4452 = vmax.xlane.f32.xlu0 %v4451_v41  ;;  %v7091_v42 = vpop.f32.mrf.mxu1  ;;  %v4824_v41 = vpop.f32.mrf.mxu0 }
0x163f   : > { %v4825_v42 = vadd.f32 %v6184_v39, %v4824_v41 }
0x1640   : > { %v4447_v43 = vpop.f32.mrf.mxu1 }
0x1641   : > { %v4454_v44 = vsel %vm1261_vm2, %v4447_v43, -inf }
0x1642   : > { %4455 = vmax.xlane.f32.xlu1 %v4454_v44  ;;  %v7092_v45 = vpop.f32.mrf.mxu1 }
0x16c7   : > { %v4453_v53 = vpop.xlane.xlu0 %4452 }
0x16c8   : > { %v4457_v17 = vsub.f32 %v4444_v59, %v4453_v53  ;;  %v4822_v59 = vadd.f32 %v6184_v39, %v4821_v57 }
0x16ca   : > { %v4459_v22 = vmul.f32 1.442695, %v4457_v17  ;;  %v4926_v44 = vpack.c.bf16 %v4825_v42, %v4822_v59 }
0x16cb   : > { %v4456_v55 = vpop.xlane.xlu1 %4455 }
0x16cc   : > { %7531 = vpow2.f32 %v4459_v22  ;;  %v4458_v58 = vsub.f32 %v4447_v43, %v4456_v55  ;;  %v7146_v43 = vpop.f32.mrf.mxu0  ;;  %v4931_v45 = vsel %vm1213_vm1, %v4926_v44, 0 }
0x16cd   : > { %7168 = vmatpush3.bf16.xpose.msra.mxu0 %v4931_v45 }
0x16ce   : > { %v4461_v60 = vmul.f32 1.442695, %v4458_v58  ;;  %7173 = vmatprep.subr.bf16.mxu0 %v7619_v1 }
0x16d0   : > { %7533 = vpow2.f32 %v4461_v60 }
0x16d9   : > { %v7532_v61 = vpop.eup %7531 }
0x16da   : > { %v4463_v63 = vsel %vm1261_vm2, %v7532_v61, 0.0 }
0x16db   : > { %4464 = vadd.xlane.f32.xlu0 %v4463_v63 }
0x16dd   : > { %v7534_v0 = vpop.eup %7533 }
0x16de   : > { %v4466_v2 = vsel %vm1261_vm2, %v7534_v0, 0.0  ;;  %v4469_v3 = vpack.c.bf16 %v7534_v0, %v7532_v61  ;;  %v6174_v61 = vld [vmem:[%s9273_s13 + $0x3] ss:$0 sm:$0xff]  ;;  %s7563_s13 = scalar_lea.vmem %s7562_s0, 512 }
0x16df   : > { %4467 = vadd.xlane.f32.xlu1 %v4466_v2  ;;  %p7565_p1 = scmp.lt.s32.totalorder %s7563_s13, %s7557_s9 }
0x16e0   : > { %7096 = vmatmul.mubr.msk.bf16.vlgmr.msra.gmra.mxu1 %vm1261_vm2, %v4469_v3 }
0x16e1   : > { %7103 = vmatprep.mubr.msk.bf16.mxu1 %vm7620_vm0, %v7619_v1  ;;  %7100 = vmatpush3.bf16.msra.mxu1 %v7413_v6  ;;  %p7566_p2 = por %p7565_p1, %p7564_p0 }
0x16e2   : > { %7101 = vmatprep.subr.bf16.mxu1 %v7619_v1 }
0x16e3   : > { %p7567_p3 = pnand %p7566_p2, %p7560_p13 }
0x16e5   : > { %7102 = vmatpush3.bf16.msra.mxu1 %v7415_v8 }
0x16e6   : > { %7107 = vmatprep.subr.bf16.mxu1 %v7619_v1 }
0x1764   : > { %v4465_v14 = vpop.xlane.xlu0 %4464 }
0x1765   : > { %7535 = vrcp.f32 %v4465_v14 }
0x1768   : > { %v4468_v15 = vpop.xlane.xlu1 %4467 }
0x1769   : > { %7537 = vrcp.f32 %v4468_v15 }
0x1772   : > { %v7536_v24 = vpop.eup %7535 }
0x1776   : > { %v7538_v25 = vpop.eup %7537 }
0x17a0   : > { %v4508_v16 = vpop.f32.mrf.mxu1 }
0x17a1   : > { %v4517_v27 = vmul.f32 %v7536_v24, %v4508_v16 }
0x17a2   : > { %v7097_v23 = vpop.f32.mrf.mxu1 }
0x17a4   : > { %v4511_v26 = vpop.f32.mrf.mxu1 }
0x17a5   : > { %v4518_v28 = vmul.f32 %v7538_v25, %v4511_v26 }
0x17a6   : > { %v7098_v29 = vpop.f32.mrf.mxu1 }
0x17a7   : > { %v4519_v56 = vpack.c.bf16 %v4518_v28, %v4517_v27 }
0x17a9   : > { %7104 = vmatmul.mubr.msk.bf16.vlgmr.msra.gmra.mxu1 %vm1213_vm1, %v4519_v56 }
0x17aa   : > { %7108 = vmatpush3.bf16.msra.mxu1 %v7417_v30  ;;  %7123 = vmatprep.mubr.msk.bf16.mxu1 %vm7620_vm0, %v7619_v1 }
0x17ab   : > { %7109 = vmatprep.subr.bf16.mxu1 %v7619_v1 }
0x17ae   : > { %7110 = vmatpush3.bf16.msra.mxu1 %v7419_v31 }
0x17af   : > { %7111 = vmatprep.subr.bf16.mxu1 %v7619_v1 }
0x17b2   : > { %7112 = vmatpush3.bf16.msra.mxu1 %v7421_v33 }
0x17b3   : > { %7113 = vmatprep.subr.bf16.mxu1 %v7619_v1 }
0x17b6   : > { %7114 = vmatpush3.bf16.msra.mxu1 %v7423_v34  ;;  %v7437_v34 = vld [vmem:[%s9196_s18 + $0x38] sm:$0xff]  }
0x17b7   : > { %7115 = vmatprep.subr.bf16.mxu1 %v7619_v1 }
0x17ba   : > { %7116 = vmatpush3.bf16.msra.mxu1 %v7425_v35  ;;  %v7438_v35 = vld [vmem:[%s9196_s18 + $0x30] sm:$0xff]  }
0x17bb   : > { %7117 = vmatprep.subr.bf16.mxu1 %v7619_v1 }
0x17be   : > { %7118 = vmatpush3.bf16.msra.mxu1 %v7426_v36 }
0x17bf   : > { %7119 = vmatprep.subr.bf16.mxu1 %v7619_v1 }
0x17c2   : > { %7120 = vmatpush3.bf16.msra.mxu1 %v7427_v37 }
0x17c3   : > { %7121 = vmatprep.subr.bf16.mxu1 %v7619_v1 }
0x17c6   : > { %7122 = vmatpush3.bf16.msra.mxu1 %v7428_v38 }
0x17c7   : > { %7147 = vmatprep.subr.bf16.mxu1 %v7619_v1 }
0x17c9   : > { %7124 = vmatmul.mubr.bf16.vlgmr.msra.gmra.mxu1 %v8501_v21  ;;  %v7429_v21 = vld [vmem:[%s9194_s16 + $0xf8] sm:$0xff]  }
0x17ca   : > { %7163 = vmatprep.mubr.msk.bf16.mxu1 %vm7620_vm0, %v7619_v1  ;;  %7148 = vmatpush3.bf16.msra.mxu1 %v7429_v21 }
0x17cb   : > { %7149 = vmatprep.subr.bf16.mxu1 %v7619_v1 }
0x17ce   : > { %7150 = vmatpush3.bf16.msra.mxu1 %v7430_v46 }
0x17cf   : > { %7151 = vmatprep.subr.bf16.mxu1 %v7619_v1 }
0x17d2   : > { %7152 = vmatpush3.bf16.msra.mxu1 %v7431_v47 }
0x17d3   : > { %7153 = vmatprep.subr.bf16.mxu1 %v7619_v1 }
0x17d6   : > { %7154 = vmatpush3.bf16.msra.mxu1 %v7432_v48 }
0x17d7   : > { %7155 = vmatprep.subr.bf16.mxu1 %v7619_v1 }
0x17da   : > { %7156 = vmatpush3.bf16.msra.mxu1 %v7433_v49 }
0x17db   : > { %7157 = vmatprep.subr.bf16.mxu1 %v7619_v1 }
0x17de   : > { %7158 = vmatpush3.bf16.msra.mxu1 %v7434_v19 }
0x17df   : > { %7159 = vmatprep.subr.bf16.mxu1 %v7619_v1 }
0x17e2   : > { %7160 = vmatpush3.bf16.msra.mxu1 %v7435_v50  ;;  %v7439_v50 = vld [vmem:[%s9200_s22 + $0x70] ss:$8 sps:$4 sm:$0xff]  }
0x17e3   : > { %7161 = vmatprep.subr.bf16.mxu1 %v7619_v1 }
0x17e6   : > { %7162 = vmatpush3.bf16.msra.mxu1 %v7436_v51  ;;  %v7441_v51 = vld [vmem:[%s9200_s22 + $0x74] ss:$8 sps:$4 sm:$0xff]  }
0x17e9   : > { %7164 = vmatmul.mubr.bf16.vlgmr.msra.gmra.mxu1 %v8470_v62 }
0x1869   : > { %v4569_v52 = vpop.f32.mrf.mxu1 }
0x186a   : > { %v8971_v53 = vadd.f32 %v4569_v52, %v8830_v54 }
0x186b   : > { %v7105_v17 = vpop.f32.mrf.mxu1 }
0x186d   : > { %v4572_v22 = vpop.f32.mrf.mxu1 }
0x186e   : > { %v8974_v55 = vadd.f32 %v4572_v22, %v8833_v32 }
0x186f   : > { %v7106_v58 = vpop.f32.mrf.mxu1 }
0x1889   : > { %v4724_v60 = vpop.f32.mrf.mxu1 }
0x188a   : > { %v4725_v2 = vadd.f32 %v6174_v61, %v4724_v60  ;;  %v7444_v60 = vld [vmem:[%s9200_s22 + $0x64] ss:$8 sps:$4 sm:$0xff]  }
0x188b   : > { %v7125_v63 = vpop.f32.mrf.mxu1 }
0x188c   : > { %v7447_v63 = vld [vmem:[%s9200_s22 + $0x54] ss:$8 sps:$4 sm:$0xff]  }
0x188d   : > { %v4727_v0 = vpop.f32.mrf.mxu1 }
0x188e   : > { %v4728_v3 = vadd.f32 %v6174_v61, %v4727_v0  ;;  %v7442_v61 = vld [vmem:[%s9200_s22 + $0x60] ss:$8 sps:$4 sm:$0xff]   ;;  %v7445_v0 = vld [vmem:[%s9200_s22 + $0x50] ss:$8 sps:$4 sm:$0xff]  }
0x188f   : > { %v7126_v62 = vpop.f32.mrf.mxu1 }
0x1890   : > { %v4925_v4 = vpack.c.bf16 %v4728_v3, %v4725_v2  ;;  %v7448_v2 = vld [vmem:[%s9200_s22 + $0x40] ss:$8 sps:$4 sm:$0xff]   ;;  %v7450_v3 = vld [vmem:[%s9200_s22 + $0x44] ss:$8 sps:$4 sm:$0xff]   ;;  %v7453_v62 = vld [vmem:[%s9200_s22 + $0x34] ss:$8 sps:$4 sm:$0xff]  }
0x1892   : > { %7170 = vmatmul.mubr.msk.bf16.vlgmr.msra.gmra.mxu0 %vm1213_vm1, %v4925_v4  ;;  %v7451_v4 = vld [vmem:[%s9200_s22 + $0x30] ss:$8 sps:$4 sm:$0xff]  }
0x1893   : > { %7175 = vmatprep.mubr.msk.bf16.mxu0 %vm7620_vm0, %v7619_v1 }
0x18a9   : > { %v4918_v10 = vpop.f32.mrf.mxu1 }
0x18aa   : > { %v4919_v12 = vadd.f32 %v6194_v9, %v4918_v10  ;;  %v7463_v10 = vld [vmem:[%s9202_s24 + $0x78] sm:$0xff]  }
0x18ab   : > { %v7165_v11 = vpop.f32.mrf.mxu1  ;;  %6525 = vmatprep.subr.bf16.mxu1 %v7463_v10 }
0x18ac   : > { %v7464_v11 = vld [vmem:[%s9202_s24 + $0x38] sm:$0xff]  }
0x18ad   : > { %v4921_v13 = vpop.f32.mrf.mxu1  ;;  %6526 = vmatpush3.bf16.msra.mxu1 %v7464_v11 }
0x18ae   : > { %v4922_v14 = vadd.f32 %v6194_v9, %v4921_v13  ;;  %v7460_v9 = vld [vmem:[%s9200_s22] ss:$8 sps:$4 sm:$0xff]   ;;  %v7466_v13 = vld [vmem:[%s9202_s24 + $0x30] sm:$0xff]  }
0x18af   : > { %v7166_v15 = vpop.f32.mrf.mxu1 }
0x18b0   : > { %v4993_v16 = vpack.c.bf16 %v4922_v14, %v4919_v12  ;;  %v7465_v12 = vld [vmem:[%s9202_s24 + $0x70] sm:$0xff]   ;;  %v7467_v14 = vld [vmem:[%s9202_s24 + $0x68] sm:$0xff]  }
0x18b1   : > { %6527 = vmatprep.subr.bf16.mxu1 %v7465_v12  ;;  %v7468_v15 = vld [vmem:[%s9202_s24 + $0x28] sm:$0xff]  }
0x18b2   : > { %7174 = vmatpush3.bf16.msra.mxu0 %v4993_v16  ;;  %6528 = vmatpush3.bf16.msra.mxu1 %v7466_v13  ;;  %v7469_v16 = vld [vmem:[%s9202_s24 + $0x60] sm:$0xff]  }
0x18b3   : > { %7179 = vmatprep.subr.bf16.mxu0 %v7619_v1  ;;  %6529 = vmatprep.subr.bf16.mxu1 %v7467_v14 }
0x18b6   : > { %6530 = vmatpush3.bf16.msra.mxu1 %v7468_v15 }
0x18b7   : > { %6531 = vmatprep.subr.bf16.mxu1 %v7469_v16 }
0x1952   : > { %v4967_v54 = vpop.f32.mrf.mxu0 }
0x1953   : > { %v4974_v32 = vsel %vm1261_vm2, %v4967_v54, -inf }
0x1954   : > { %4975 = vmax.xlane.f32.xlu0 %v4974_v32  ;;  %v7171_v5 = vpop.f32.mrf.mxu0  ;;  %v7621_v32 = vmov 0  }
0x1955   : > { %v7454_v5 = vld [vmem:[%s9200_s22 + $0x20] ss:$8 sps:$4 sm:$0xff]  }
0x1956   : > { %v4970_v6 = vpop.f32.mrf.mxu0 }
0x1957   : > { %v4977_v7 = vsel %vm1261_vm2, %v4970_v6, -inf }
0x1958   : > { %4978 = vmax.xlane.f32.xlu1 %v4977_v7  ;;  %v7172_v8 = vpop.f32.mrf.mxu0  ;;  %v7457_v7 = vld [vmem:[%s9200_s22 + $0x10] ss:$8 sps:$4 sm:$0xff]  }
0x1959   : > { %v7462_v8 = vld [vmem:[%s9200_s22 + $0x4] ss:$8 sps:$4 sm:$0xff]  }
0x19dd   : > { %v4976_v23 = vpop.xlane.xlu0 %4975 }
0x19de   : > { %v4980_v24 = vsub.f32 %v4967_v54, %v4976_v23  ;;  %v7456_v54 = vld [vmem:[%s9200_s22 + $0x24] ss:$8 sps:$4 sm:$0xff]  }
0x19df   : > { %v7470_v23 = vld [vmem:[%s9202_s24 + $0x20] sm:$0xff]  }
0x19e0   : > { %v4982_v25 = vmul.f32 1.442695, %v4980_v24  ;;  %v7471_v24 = vld [vmem:[%s9202_s24 + $0x58] sm:$0xff]   ;;  %6532 = vmatpush3.bf16.msra.mxu1 %v7470_v23 }
0x19e1   : > { %v4979_v26 = vpop.xlane.xlu1 %4978  ;;  %6533 = vmatprep.subr.bf16.mxu1 %v7471_v24 }
0x19e2   : > { %7539 = vpow2.f32 %v4982_v25  ;;  %v4981_v27 = vsub.f32 %v4970_v6, %v4979_v26  ;;  %v7459_v6 = vld [vmem:[%s9200_s22 + $0x14] ss:$8 sps:$4 sm:$0xff]  }
0x19e3   : > { %v7472_v25 = vld [vmem:[%s9202_s24 + $0x18] sm:$0xff]  }
0x19e4   : > { %v4984_v28 = vmul.f32 1.442695, %v4981_v27  ;;  %6534 = vmatpush3.bf16.msra.mxu1 %v7472_v25 }
0x19e6   : > { %7541 = vpow2.f32 %v4984_v28 }
0x19ef   : > { %v7540_v29 = vpop.eup %7539 }
0x19f0   : > { %v4986_v30 = vsel %vm1261_vm2, %v7540_v29, 0.0 }
0x19f1   : > { %4987 = vadd.xlane.f32.xlu0 %v4986_v30 }
0x19f3   : > { %v7542_v56 = vpop.eup %7541 }
0x19f4   : > { %v4989_v31 = vsel %vm1261_vm2, %v7542_v56, 0.0  ;;  %v4992_v33 = vpack.c.bf16 %v7542_v56, %v7540_v29 }
0x19f5   : > { %4990 = vadd.xlane.f32.xlu1 %v4989_v31 }
0x19f6   : > { %7176 = vmatmul.mubr.msk.bf16.vlgmr.msra.gmra.mxu0 %vm1261_vm2, %v4992_v33 }
0x19f7   : > { %7183 = vmatprep.mubr.msk.bf16.mxu0 %vm7620_vm0, %v7619_v1  ;;  %7180 = vmatpush3.bf16.msra.mxu0 %v7437_v34  ;;  %v6208_v34 = vld [vmem:[%s9198_s20] ss:$0 sm:$0xff] }
0x19f8   : > { %7181 = vmatprep.subr.bf16.mxu0 %v7619_v1 }
0x19fb   : > { %7182 = vmatpush3.bf16.msra.mxu0 %v7438_v35 }
0x19fc   : > { %5252 = vmatprep.subr.bf16.mxu0 %v7441_v51 }
0x1a7a   : > { %v4988_v36 = vpop.xlane.xlu0 %4987 }
0x1a7b   : > { %7543 = vrcp.f32 %v4988_v36 }
0x1a7e   : > { %v4991_v37 = vpop.xlane.xlu1 %4990 }
0x1a7f   : > { %7545 = vrcp.f32 %v4991_v37 }
0x1a88   : > { %v7544_v57 = vpop.eup %7543 }
0x1a8c   : > { %v7546_v40 = vpop.eup %7545 }
0x1ab6   : > { %v5031_v38 = vpop.f32.mrf.mxu0 }
0x1ab7   : > { %v5040_v41 = vmul.f32 %v7544_v57, %v5031_v38  ;;  %v6209_v38 = vld [vmem:[%s9199_s21] ss:$0 sm:$0xff] }
0x1ab8   : > { %v7177_v39 = vpop.f32.mrf.mxu0 }
0x1aba   : > { %v5034_v59 = vpop.f32.mrf.mxu0 }
0x1abb   : > { %v5041_v42 = vmul.f32 %v7546_v40, %v5034_v59 }
0x1abc   : > { %v7178_v43 = vpop.f32.mrf.mxu0 }
0x1abd   : > { %v5042_v44 = vpack.c.bf16 %v5041_v42, %v5040_v41  ;;  %v7473_v41 = vld [vmem:[%s9202_s24 + $0x50] sm:$0xff]   ;;  %v7475_v43 = vld [vmem:[%s9202_s24 + $0x48] sm:$0xff]  }
0x1abe   : > { %v7474_v42 = vld [vmem:[%s9202_s24 + $0x10] sm:$0xff]   ;;  %6535 = vmatprep.subr.bf16.mxu1 %v7473_v41 }
0x1abf   : > { %7184 = vmatmul.mubr.msk.bf16.vlgmr.msra.gmra.mxu0 %vm1213_vm1, %v5042_v44  ;;  %6536 = vmatpush3.bf16.msra.mxu1 %v7474_v42  ;;  %v7476_v44 = vld [vmem:[%s9202_s24 + $0x8] sm:$0xff]  }
0x1ac0   : > { %5253 = vmatpush1.bf16.msra.mxu0 %v7439_v50  ;;  %5284 = vmatprep.mubr.bf16.mxu0 %v7621_v32 }
0x1ac1   : > { %5254 = vmatprep.subr.bf16.mxu0 %v7444_v60  ;;  %6537 = vmatprep.subr.bf16.mxu1 %v7475_v43 }
0x1ac3   : > { %6538 = vmatpush3.bf16.msra.mxu1 %v7476_v44 }
0x1ac4   : > { %5255 = vmatpush1.bf16.msra.mxu0 %v7442_v61 }
0x1ac5   : > { %5256 = vmatprep.subr.bf16.mxu0 %v7447_v63 }
0x1ac8   : > { %5257 = vmatpush1.bf16.msra.mxu0 %v7445_v0 }
0x1ac9   : > { %5258 = vmatprep.subr.bf16.mxu0 %v7450_v3 }
0x1acc   : > { %5259 = vmatpush1.bf16.msra.mxu0 %v7448_v2 }
0x1acd   : > { %5260 = vmatprep.subr.bf16.mxu0 %v7453_v62  ;;  %v6226_v62 = vld [vmem:[%s9203_s25] ss:$0 sm:$0xff] }
0x1ad0   : > { %5261 = vmatpush1.bf16.msra.mxu0 %v7451_v4 }
0x1ad1   : > { %5262 = vmatprep.subr.bf16.mxu0 %v7456_v54 }
0x1ad4   : > { %5263 = vmatpush1.bf16.msra.mxu0 %v7454_v5 }
0x1ad5   : > { %5264 = vmatprep.subr.bf16.mxu0 %v7459_v6 }
0x1ad8   : > { %5265 = vmatpush1.bf16.msra.mxu0 %v7457_v7 }
0x1ad9   : > { %5266 = vmatprep.subr.bf16.mxu0 %v7462_v8 }
0x1adc   : > { %5267 = vmatpush1.bf16.msra.mxu0 %v7460_v9 }
0x1b7f   : > { %v5092_v1 = vpop.f32.mrf.mxu0 }
0x1b80   : > { %v5099_v45 = vadd.f32 %v5092_v1, %v8971_v53  ;;  %v7477_v1 = vld [vmem:[%s9202_s24 + $0x40] sm:$0xff]  }
0x1b81   : > { %v7185_v21 = vpop.f32.mrf.mxu0  ;;  %6539 = vmatprep.subr.bf16.mxu1 %v7477_v1 }
0x1b82   : > { %v5101_v46 = vadd.f32 %v5099_v45, %v8495_v18  ;;  %v7478_v45 = vld [vmem:[%s9202_s24] sm:$0xff]   ;;  %v5162_v21 = vlaneseq }
0x1b83   : > { %v5095_v47 = vpop.f32.mrf.mxu0  ;;  %6540 = vmatpush3.bf16.msra.mxu1 %v7478_v45 }
0x1b84   : > { %v5100_v48 = vadd.f32 %v5095_v47, %v8974_v55  ;;  %5105 = vadd.xlane.f32.xlu0 %v5101_v46 }
0x1b85   : > { %v7186_v49 = vpop.f32.mrf.mxu0 }
0x1b86   : > { %v5102_v19 = vadd.f32 %v5100_v48, %v8497_v20  ;;  %v5160_v49 = vld [vmem:[%s9201_s23] sm:$0x3] }
0x1b88   : > { %5107 = vadd.xlane.f32.xlu1 %v5102_v19 }
0x1c0d   : > { %v5106_v52 = vpop.xlane.xlu0 %5105 }
0x1c0e   : > { %v5109_v18 = vmul.f32 0.0078125, %v5106_v52 }
0x1c10   : > { %v9011_v53 = vsub.f32 %v5101_v46, %v5109_v18  ;;  %v5163_v46 = vshrl.u32 %v5162_v21, 7 }
0x1c11   : > { %v5108_v17 = vpop.xlane.xlu1 %5107 }
0x1c12   : > { %v5110_v22 = vmul.f32 0.0078125, %v5108_v17  ;;  %v5113_v20 = vmul.f32 %v9011_v53, %v9011_v53  ;;  %v5168_v47 = vsub.s32 1, %v5163_v46  ;;  %v5164_v48 = vsub.s32 0, %v5163_v46 }
0x1c14   : > { %v9015_v55 = vsub.f32 %v5102_v19, %v5110_v22  ;;  %5115 = vadd.xlane.f32.xlu0 %v5113_v20  ;;  %v5169_v50 = vrot.slane %v5160_v49, %v5168_v47  ;;  %v5165_v51 = vrot.slane %v5160_v49, %v5164_v48 }
0x1c16   : > { %v5114_v58 = vmul.f32 %v9015_v55, %v9015_v55 }
0x1c18   : > { %5117 = vadd.xlane.f32.xlu1 %v5114_v58 }
0x1c9d   : > { %v5116_v26 = vpop.xlane.xlu0 %5115 }
0x1c9e   : > { %v5119_v27 = vmul.f32 0.0078125, %v5116_v26 }
0x1ca0   : > { %v5121_v28 = vadd.f32 1e-05, %v5119_v27 }
0x1ca1   : > { %v5118_v29 = vpop.xlane.xlu1 %5117 }
0x1ca2   : > { %7547 = vrsqrt.f32 %v5121_v28  ;;  %v5120_v30 = vmul.f32 0.0078125, %v5118_v29 }
0x1ca4   : > { %v5122_v56 = vadd.f32 1e-05, %v5120_v30 }
0x1ca6   : > { %7549 = vrsqrt.f32 %v5122_v56 }
0x1caf   : > { %v7548_v31 = vpop.eup %7547 }
0x1cb0   : > { %v5125_v33 = vmul.f32 %v7548_v31, %v9011_v53  ;;  %v6243_v31 = vld [vmem:[%s9275_s4] ss:$0 sm:$0xff]  ;;  %s9138_s4 = scalar_lea.sflag [#allocation3], %s851_s12 }
0x1cb2   : > { %v5133_v37 = vmul.f32 %v6208_v34, %v5125_v33 }
0x1cb3   : > { %v7550_v35 = vpop.eup %7549 }
0x1cb4   : > { %v5126_v36 = vmul.f32 %v7550_v35, %v9015_v55  ;;  %v5141_v57 = vadd.f32 %v6209_v38, %v5133_v37 }
0x1cb6   : > { %v5134_v39 = vmul.f32 %v6208_v34, %v5126_v36  ;;  %v6244_v34 = vld [vmem:[%s9276_s8] ss:$0 sm:$0xff] }
0x1cb8   : > { %v5142_v40 = vadd.f32 %v6209_v38, %v5134_v39 }
0x1cba   : > { %v5143_v59 = vpack.c.bf16 %v5142_v40, %v5141_v57 }
0x1cbc   : > { %5285 = vmatmul.mubr.bf16.vlgmr.msra.gmra.mxu0 %v5143_v59 }
0x1d7c   : > { %v5286_v19 = vpop.f32.mrf.mxu0 }
0x1d7d   : > { %v5287_v22 = vadd.f32 %v5286_v19, %v5165_v51 }
0x1d7e   : > { %v5288_v52 = vpop.f32.mrf.mxu0 }
0x1d7f   : > { %v5289_v53 = vadd.f32 %v5288_v52, %v5169_v50  ;;  %v5295_v63 = vmax.f32 %v5287_v22, 0.0 }
0x1d80   : > { %v5290_v18 = vpop.f32.mrf.mxu0 }
0x1d81   : > { %v5291_v17 = vadd.f32 %v5290_v18, %v5165_v51  ;;  %v5296_v60 = vmax.f32 %v5289_v53, 0.0 }
0x1d82   : > { %v5292_v20 = vpop.f32.mrf.mxu0 }
0x1d83   : > { %v5293_v55 = vadd.f32 %v5292_v20, %v5169_v50  ;;  %v5297_v58 = vmax.f32 %v5291_v17, 0.0 }
0x1d85   : > { %v5298_v61 = vmax.f32 %v5293_v55, 0.0  ;;  %v5299_v2 = vpack.c.bf16 %v5297_v58, %v5295_v63 }
0x1d87   : > { %v5300_v0 = vpack.c.bf16 %v5298_v61, %v5296_v60 }
0x1d89   : > { %5468 = vmatprep.mubr.bf16.mxu1 %v5300_v0 }
0x1d8a   : > { %5469 = vmatmul.mubr.bf16.vlgmr.msra.gmra.mxu1 %v5299_v2 }
0x1e4a   : > { %v6541_v3 = vpop.f32.mrf.mxu1 }
0x1e4c   : > { %v6542_v4 = vpop.f32.mrf.mxu1 }
0x1e4d   : > { %v6543_v54 = vadd.f32 %v6542_v4, %v6541_v3 }
0x1e4e   : > { %v6544_v32 = vpop.f32.mrf.mxu1 }
0x1e4f   : > { %v5471_v5 = vadd.f32 %v6543_v54, %v6226_v62 }
0x1e50   : > { %v6545_v6 = vpop.f32.mrf.mxu1 }
0x1e51   : > { %v6546_v7 = vadd.f32 %v6545_v6, %v6544_v32  ;;  %v5477_v8 = vadd.f32 %v5471_v5, %v5141_v57 }
0x1e53   : > { %v5474_v9 = vadd.f32 %v6546_v7, %v6226_v62  ;;  %5481 = vadd.xlane.f32.xlu0 %v5477_v8 }
0x1e55   : > { %v5478_v10 = vadd.f32 %v5474_v9, %v5142_v40 }
0x1e57   : > { %5483 = vadd.xlane.f32.xlu1 %v5478_v10 }
0x1edc   : > { %v5482_v11 = vpop.xlane.xlu0 %5481 }
0x1edd   : > { %v5485_v12 = vmul.f32 0.0078125, %v5482_v11 }
0x1edf   : > { %v5487_v13 = vsub.f32 %v5477_v8, %v5485_v12 }
0x1ee0   : > { %v5484_v14 = vpop.xlane.xlu1 %5483 }
0x1ee1   : > { %v5486_v15 = vmul.f32 0.0078125, %v5484_v14  ;;  %v5489_v16 = vmul.f32 %v5487_v13, %v5487_v13 }
0x1ee3   : > { %v5488_v23 = vsub.f32 %v5478_v10, %v5486_v15  ;;  %5491 = vadd.xlane.f32.xlu0 %v5489_v16 }
0x1ee5   : > { %v5490_v24 = vmul.f32 %v5488_v23, %v5488_v23 }
0x1ee7   : > { %5493 = vadd.xlane.f32.xlu1 %v5490_v24 }
0x1f6c   : > { %v5492_v25 = vpop.xlane.xlu0 %5491 }
0x1f6d   : > { %v5495_v26 = vmul.f32 0.0078125, %v5492_v25 }
0x1f6f   : > { %v5497_v27 = vadd.f32 1e-05, %v5495_v26 }
0x1f70   : > { %v5494_v28 = vpop.xlane.xlu1 %5493 }
0x1f71   : > { %7551 = vrsqrt.f32 %v5497_v27  ;;  %v5496_v29 = vmul.f32 0.0078125, %v5494_v28 }
0x1f73   : > { %v5498_v30 = vadd.f32 1e-05, %v5496_v29 }
0x1f75   : > { %7553 = vrsqrt.f32 %v5498_v30 }
0x1f7e   : > { %v7552_v56 = vpop.eup %7551 }
0x1f7f   : > { %v5501_v33 = vmul.f32 %v7552_v56, %v5487_v13 }
0x1f81   : > { %v5509_v35 = vmul.f32 %v6243_v31, %v5501_v33 }
0x1f82   : > { %v7554_v36 = vpop.eup %7553 }
0x1f83   : > { %v5502_v37 = vmul.f32 %v7554_v36, %v5488_v23  ;;  %v5517_v38 = vadd.f32 %v6244_v34, %v5509_v35 }
0x1f85   : > { %v5510_v39 = vmul.f32 %v6243_v31, %v5502_v37  ;;  %5519 = vst [vmem:[%s853_s2] sm:$0xff] %v5517_v38 }
0x1f87   : > { %v5518_v57 = vadd.f32 %v6244_v34, %v5510_v39 }
0x1f89   : > { %5520 = vst [vmem:[%s853_s2 + $0x8] sm:$0xff] %v5518_v57 }
0x1f8a   : > { %7570 = shalt.err (!%p7567_p3)
}
0x1f8b   : > { %s7571_s11 = scalar_lea.hbm %s9134_s1, 256  ;;  %s7575_s8 = scalar_lea.hbm %s9278_s10, 512 }
0x1f8c   : > { %p7572_p4 = scmp.ne.s32.totalorder %s9134_s1, %s7571_s11  ;;  %p7576_p9 = scmp.lt.s32.totalorder %s9134_s1, %s9278_s10 }
0x1f8d   : > { %p7577_p10 = scmp.lt.s32.totalorder %s7575_s8, %s7571_s11 }
0x1f8e   : > { %p7573_p7 = pnand %p7572_p4, %p7808_p5 }
0x1f8f   : > { %p7578_p11 = por %p7577_p10, %p7576_p9 }
0x1f90   : > { %p7574_p8 = pneg %p7573_p7 }
0x1f92   : > { %p7579_p12 = pnand %p7578_p11, %p7574_p8 }
0x1f94   : > { %7582 = shalt.err (!%p7579_p12)
}
0x1f95   : > { %s7623_s9 = smov 128   ;;  %s7624_s7 = smov 8  }
0x1f96   : > { %7187 = dma.vmem_to_hbm [thread:$0]  (%p7808_p5), %s9136_s6, 256, %s9134_s1, %s9138_s4, %s7623_s9, %s7623_s9, %s7624_s7  }
0x1f97 PF: > { %s9279_s0 = sld [smem:[#allocation7_spill]] }
0x1f98   : > { %s9280_s13 = sld [smem:[#allocation5_spill]] }
0x1f9d   : > { %p7193_p13 = scmp.ge.s32.totalorder %s9279_s0, 2 }
0x1f9e   : > { %s5550_s30 = sand.u32 1, %s9280_s13  }
0x1f9f   : > { %p7190_p0 = pnand %p7193_p13, %p7812_p6  ;;  %s5551_s11 = scalar_lea.sflag [#allocation3], %s5550_s30 }
0x1fa1   : > { %p7191_p1 = pneg %p7190_p0 }
0x1fa3   : > { %7600 = dma.done.wait (%p7191_p1), %s5551_s11, 256  }
0x1fa4   : > { %7602 = vsyncadd (%p7191_p1), %s5551_s11, 4294967040  ;;  %s9282_s30 = sld [smem:[#allocation9_spill]]  ;;  %s9285_s8 = smov %s7609_s5 }
0x1fa5   : > { %s9283_s3 = sld [smem:[#allocation6_spill]] }
0x1fa6   : > { %s9284_s9 = sld [smem:[#allocation10_spill]] }
0x1faa   : > { %p38_p2 = scmp.ge.s32.totalorder %s9282_s30, 4  }
0x1fab   : > { %s9286_s5 = smov %s9283_s3 }
0x1fac   :  { %40 = sbr.rel (!%p38_p2) target bundleno = 21 (0x15), region = 212 }
0x1fb1   :  { %5556 = vsyncpa [#allocation3], 1 }
0x1fb2   :  { %5558 = vsyncpa [#allocation3 + $0x1], 1 }

</bundles_post_ra>
